<compile_context>
chip_gen: v6e
topology: v6e:2x2x1
jax: 0.10.0
libtpu: 0.0.40
codegen_flags: <defaults>
</compile_context>

<pallas_src>
import jax
import jax.numpy as jnp
from jax.experimental import pallas as pl
from jax.experimental.pallas import tpu as pltpu

HIDDEN = 1024          # conv1 output channels (fixed by the module)
BN_EPS = 1e-5
L2_EPS = 1e-12          # F.normalize default eps
SOFTPLUS_THRESHOLD = 20.0


def _spatial_attention_kernel(x_ref, w1_ref, shift_ref, w2_ref, b2_ref,
                              out_ref, att_ref):
    # x_ref     : (TM, C_in)       input tile (f32 or bf16)
    # w1_ref    : (C_in, HIDDEN)   conv1 weight with BN scale folded in
    # shift_ref : (1, HIDDEN)      folded conv1-bias + BN shift (f32)
    # w2_ref    : (1, HIDDEN)      conv2 weight row (f32)
    # b2_ref    : (1, 1) SMEM      conv2 bias scalar
    # out_ref   : (TM, HIDDEN)     att * L2-normalized feature map
    # att_ref   : (TM, 1)          attention score (softplus output)
    y = jnp.dot(x_ref[...], w1_ref[...],
                preferred_element_type=jnp.float32) + shift_ref[...]

    # F.normalize(., p=2, dim=channel): only the per-row 1/norm scalar is
    # computed; the normalized feature map is never materialized and there is
    # no full-width divide.
    sumsq = jnp.sum(y * y, axis=-1, keepdims=True)                  # (TM, 1)
    inv_norm = 1.0 / jnp.maximum(jnp.sqrt(sumsq), L2_EPS)           # (TM, 1)

    # conv2(relu(y)) -> one scalar per row, plus bias (scalar from SMEM).
    r = jnp.maximum(y, 0.0)
    z = jnp.sum(r * w2_ref[...], axis=-1, keepdims=True) + b2_ref[0, 0]

    # Softplus(beta=1, threshold=20)
    att = jnp.where(z > SOFTPLUS_THRESHOLD, z,
                    jnp.log1p(jnp.exp(jnp.minimum(z, SOFTPLUS_THRESHOLD))))

    out_ref[...] = ((att * inv_norm) * y).astype(out_ref.dtype)
    att_ref[...] = att


def spatial_attention2d_flat(x_flat, params, *, tile_m=512,
                             compute_dtype=jnp.float32,
                             out_dtype=jnp.float32,
                             vmem_limit_bytes=32 * 1024 * 1024):
    """Channels-last core. x_flat: (M, C_in) float32.

    Returns (out_flat (M, HIDDEN), att_flat (M, 1)).  Callers with NHWC data
    should use this entry directly to avoid the NCHW<->NHWC transposes around
    the kernel (they cost as much HBM traffic as the kernel itself).

    Tuning notes (from the perf review):
      * tile_m=512 (default) approaches the HBM roofline; 1024 is fine on
        v5e/v6e (128 MiB VMEM), keep <=512 on v7x (64 MiB VMEM).
      * compute_dtype=jnp.bfloat16 halves x/w1 DMA and ~doubles MXU throughput
        on v5e (accumulation stays f32); relax verification tolerance.
      * out_dtype=jnp.bfloat16 halves the dominant (M, 1024) output store.
      * On v7x choose tile_m so M/tile_m >= 2 so both TensorCores get work.
    """
    m, c_in = x_flat.shape
    assert tile_m % 8 == 0

    # Shrink the tile for tiny inputs so we don't pad excessively.
    if m < tile_m:
        tile_m = max(8, -(-m // 8) * 8)

    m_pad = pl.cdiv(m, tile_m) * tile_m
    if m_pad != m:
        x_flat = jnp.pad(x_flat, ((0, m_pad - m), (0, 0)))

    # Fold conv1 bias + BatchNorm (inference) into the conv1 weight / shift:
    #   BN(x@w1 + b1) = x@(w1*scale) + (b1*scale + beta - mean*scale)
    scale = params["gamma"] / jnp.sqrt(params["running_var"] + BN_EPS)   # (HIDDEN,)
    w1 = (params["w1"] * scale[None, :]).astype(compute_dtype)           # (C_in, HIDDEN)
    shift = (params["b1"] * scale + params["beta"]
             - params["running_mean"] * scale).reshape(1, HIDDEN).astype(jnp.float32)
    w2 = params["w2"].reshape(1, HIDDEN).astype(jnp.float32)
    b2 = params["b2"].reshape(1, 1).astype(jnp.float32)

    x_flat = x_flat.astype(compute_dtype)

    grid = (m_pad // tile_m,)

    out_flat, att_flat = pl.pallas_call(
        _spatial_attention_kernel,
        out_shape=(
            jax.ShapeDtypeStruct((m_pad, HIDDEN), out_dtype),
            jax.ShapeDtypeStruct((m_pad, 1), jnp.float32),
        ),
        grid_spec=pltpu.PrefetchScalarGridSpec(
            num_scalar_prefetch=0,
            grid=grid,
            in_specs=[
                pl.BlockSpec((tile_m, c_in), lambda i: (i, 0)),
                pl.BlockSpec((c_in, HIDDEN), lambda i: (0, 0)),
                pl.BlockSpec((1, HIDDEN), lambda i: (0, 0)),
                pl.BlockSpec((1, HIDDEN), lambda i: (0, 0)),
                pl.BlockSpec(memory_space=pltpu.MemorySpace.SMEM),
            ],
            out_specs=[
                pl.BlockSpec((tile_m, HIDDEN), lambda i: (i, 0)),
                # NOTE: (tile_m, 1) att store is lane-sparse, but it is only
                # ~0.1% of the output bytes (1/1024 of the main store), so the
                # guaranteed-correct layout is kept.
                pl.BlockSpec((tile_m, 1), lambda i: (i, 0)),
            ],
        ),
        compiler_params=pltpu.CompilerParams(
            dimension_semantics=("parallel",),
            vmem_limit_bytes=vmem_limit_bytes,
        ),
    )(x_flat, w1, shift, w2, b2)

    return out_flat[:m], att_flat[:m]


def spatial_attention2d(x_nchw, params, **kwargs):
    """NCHW wrapper matching the PyTorch module interface."""
    n, c_in, h, w = x_nchw.shape
    x_flat = jnp.transpose(x_nchw, (0, 2, 3, 1)).reshape(n * h * w, c_in)
    out_flat, att_flat = spatial_attention2d_flat(x_flat, params, **kwargs)
    out = jnp.transpose(out_flat.reshape(n, h, w, HIDDEN), (0, 3, 1, 2))
    att = jnp.transpose(att_flat.reshape(n, h, w, 1), (0, 3, 1, 2))
    return out, att


def _reference(x_nchw, params):
    """Pure-JAX reference of the same forward pass (unfused, for verification)."""
    n, c_in, h, w = x_nchw.shape
    xf = jnp.transpose(x_nchw, (0, 2, 3, 1)).reshape(-1, c_in)
    y = xf @ params["w1"] + params["b1"]
    scale = params["gamma"] / jnp.sqrt(params["running_var"] + BN_EPS)
    shift = params["beta"] - params["running_mean"] * scale
    y = y * scale + shift
    fm_norm = y / jnp.maximum(jnp.sqrt(jnp.sum(y * y, axis=-1, keepdims=True)), L2_EPS)
    r = jnp.maximum(y, 0.0)
    z = r @ params["w2"].reshape(HIDDEN, 1) + params["b2"]
    att = jnp.where(z > SOFTPLUS_THRESHOLD, z,
                    jnp.log1p(jnp.exp(jnp.minimum(z, SOFTPLUS_THRESHOLD))))
    out = att * fm_norm
    out = jnp.transpose(out.reshape(n, h, w, HIDDEN), (0, 3, 1, 2))
    att = jnp.transpose(att.reshape(n, h, w, 1), (0, 3, 1, 2))
    return out, att


def _init_params(key, c_in):
    k1, k2, k3, k4, k5, k6, k7 = jax.random.split(key, 7)
    return {
        # conv1: Conv2d(c_in, 1024, 1) -> weight (1024, c_in, 1, 1) stored as (c_in, 1024)
        "w1": 0.05 * jax.random.normal(k1, (c_in, HIDDEN), jnp.float32),
        "b1": 0.01 * jax.random.normal(k2, (HIDDEN,), jnp.float32),
        # BatchNorm2d(1024)
        "gamma": 1.0 + 0.1 * jax.random.normal(k3, (HIDDEN,), jnp.float32),
        "beta": 0.1 * jax.random.normal(k4, (HIDDEN,), jnp.float32),
        "running_mean": 0.05 * jax.random.normal(k5, (HIDDEN,), jnp.float32),
        "running_var": 1.0 + 0.1 * jax.random.uniform(k6, (HIDDEN,), jnp.float32),
        # conv2: Conv2d(1024, 1, 1) -> weight (1, 1024, 1, 1) stored as (1024,)
        "w2": 0.05 * jax.random.normal(k7, (HIDDEN,), jnp.float32),
        "b2": jnp.array([0.02], jnp.float32),
    }


if __name__ == "__main__":
    key = jax.random.PRNGKey(0)
    k_x, k_p = jax.random.split(key)

    N, C_IN, H, W = 2, 8, 16, 16          # M = N*H*W = 512
    x = jax.random.normal(k_x, (N, C_IN, H, W), jnp.float32)
    params = _init_params(k_p, C_IN)

    # tile_m=128 here so the small test exercises a multi-step grid;
    # production default is 512.
    out, att_score = spatial_attention2d(x, params, tile_m=128)
    out = jax.block_until_ready(out)
    att_score = jax.block_until_ready(att_score)

    ref_out, ref_att = _reference(x, params)
    assert out.shape == (N, HIDDEN, H, W)
    assert att_score.shape == (N, 1, H, W)
    assert jnp.allclose(out, ref_out, atol=1e-4, rtol=1e-4)
    assert jnp.allclose(att_score, ref_att, atol=1e-4, rtol=1e-4)

    print("KERNEL_OK")
</pallas_src>

<mosaic_0001>
module attributes {stable_mosaic.version = 11 : i64} {
  func.func @_spatial_attention_kernel(%arg0: i32, %arg1: memref<128x8xf32, #tpu.memory_space<vmem>>, %arg2: memref<8x1024xf32, #tpu.memory_space<vmem>>, %arg3: memref<1x1024xf32, #tpu.memory_space<vmem>>, %arg4: memref<1x1024xf32, #tpu.memory_space<vmem>>, %arg5: memref<1x1xf32, #tpu.memory_space<smem>>, %arg6: memref<128x1024xf32, #tpu.memory_space<vmem>>, %arg7: memref<128x1xf32, #tpu.memory_space<vmem>>) attributes {dimension_semantics = [#tpu.dimension_semantics<parallel>], iteration_bounds = array<i64: 4>, scalar_prefetch = 0 : i64, scratch_operands = 0 : i64, tpu.core_type = #tpu.core_type<tc>, window_params = [{transform_indices = @transform_0, window_bounds = array<i64: 128, 8>}, {pipeline_mode = #tpu.pipeline_mode<synchronous>, transform_indices = @transform_1, window_bounds = array<i64: 8, 1024>}, {pipeline_mode = #tpu.pipeline_mode<synchronous>, transform_indices = @transform_2, window_bounds = array<i64: 1, 1024>}, {pipeline_mode = #tpu.pipeline_mode<synchronous>, transform_indices = @transform_3, window_bounds = array<i64: 1, 1024>}, {transform_indices = @transform_4, window_bounds = array<i64: 1, 1>}, {transform_indices = @transform_5, window_bounds = array<i64: 128, 1024>}, {transform_indices = @transform_6, window_bounds = array<i64: 128, 1>}]} {
    %c0 = arith.constant 0 : index
    %c0_0 = arith.constant 0 : index
    %0 = vector.load %arg1[%c0, %c0_0] : memref<128x8xf32, #tpu.memory_space<vmem>>, vector<128x8xf32>
    %c0_1 = arith.constant 0 : index
    %c0_2 = arith.constant 0 : index
    %1 = vector.load %arg2[%c0_1, %c0_2] : memref<8x1024xf32, #tpu.memory_space<vmem>>, vector<8x1024xf32>
    %cst = arith.constant dense<0.000000e+00> : vector<128x1024xf32>
    %2 = tpu.matmul %0, %1, %cst {dimension_numbers = #tpu.dot_dimension_numbers<[1], [0], [0], [1], [0, 0, 1, 1], [], []>} : vector<128x8xf32>, vector<8x1024xf32>, vector<128x1024xf32> -> vector<128x1024xf32>
    %c0_3 = arith.constant 0 : index
    %c0_4 = arith.constant 0 : index
    %3 = vector.load %arg3[%c0_3, %c0_4] : memref<1x1024xf32, #tpu.memory_space<vmem>>, vector<1x1024xf32>
    %4 = vector.broadcast %3 : vector<1x1024xf32> to vector<128x1024xf32>
    %5 = arith.addf %2, %4 : vector<128x1024xf32>
    %6 = arith.mulf %5, %5 : vector<128x1024xf32>
    %cst_5 = arith.constant dense<0.000000e+00> : vector<128xf32>
    %7 = vector.multi_reduction <add>, %6, %cst_5 [1] : vector<128x1024xf32> to vector<128xf32>
    %8 = vector.shape_cast %7 : vector<128xf32> to vector<128x1xf32>
    %9 = math.sqrt %8 : vector<128x1xf32>
    %cst_6 = arith.constant 9.99999996E-13 : f32
    %10 = vector.broadcast %cst_6 : f32 to vector<128x1xf32>
    %11 = arith.maximumf %9, %10 : vector<128x1xf32>
    %cst_7 = arith.constant 1.000000e+00 : f32
    %12 = vector.broadcast %cst_7 : f32 to vector<128x1xf32>
    %13 = arith.divf %12, %11 : vector<128x1xf32>
    %cst_8 = arith.constant 0.000000e+00 : f32
    %14 = vector.broadcast %cst_8 : f32 to vector<128x1024xf32>
    %15 = arith.maximumf %5, %14 : vector<128x1024xf32>
    %c0_9 = arith.constant 0 : index
    %c0_10 = arith.constant 0 : index
    %16 = vector.load %arg4[%c0_9, %c0_10] : memref<1x1024xf32, #tpu.memory_space<vmem>>, vector<1x1024xf32>
    %17 = vector.broadcast %16 : vector<1x1024xf32> to vector<128x1024xf32>
    %18 = arith.mulf %15, %17 : vector<128x1024xf32>
    %cst_11 = arith.constant dense<0.000000e+00> : vector<128xf32>
    %19 = vector.multi_reduction <add>, %18, %cst_11 [1] : vector<128x1024xf32> to vector<128xf32>
    %20 = vector.shape_cast %19 : vector<128xf32> to vector<128x1xf32>
    %c0_12 = arith.constant 0 : index
    %c0_13 = arith.constant 0 : index
    %21 = memref.load %arg5[%c0_12, %c0_13] : memref<1x1xf32, #tpu.memory_space<smem>>
    %22 = vector.broadcast %21 : f32 to vector<128x1xf32>
    %23 = arith.addf %20, %22 : vector<128x1xf32>
    %cst_14 = arith.constant 2.000000e+01 : f32
    %24 = vector.broadcast %cst_14 : f32 to vector<128x1xf32>
    %25 = arith.cmpf ogt, %23, %24 : vector<128x1xf32>
    %cst_15 = arith.constant 2.000000e+01 : f32
    %26 = vector.broadcast %cst_15 : f32 to vector<128x1xf32>
    %27 = arith.minimumf %23, %26 : vector<128x1xf32>
    %28 = math.exp %27 : vector<128x1xf32>
    %29 = math.log1p %28 : vector<128x1xf32>
    %30 = arith.select %25, %23, %29 : vector<128x1xi1>, vector<128x1xf32>
    %31 = arith.mulf %30, %13 : vector<128x1xf32>
    %32 = vector.broadcast %31 : vector<128x1xf32> to vector<128x1024xf32>
    %33 = arith.mulf %32, %5 : vector<128x1024xf32>
    %c0_16 = arith.constant 0 : index
    %c0_17 = arith.constant 0 : index
    %34 = vector.load %arg6[%c0_16, %c0_17] : memref<128x1024xf32, #tpu.memory_space<vmem>>, vector<128x1024xf32>
    tpu.vector_store %arg6[%c0_16, %c0_17], %33 {strides = array<i32>} : memref<128x1024xf32, #tpu.memory_space<vmem>>, vector<128x1024xf32>,
    %c0_18 = arith.constant 0 : index
    %c0_19 = arith.constant 0 : index
    %35 = vector.load %arg7[%c0_18, %c0_19] : memref<128x1xf32, #tpu.memory_space<vmem>>, vector<128x1xf32>
    tpu.vector_store %arg7[%c0_18, %c0_19], %30 {strides = array<i32>} : memref<128x1xf32, #tpu.memory_space<vmem>>, vector<128x1xf32>,
    return
  }
  func.func @transform_0(%arg0: i32) -> (i32, i32) {
    %c0_i32 = arith.constant 0 : i32
    %c0_i32_0 = arith.constant 0 : i32
    return %arg0, %c0_i32 : i32, i32
  }
  func.func @transform_1(%arg0: i32) -> (i32, i32) {
    %c0_i32 = arith.constant 0 : i32
    %c0_i32_0 = arith.constant 0 : i32
    %c0_i32_1 = arith.constant 0 : i32
    return %c0_i32, %c0_i32_0 : i32, i32
  }
  func.func @transform_2(%arg0: i32) -> (i32, i32) {
    %c0_i32 = arith.constant 0 : i32
    %c0_i32_0 = arith.constant 0 : i32
    %c0_i32_1 = arith.constant 0 : i32
    return %c0_i32, %c0_i32_0 : i32, i32
  }
  func.func @transform_3(%arg0: i32) -> (i32, i32) {
    %c0_i32 = arith.constant 0 : i32
    %c0_i32_0 = arith.constant 0 : i32
    %c0_i32_1 = arith.constant 0 : i32
    return %c0_i32, %c0_i32_0 : i32, i32
  }
  func.func @transform_4(%arg0: i32) -> (i32, i32) {
    %c0_i32 = arith.constant 0 : i32
    %c0_i32_0 = arith.constant 0 : i32
    %c0_i32_1 = arith.constant 0 : i32
    return %c0_i32, %c0_i32_0 : i32, i32
  }
  func.func @transform_5(%arg0: i32) -> (i32, i32) {
    %c0_i32 = arith.constant 0 : i32
    %c0_i32_0 = arith.constant 0 : i32
    return %arg0, %c0_i32 : i32, i32
  }
  func.func @transform_6(%arg0: i32) -> (i32, i32) {
    %c0_i32 = arith.constant 0 : i32
    %c0_i32_0 = arith.constant 0 : i32
    return %arg0, %c0_i32 : i32, i32
  }
}

</mosaic_0001>

<bundles_post_ra>
// kernel: tpu_custom_call.1
= control target key start
LH: loop header
LB: loop body
LE: loop exit
PB: predicated region body
PF: predicated region fallthrough
CT: control target
= control target key end

     0   :  { %s5704_s0 = inlined_call_operand.vmem [shape: f32[512,8], index: 0, kind: input, shape index: {}]   ;;  %s5705_s1 = inlined_call_operand.hbm [shape: f32[8,1024], index: 1, kind: input, shape index: {}]   ;;  %s5706_s2 = inlined_call_operand.hbm [shape: f32[1,1024], index: 2, kind: input, shape index: {}]   ;;  %s5707_s3 = inlined_call_operand.hbm [shape: f32[1,1024], index: 3, kind: input, shape index: {}]   ;;  %s5708_s4 = inlined_call_operand.<no memory space> [shape: f32[1,1], index: 4, kind: input, shape index: {}]   ;;  %s5709_s5 = inlined_call_operand.hbm [shape: f32[512,1024], index: 5, kind: output, shape index: {0}]   ;;  %s5710_s6 = inlined_call_operand.vmem [shape: f32[512,1], index: 6, kind: output, shape index: {1}]  }
   0x1   :  { %12 = sst [smem:[#allocation2]] %s5708_s4 }
   0x2   :  { %13 = vsyncpa [#allocation4], 0 }
   0x3   :  { %14 = vsyncpa [#allocation7], 0 }
   0x4   :  { %15 = vsyncpa [#allocation5], 0 }
   0x5   :  { %17 = vsyncpa [#allocation5 + $0x1], 0  ;;  %s3093_s23 = smov 0   ;;  %s3095_s24 = smov 0  }
   0x6   :  { %s3097_s25 = smov 0   ;;  %s3099_s26 = smov 0  }
   0x7 LB: > { %s3114_s4 = sadd.s32 4294967295, %s3046_s26   ;;  %s2612_s27 = sadd.s32 4294967294, %s3046_s26   ;;  %s3046_s26 = sphi %s3099_s26, %s6148_s26   ;;  %s3042_s25 = sphi %s3097_s25, %s6147_s25   ;;  %s3038_s24 = sphi %s3095_s24, %s6146_s24   ;;  %s3034_s23 = sphi %s3093_s23, %s6145_s23  }
   0x8   : > { %s3118_s28 = sadd.s32 1, %s3046_s26   ;;  %s140_s29 = sadd.s32 1, %s3042_s25 }
   0x9   : > { %s137_s30 = ssub.s32 %s3046_s26, %s3118_s28  ;;  %p150_p0 = scmp.ne.s32.totalorder %s3042_s25, %s3038_s24 }
   0xa   : > { %p138_p1 = scmp.eq.s32.totalorder %s137_s30, 0  ;;  %p151_p2 = scmp.eq.s32.totalorder %s3114_s4, 3 }
   0xb   : > { %p156_p3 = scmp.ne.s32.totalorder %s3038_s24, %s3034_s23  ;;  %p157_p4 = scmp.eq.s32.totalorder %s2612_s27, 3 }
   0xc   : > { %s3129_s7 = scalar_select %p138_p1, %s3042_s25, %s140_s29  }
   0xd   : > { %p3131_p5 = por %p151_p2, %p150_p0  ;;  %p3135_p6 = por %p157_p4, %p156_p3 }
   0xe   : > { %p2613_p7 = scmp.ge.s32.totalorder %s3046_s26, 1  ;;  %p190_p8 = scmp.lt.s32.totalorder %s3046_s26, 5 }
   0xf   : > { %s5822_s8 = scalar_select %p3131_p5, 1, 0 }
  0x10   : > { %s5823_s9 = scalar_select %p3135_p6, 1, 0 }
  0x11   : > { %p5711_p9 = scmp.eq.s32.totalorder %s3114_s4, 0  ;;  %p3142_p10 = pnand %p2613_p7, %p190_p8 }
  0x12   : > { %s3048_s11 = smov [#allocation6]   ;;  %s3049_s13 = smov [#allocation3]  }
  0x13   : > { %s5824_s10 = scalar_select %p3142_p10, 1, 0 }
  0x14   : > { %s214_s12 = sshll.u32 %s3048_s11, 4  ;;  %p2713_p11 = pneg %p3142_p10  ;;  %s215_s12 = int_to_ptr.vmem [resolvable:$true] %s214_s12 }
  0x15   : > { %s203_s14 = sshll.u32 %s3049_s13, 4  ;;  %s3050_s16 = smov [#allocation8]   ;;  %s204_s14 = int_to_ptr.vmem [resolvable:$true] %s203_s14 }
  0x16   : > { %p3150_p12 = pnand %p5711_p9, %p2713_p11  ;;  %s225_s17 = sshll.u32 %s3050_s16, 4  ;;  %s3154_s17 = int_to_ptr.vmem [resolvable:$true] %s225_s17 }
  0x17   : > { %s2911_s18 = scalar_lea.vmem %s215_s12, 128  ;;  %p2919_p3 = scmp.lt.s32.totalorder %s215_s12, %s215_s12 }
  0x18   : > { %p2902_p13 = pneg %p3150_p12  ;;  %p2912_p0 = scmp.ne.s32.totalorder %s215_s12, %s2911_s18 }
  0x19   : > { %p2920_p4 = scmp.lt.s32.totalorder %s2911_s18, %s2911_s18 }
  0x1a   : > { %p2914_p1 = pnand %p2912_p0, %p2902_p13 }
  0x1b   : > { %p2921_p7 = por %p2920_p4, %p2919_p3 }
  0x1c   : > { %p2915_p2 = pneg %p2914_p1 }
  0x1e   : > { %p2922_p8 = pnand %p2921_p7, %p2915_p2 }
  0x20   : > { %2925 = shalt.err (!%p2922_p8)
}
  0x21   : > { %2719 = dma.hbm_to_vmem [thread:$0]  (!%p3150_p12), %s5706_s2, 128, %s215_s12, [#allocation7]  }
  0x22   : > { %s2937_s21 = scalar_lea.vmem %s204_s14, 1024  ;;  %p2945_p0 = scmp.lt.s32.totalorder %s204_s14, %s204_s14 }
  0x23   : > { %p2938_p11 = scmp.ne.s32.totalorder %s204_s14, %s2937_s21  ;;  %p2946_p1 = scmp.lt.s32.totalorder %s2937_s21, %s2937_s21 }
  0x25   : > { %p2940_p9 = pnand %p2938_p11, %p2902_p13  ;;  %p2947_p5 = por %p2946_p1, %p2945_p0 }
  0x27   : > { %p2941_p6 = pneg %p2940_p9 }
  0x29   : > { %p2948_p10 = pnand %p2947_p5, %p2941_p6 }
  0x2b   : > { %2951 = shalt.err (!%p2948_p10)
}
  0x2c   : > { %2716 = dma.hbm_to_vmem [thread:$0]  (!%p3150_p12), %s5705_s1, 1024, %s204_s14, [#allocation4]  }
  0x2d   : > { %s2963_s29 = scalar_lea.vmem %s3154_s17, 128  ;;  %p2971_p4 = scmp.lt.s32.totalorder %s3154_s17, %s3154_s17 }
  0x2e   : > { %p2964_p2 = scmp.ne.s32.totalorder %s3154_s17, %s2963_s29  ;;  %p2972_p5 = scmp.lt.s32.totalorder %s2963_s29, %s2963_s29 }
  0x30   : > { %p2966_p9 = pnand %p2964_p2, %p2902_p13  ;;  %p2973_p6 = por %p2972_p5, %p2971_p4 }
  0x32   : > { %p2967_p3 = pneg %p2966_p9 }
  0x34   : > { %p2974_p10 = pnand %p2973_p6, %p2967_p3 }
  0x36   : > { %2977 = shalt.err (!%p2974_p10)
}
  0x37   : > { %2722 = dma.hbm_to_vmem [thread:$0]  (!%p3150_p12), %s5707_s3, 128, %s3154_s17, [#allocation7]  }
  0x38   : > { %p5826_p7 = scmp.ne.s32.totalorder %s5824_s10, 0 }
  0x3a   : > { %250 = sbr.rel (%p5826_p7) target bundleno = 695 (0x2b7), region = 40 }
  0x3f   : > { %p5827_p8 = scmp.eq.s32.totalorder %s3114_s4, 0 }
  0x41   : > { %3021 = dma.done.wait (%p5827_p8), [#allocation4], 1024   ;;  %p5828_p13 = pmov %p5827_p8 }
  0x42   : > { %p5829_p11 = pmov %p5827_p8 }
  0x43   : > { %3023 = vsyncadd (%p5828_p13), [#allocation4], 4294966272 }
  0x44   : > { %3025 = dma.done.wait (%p5829_p11), [#allocation7], 256   ;;  %p5830_p0 = pmov %p5827_p8 }
  0x45   : > { %s2623_s12 = sshll.u32 %s3114_s4, 4  ;;  %v3051_v0 = vmov 0.0   ;;  %v323_v1 = vld [vmem:[#allocation3 + $0x8] sm:$0xff]  ;;  %v322_v2 = vld [vmem:[#allocation3] sm:$0xff]  ;;  %vm372_vm0 = vcmask 64512   ;;  %v325_v5 = vld [vmem:[#allocation3 + $0x18] sm:$0xff]  ;;  %v332_v25 = vlaneseq }
  0x46   : > { %3027 = vsyncadd (%p5830_p0), [#allocation7], 4294967040  ;;  %485 = vmatprep.mubr.f32.mxu0 %v3051_v0  ;;  %p294_p12 = scmp.lt.s32.totalorder %s2623_s12, 63  ;;  %646 = vmatprep.mubr.f32.mxu1 %v3051_v0  ;;  %v327_v4 = vld [vmem:[#allocation3 + $0x28] sm:$0xff]  ;;  %v326_v6 = vld [vmem:[#allocation3 + $0x20] sm:$0xff]  ;;  %s1939_s16 = sld [smem:[#allocation2]] }
  0x47   : > { %451 = vmatprep.subr.mxu0 %v323_v1  ;;  %612 = vmatprep.subr.mxu1 %v325_v5  ;;  %v324_v7 = vld [vmem:[#allocation3 + $0x10] sm:$0xff]  ;;  %v329_v8 = vld [vmem:[#allocation3 + $0x38] sm:$0xff]  ;;  %v3448_v26 = vshrl.u32 %v332_v25, 7  ;;  %v330_v28 = vld [vmem:[#allocation6] sm:$0xff]  ;;  %vm2453_vm7 = vcmask 7168   ;;  %s283_s17 = sand.u32 1, %s3038_s24  }
  0x48   : > { %s6150_s12 = smov (!%p294_p12, %s2623_s12), 63  ;;  %452 = vmatpush1.msra.mxu0 %v322_v2  ;;  %613 = vmatpush1.msra.mxu1 %v324_v7  ;;  %v328_v10 = vld [vmem:[#allocation3 + $0x30] sm:$0xff]  ;;  %v3463_v37 = vld [vmem:[#allocation8] sm:$0xff]  ;;  %s4995_s21 = sshll.u32 %s283_s17, 10 }
  0x49   : > { %s2624_s10 = sshll.u32 %s6150_s12, 3  ;;  %773 = vmatprep.subr.mxu0 %v327_v4  ;;  %934 = vmatprep.subr.mxu1 %v329_v8  ;;  %v334_v27 = vsub.s32 0, %v3448_v26  ;;  %v338_v29 = vsub.s32 1, %v3448_v26  ;;  %v342_v30 = vsub.s32 2, %v3448_v26  ;;  %v346_v34 = vsub.s32 3, %v3448_v26  ;;  %s5026_s22 = scalar_lea.vmem [#allocation9], %s4995_s21 }
  0x4a   : > { %s3208_s15 = scalar_lea.vmem %s5704_s0, %s2624_s10  ;;  %v350_v38 = vsub.s32 4, %v3448_v26  ;;  %v354_v41 = vsub.s32 5, %v3448_v26  ;;  %v358_v51 = vsub.s32 6, %v3448_v26  ;;  %v362_v55 = vsub.s32 7, %v3448_v26  ;;  %s4988_s20 = scalar_lea.vmem %s5710_s6, %s2624_s10 }
  0x4b   : > { %v3211_v3 = vld [vmem:[%s3208_s15] sm:$0xff]  ;;  %v3216_v9 = vld [vmem:[%s3208_s15 + $0x8] sm:$0xff]  ;;  %v3226_v11 = vld [vmem:[%s3208_s15 + $0x10] sm:$0xff]  ;;  %v3453_v31 = vrot.slane %v330_v28, %v334_v27  ;;  %v3455_v32 = vrot.slane %v330_v28, %v338_v29  ;;  %v3457_v33 = vrot.slane %v330_v28, %v342_v30  ;;  %v3471_v43 = vrot.slane %v3463_v37, %v338_v29  ;;  %s2698_s27 = sshll.u32 %s3114_s4, 14  ;;  %s2490_s29 = sshll.u32 %s5026_s22, 4  ;;  %s5644_s29 = int_to_ptr.vmem [resolvable:$true] %s2490_s29 }
  0x4c   : > { %2627 = vmatmul.mubr.msk.f32.vlgmr.msra.gmra.mxu0 %vm372_vm0, %v3211_v3  ;;  %2643 = vmatmul.mubr.msk.f32.vlgmr.msra.gmra.mxu1 %vm372_vm0, %v3211_v3  ;;  %v3235_v12 = vld [vmem:[%s3208_s15 + $0x18] sm:$0xff]  ;;  %v3244_v13 = vld [vmem:[%s3208_s15 + $0x20] sm:$0xff]  ;;  %v3253_v14 = vld [vmem:[%s3208_s15 + $0x28] sm:$0xff]  ;;  %v3476_v45 = vrot.slane %v330_v28, %v346_v34  ;;  %v3479_v46 = vrot.slane %v3463_v37, %v334_v27  ;;  %v3482_v47 = vrot.slane %v3463_v37, %v342_v30  ;;  %s5642_s11 = scalar_lea.hbm %s5709_s5, %s2698_s27  ;;  %s5664_s12 = scalar_lea.sflag [#allocation5], %s283_s17 }
  0x4d   : > { %774 = vmatpush1.msra.mxu0 %v326_v6  ;;  %491 = vmatprep.mubr.f32.mxu0 %v3051_v0  ;;  %v3262_v15 = vld [vmem:[%s3208_s15 + $0x30] sm:$0xff]  ;;  %v3271_v16 = vld [vmem:[%s3208_s15 + $0x38] sm:$0xff]  ;;  %v3280_v17 = vld [vmem:[%s3208_s15 + $0x40] sm:$0xff]  ;;  %v3485_v50 = vrot.slane %v3463_v37, %v346_v34  ;;  %v3490_v54 = vrot.slane %v330_v28, %v350_v38  ;;  %v3499_v61 = vrot.slane %v330_v28, %v354_v41  ;;  %s2978_s10 = scalar_lea.vmem %s5644_s29, 16384  ;;  %p6143_p2 = scmp.ne.s32.totalorder %s5822_s8, 0 }
  0x4e   : > { %652 = vmatprep.mubr.f32.mxu1 %v3051_v0  ;;  %935 = vmatpush1.msra.mxu1 %v328_v10  ;;  %v3289_v18 = vld [vmem:[%s3208_s15 + $0x48] sm:$0xff]  ;;  %v3298_v19 = vld [vmem:[%s3208_s15 + $0x50] sm:$0xff]  ;;  %v3307_v20 = vld [vmem:[%s3208_s15 + $0x58] sm:$0xff]  ;;  %v3515_v6 = vrot.slane %v3463_v37, %v350_v38  ;;  %v3517_v7 = vrot.slane %v330_v28, %v358_v51  ;;  %v3523_v10 = vrot.slane %v3463_v37, %v354_v41  ;;  %p2979_p1 = scmp.ne.s32.totalorder %s5644_s29, %s2978_s10  ;;  %s3052_s13 = smov [#allocation9]  }
  0x4f   : > { %v3316_v21 = vld [vmem:[%s3208_s15 + $0x60] sm:$0xff]  ;;  %v3325_v22 = vld [vmem:[%s3208_s15 + $0x68] sm:$0xff]  ;;  %v3334_v23 = vld [vmem:[%s3208_s15 + $0x70] sm:$0xff]  ;;  %s2982_s14 = sshll.u32 %s3052_s13, 4  ;;  %s2983_s14 = int_to_ptr.vmem [resolvable:$false] %s2982_s14 }
  0x50   : > { %2628 = vmatmul.mubr.msk.f32.gmra.mxu0 %vm372_vm0, %v3216_v9  ;;  %2644 = vmatmul.mubr.msk.f32.gmra.mxu1 %vm372_vm0, %v3216_v9  ;;  %v3343_v24 = vld [vmem:[%s3208_s15 + $0x78] sm:$0xff]  ;;  %p2980_p9 = pnand %p2979_p1, %p6143_p2  ;;  %s2984_s15 = scalar_lea.vmem %s2983_s14, 32768 }
  0x51   : > { %497 = vmatprep.mubr.f32.mxu0 %v3051_v0  ;;  %658 = vmatprep.mubr.f32.mxu1 %v3051_v0  ;;  %p2985_p4 = scmp.lt.s32.totalorder %s5644_s29, %s2983_s14  ;;  %p2986_p5 = scmp.lt.s32.totalorder %s2984_s15, %s2978_s10 }
  0x52   : > { %p2981_p3 = pneg %p2980_p9 }
  0x53   : > { %p2987_p6 = por %p2986_p5, %p2985_p4 }
  0x54   : > { %2629 = vmatmul.mubr.msk.f32.gmra.mxu0 %vm372_vm0, %v3226_v11  ;;  %2645 = vmatmul.mubr.msk.f32.gmra.mxu1 %vm372_vm0, %v3226_v11 }
  0x55   : > { %503 = vmatprep.mubr.f32.mxu0 %v3051_v0  ;;  %664 = vmatprep.mubr.f32.mxu1 %v3051_v0  ;;  %p2988_p10 = pnand %p2987_p6, %p2981_p3 }
  0x58   : > { %2630 = vmatmul.mubr.msk.f32.gmra.mxu0 %vm372_vm0, %v3235_v12  ;;  %2646 = vmatmul.mubr.msk.f32.gmra.mxu1 %vm372_vm0, %v3235_v12 }
  0x59   : > { %509 = vmatprep.mubr.f32.mxu0 %v3051_v0  ;;  %670 = vmatprep.mubr.f32.mxu1 %v3051_v0 }
  0x5c   : > { %2631 = vmatmul.mubr.msk.f32.gmra.mxu0 %vm372_vm0, %v3244_v13  ;;  %2647 = vmatmul.mubr.msk.f32.gmra.mxu1 %vm372_vm0, %v3244_v13 }
  0x5d   : > { %515 = vmatprep.mubr.f32.mxu0 %v3051_v0  ;;  %676 = vmatprep.mubr.f32.mxu1 %v3051_v0 }
  0x60   : > { %2632 = vmatmul.mubr.msk.f32.gmra.mxu0 %vm372_vm0, %v3253_v14  ;;  %2648 = vmatmul.mubr.msk.f32.gmra.mxu1 %vm372_vm0, %v3253_v14 }
  0x61   : > { %521 = vmatprep.mubr.f32.mxu0 %v3051_v0  ;;  %682 = vmatprep.mubr.f32.mxu1 %v3051_v0 }
  0x64   : > { %2633 = vmatmul.mubr.msk.f32.gmra.mxu0 %vm372_vm0, %v3262_v15  ;;  %2649 = vmatmul.mubr.msk.f32.gmra.mxu1 %vm372_vm0, %v3262_v15 }
  0x65   : > { %527 = vmatprep.mubr.f32.mxu0 %v3051_v0  ;;  %688 = vmatprep.mubr.f32.mxu1 %v3051_v0 }
  0x68   : > { %2634 = vmatmul.mubr.msk.f32.gmra.mxu0 %vm372_vm0, %v3271_v16  ;;  %2650 = vmatmul.mubr.msk.f32.gmra.mxu1 %vm372_vm0, %v3271_v16 }
  0x69   : > { %533 = vmatprep.mubr.f32.mxu0 %v3051_v0  ;;  %694 = vmatprep.mubr.f32.mxu1 %v3051_v0 }
  0x6c   : > { %2635 = vmatmul.mubr.msk.f32.gmra.mxu0 %vm372_vm0, %v3280_v17  ;;  %2651 = vmatmul.mubr.msk.f32.gmra.mxu1 %vm372_vm0, %v3280_v17 }
  0x6d   : > { %539 = vmatprep.mubr.f32.mxu0 %v3051_v0  ;;  %700 = vmatprep.mubr.f32.mxu1 %v3051_v0 }
  0x70   : > { %2636 = vmatmul.mubr.msk.f32.gmra.mxu0 %vm372_vm0, %v3289_v18  ;;  %2652 = vmatmul.mubr.msk.f32.gmra.mxu1 %vm372_vm0, %v3289_v18 }
  0x71   : > { %545 = vmatprep.mubr.f32.mxu0 %v3051_v0  ;;  %706 = vmatprep.mubr.f32.mxu1 %v3051_v0 }
  0x74   : > { %2637 = vmatmul.mubr.msk.f32.gmra.mxu0 %vm372_vm0, %v3298_v19  ;;  %2653 = vmatmul.mubr.msk.f32.gmra.mxu1 %vm372_vm0, %v3298_v19 }
  0x75   : > { %551 = vmatprep.mubr.f32.mxu0 %v3051_v0  ;;  %712 = vmatprep.mubr.f32.mxu1 %v3051_v0 }
  0x78   : > { %2638 = vmatmul.mubr.msk.f32.gmra.mxu0 %vm372_vm0, %v3307_v20  ;;  %2654 = vmatmul.mubr.msk.f32.gmra.mxu1 %vm372_vm0, %v3307_v20 }
  0x79   : > { %557 = vmatprep.mubr.f32.mxu0 %v3051_v0  ;;  %718 = vmatprep.mubr.f32.mxu1 %v3051_v0 }
  0x7c   : > { %2639 = vmatmul.mubr.msk.f32.gmra.mxu0 %vm372_vm0, %v3316_v21  ;;  %2655 = vmatmul.mubr.msk.f32.gmra.mxu1 %vm372_vm0, %v3316_v21 }
  0x7d   : > { %563 = vmatprep.mubr.f32.mxu0 %v3051_v0  ;;  %724 = vmatprep.mubr.f32.mxu1 %v3051_v0 }
  0x80   : > { %2640 = vmatmul.mubr.msk.f32.gmra.mxu0 %vm372_vm0, %v3325_v22  ;;  %2656 = vmatmul.mubr.msk.f32.gmra.mxu1 %vm372_vm0, %v3325_v22 }
  0x81   : > { %569 = vmatprep.mubr.f32.mxu0 %v3051_v0  ;;  %730 = vmatprep.mubr.f32.mxu1 %v3051_v0 }
  0x84   : > { %2641 = vmatmul.mubr.msk.f32.gmra.mxu0 %vm372_vm0, %v3334_v23  ;;  %2657 = vmatmul.mubr.msk.f32.gmra.mxu1 %vm372_vm0, %v3334_v23 }
  0x85   : > { %575 = vmatprep.mubr.f32.mxu0 %v3051_v0  ;;  %736 = vmatprep.mubr.f32.mxu1 %v3051_v0 }
  0x88   : > { %2642 = vmatmul.mubr.msk.f32.gmra.mxu0 %vm372_vm0, %v3343_v24  ;;  %2658 = vmatmul.mubr.msk.f32.gmra.mxu1 %vm372_vm0, %v3343_v24 }
  0x89   : > { %807 = vmatprep.mubr.f32.mxu0 %v3051_v0  ;;  %968 = vmatprep.mubr.f32.mxu1 %v3051_v0 }
  0x8c   : > { %2659 = vmatmul.mubr.msk.f32.vlgmr.msra.gmra.mxu0 %vm372_vm0, %v3211_v3  ;;  %2675 = vmatmul.mubr.msk.f32.vlgmr.msra.gmra.mxu1 %vm372_vm0, %v3211_v3 }
  0x8d   : > { %813 = vmatprep.mubr.f32.mxu0 %v3051_v0  ;;  %974 = vmatprep.mubr.f32.mxu1 %v3051_v0 }
  0x90   : > { %2660 = vmatmul.mubr.msk.f32.gmra.mxu0 %vm372_vm0, %v3216_v9  ;;  %2676 = vmatmul.mubr.msk.f32.gmra.mxu1 %vm372_vm0, %v3216_v9 }
  0x91   : > { %819 = vmatprep.mubr.f32.mxu0 %v3051_v0  ;;  %980 = vmatprep.mubr.f32.mxu1 %v3051_v0 }
  0x94   : > { %2661 = vmatmul.mubr.msk.f32.gmra.mxu0 %vm372_vm0, %v3226_v11  ;;  %2677 = vmatmul.mubr.msk.f32.gmra.mxu1 %vm372_vm0, %v3226_v11  ;;  %v3527_v11 = vrot.slane %v330_v28, %v362_v55 }
  0x95   : > { %825 = vmatprep.mubr.f32.mxu0 %v3051_v0  ;;  %986 = vmatprep.mubr.f32.mxu1 %v3051_v0 }
  0x98   : > { %2662 = vmatmul.mubr.msk.f32.gmra.mxu0 %vm372_vm0, %v3235_v12  ;;  %2678 = vmatmul.mubr.msk.f32.gmra.mxu1 %vm372_vm0, %v3235_v12 }
  0x99   : > { %831 = vmatprep.mubr.f32.mxu0 %v3051_v0  ;;  %992 = vmatprep.mubr.f32.mxu1 %v3051_v0 }
  0x9c   : > { %2663 = vmatmul.mubr.msk.f32.gmra.mxu0 %vm372_vm0, %v3244_v13  ;;  %2679 = vmatmul.mubr.msk.f32.gmra.mxu1 %vm372_vm0, %v3244_v13 }
  0x9d   : > { %837 = vmatprep.mubr.f32.mxu0 %v3051_v0  ;;  %998 = vmatprep.mubr.f32.mxu1 %v3051_v0 }
  0xa0   : > { %2664 = vmatmul.mubr.msk.f32.gmra.mxu0 %vm372_vm0, %v3253_v14  ;;  %2680 = vmatmul.mubr.msk.f32.gmra.mxu1 %vm372_vm0, %v3253_v14 }
  0xa1   : > { %843 = vmatprep.mubr.f32.mxu0 %v3051_v0  ;;  %1004 = vmatprep.mubr.f32.mxu1 %v3051_v0 }
  0xa4   : > { %2665 = vmatmul.mubr.msk.f32.gmra.mxu0 %vm372_vm0, %v3262_v15  ;;  %2681 = vmatmul.mubr.msk.f32.gmra.mxu1 %vm372_vm0, %v3262_v15 }
  0xa5   : > { %849 = vmatprep.mubr.f32.mxu0 %v3051_v0  ;;  %1010 = vmatprep.mubr.f32.mxu1 %v3051_v0 }
  0xa8   : > { %2666 = vmatmul.mubr.msk.f32.gmra.mxu0 %vm372_vm0, %v3271_v16  ;;  %2682 = vmatmul.mubr.msk.f32.gmra.mxu1 %vm372_vm0, %v3271_v16 }
  0xa9   : > { %855 = vmatprep.mubr.f32.mxu0 %v3051_v0  ;;  %1016 = vmatprep.mubr.f32.mxu1 %v3051_v0 }
  0xac   : > { %2667 = vmatmul.mubr.msk.f32.gmra.mxu0 %vm372_vm0, %v3280_v17  ;;  %2683 = vmatmul.mubr.msk.f32.gmra.mxu1 %vm372_vm0, %v3280_v17 }
  0xad   : > { %861 = vmatprep.mubr.f32.mxu0 %v3051_v0  ;;  %1022 = vmatprep.mubr.f32.mxu1 %v3051_v0 }
  0xb0   : > { %2668 = vmatmul.mubr.msk.f32.gmra.mxu0 %vm372_vm0, %v3289_v18  ;;  %2684 = vmatmul.mubr.msk.f32.gmra.mxu1 %vm372_vm0, %v3289_v18 }
  0xb1   : > { %867 = vmatprep.mubr.f32.mxu0 %v3051_v0  ;;  %1028 = vmatprep.mubr.f32.mxu1 %v3051_v0 }
  0xb4   : > { %2669 = vmatmul.mubr.msk.f32.gmra.mxu0 %vm372_vm0, %v3298_v19  ;;  %2685 = vmatmul.mubr.msk.f32.gmra.mxu1 %vm372_vm0, %v3298_v19 }
  0xb5   : > { %873 = vmatprep.mubr.f32.mxu0 %v3051_v0  ;;  %1034 = vmatprep.mubr.f32.mxu1 %v3051_v0 }
  0xb8   : > { %2670 = vmatmul.mubr.msk.f32.gmra.mxu0 %vm372_vm0, %v3307_v20  ;;  %2686 = vmatmul.mubr.msk.f32.gmra.mxu1 %vm372_vm0, %v3307_v20 }
  0xb9   : > { %879 = vmatprep.mubr.f32.mxu0 %v3051_v0  ;;  %1040 = vmatprep.mubr.f32.mxu1 %v3051_v0 }
  0xbc   : > { %2671 = vmatmul.mubr.msk.f32.gmra.mxu0 %vm372_vm0, %v3316_v21  ;;  %2687 = vmatmul.mubr.msk.f32.gmra.mxu1 %vm372_vm0, %v3316_v21 }
  0xbd   : > { %885 = vmatprep.mubr.f32.mxu0 %v3051_v0  ;;  %1046 = vmatprep.mubr.f32.mxu1 %v3051_v0 }
  0xc0   : > { %2672 = vmatmul.mubr.msk.f32.gmra.mxu0 %vm372_vm0, %v3325_v22  ;;  %2688 = vmatmul.mubr.msk.f32.gmra.mxu1 %vm372_vm0, %v3325_v22 }
  0xc1   : > { %891 = vmatprep.mubr.f32.mxu0 %v3051_v0  ;;  %1052 = vmatprep.mubr.f32.mxu1 %v3051_v0 }
  0xc4   : > { %2673 = vmatmul.mubr.msk.f32.gmra.mxu0 %vm372_vm0, %v3334_v23  ;;  %2689 = vmatmul.mubr.msk.f32.gmra.mxu1 %vm372_vm0, %v3334_v23 }
  0xc5   : > { %897 = vmatprep.mubr.f32.mxu0 %v3051_v0  ;;  %1058 = vmatprep.mubr.f32.mxu1 %v3051_v0 }
  0xc8   : > { %2674 = vmatmul.mubr.msk.f32.gmra.mxu0 %vm372_vm0, %v3343_v24  ;;  %2690 = vmatmul.mubr.msk.f32.gmra.mxu1 %vm372_vm0, %v3343_v24 }
 0x10c   : > { %v487_v35 = vpop.f32.mrf.mxu0  ;;  %v648_v40 = vpop.f32.mrf.mxu1 }
 0x10d   : > { %v3461_v36 = vadd.f32 %v487_v35, %v3453_v31  ;;  %v3474_v44 = vadd.f32 %v648_v40, %v3457_v33 }
 0x10e   : > { %v489_v39 = vpop.f32.mrf.mxu0  ;;  %v650_v49 = vpop.f32.mrf.mxu1 }
 0x10f   : > { %5831 = vst [vmem:[#allocation13_spill] sm:$0xff] %v3461_v36  ;;  %v3468_v42 = vadd.f32 %v489_v39, %v3455_v32  ;;  %5833 = vst [vmem:[#allocation15_spill] sm:$0xff] %v3474_v44  ;;  %v1497_v52 = vmax.f32 %v3461_v36, 0.0  ;;  %v1499_v57 = vmax.f32 %v3474_v44, 0.0  ;;  %v3503_v63 = vadd.f32 %v650_v49, %v3476_v45 }
 0x110   : > { %v493_v48 = vpop.f32.mrf.mxu0  ;;  %v654_v60 = vpop.f32.mrf.mxu1  ;;  %v1065_v2 = vmul.f32 %v3461_v36, %v3461_v36  ;;  %v1067_v13 = vmul.f32 %v3474_v44, %v3474_v44  ;;  %v3557_v49 = vrot.slane %v3463_v37, %v358_v51 }
 0x111   : > { %5832 = vst [vmem:[#allocation14_spill] sm:$0xff] %v3468_v42  ;;  %v1498_v53 = vmax.f32 %v3468_v42, 0.0  ;;  %v1066_v56 = vmul.f32 %v3468_v42, %v3468_v42  ;;  %v3497_v58 = vadd.f32 %v493_v48, %v3453_v31  ;;  %5835 = vst [vmem:[#allocation17_spill] sm:$0xff] %v3503_v63  ;;  %v3509_v1 = vadd.f32 %v654_v60, %v3457_v33 }
 0x112   : > { %v495_v59 = vpop.f32.mrf.mxu0  ;;  %v656_v5 = vpop.f32.mrf.mxu1  ;;  %v1667_v8 = vmul.f32 %v3479_v46, %v1497_v52  ;;  %v1669_v19 = vmul.f32 %v3482_v47, %v1499_v57  ;;  %v1500_v21 = vmax.f32 %v3503_v63, 0.0  ;;  %v1068_v38 = vmul.f32 %v3503_v63, %v3503_v63  ;;  %5842 = vst [vmem:[#allocation24_spill] sm:$0xff] %v3557_v49 }
 0x113   : > { %5834 = vst [vmem:[#allocation16_spill] sm:$0xff] %v3497_v58  ;;  %v1668_v62 = vmul.f32 %v3471_v43, %v1498_v53  ;;  %v3506_v0 = vadd.f32 %v495_v59, %v3455_v32  ;;  %5837 = vst [vmem:[#allocation19_spill] sm:$0xff] %v3509_v1  ;;  %v1505_v3 = vmax.f32 %v3497_v58, 0.0  ;;  %v1193_v12 = vadd.f32 %v1066_v56, %v1065_v2 }
 0x114   : > { %v499_v4 = vpop.f32.mrf.mxu0  ;;  %v1507_v15 = vmax.f32 %v3509_v1, 0.0  ;;  %v660_v17 = vpop.f32.mrf.mxu1  ;;  %v1073_v20 = vmul.f32 %v3497_v58, %v3497_v58  ;;  %v3543_v25 = vadd.f32 %v656_v5, %v3476_v45  ;;  %v1075_v30 = vmul.f32 %v3509_v1, %v3509_v1 }
 0x115   : > { %5836 = vst [vmem:[#allocation18_spill] sm:$0xff] %v3506_v0  ;;  %v1074_v9 = vmul.f32 %v3506_v0, %v3506_v0  ;;  %v1506_v14 = vmax.f32 %v3506_v0, 0.0  ;;  %v1795_v18 = vadd.f32 %v1668_v62, %v1667_v8  ;;  %v1675_v22 = vmul.f32 %v3479_v46, %v1505_v3 }
 0x116   : > { %v501_v16 = vpop.f32.mrf.mxu0  ;;  %v3540_v24 = vadd.f32 %v499_v4, %v3453_v31  ;;  %5839 = vst [vmem:[#allocation21_spill] sm:$0xff] %v3543_v25  ;;  %v662_v28 = vpop.f32.mrf.mxu1  ;;  %v3551_v35 = vadd.f32 %v660_v17, %v3457_v33  ;;  %v1677_v40 = vmul.f32 %v3482_v47, %v1507_v15  ;;  %v1194_v52 = vadd.f32 %v1193_v12, %v1067_v13 }
 0x117   : > { %v1676_v23 = vmul.f32 %v3471_v43, %v1506_v14  ;;  %v1202_v29 = vadd.f32 %v1074_v9, %v1073_v20  ;;  %v3548_v34 = vadd.f32 %v501_v16, %v3455_v32  ;;  %v1796_v59 = vadd.f32 %v1795_v18, %v1669_v19 }
 0x118   : > { %5838 = vst [vmem:[#allocation20_spill] sm:$0xff] %v3540_v24  ;;  %v505_v27 = vpop.f32.mrf.mxu0  ;;  %5841 = vst [vmem:[#allocation23_spill] sm:$0xff] %v3551_v35  ;;  %v666_v48 = vpop.f32.mrf.mxu1  ;;  %v1513_v53 = vmax.f32 %v3540_v24, 0.0  ;;  %v1670_v60 = vmul.f32 %v3485_v50, %v1500_v21  ;;  %v1081_v62 = vmul.f32 %v3540_v24, %v3540_v24  ;;  %v1508_v2 = vmax.f32 %v3543_v25, 0.0 }
 0x119   : > { %5840 = vst [vmem:[#allocation22_spill] sm:$0xff] %v3548_v34  ;;  %v1804_v39 = vadd.f32 %v1676_v23, %v1675_v22  ;;  %v1082_v56 = vmul.f32 %v3548_v34, %v3548_v34  ;;  %v1514_v57 = vmax.f32 %v3548_v34, 0.0  ;;  %v1203_v51 = vadd.f32 %v1202_v29, %v1075_v30 }
 0x11a   : > { %v507_v41 = vpop.f32.mrf.mxu0  ;;  %v668_v4 = vpop.f32.mrf.mxu1  ;;  %v1515_v8 = vmax.f32 %v3551_v35, 0.0  ;;  %v3570_v9 = vadd.f32 %v505_v27, %v3453_v31  ;;  %v1083_v14 = vmul.f32 %v3551_v35, %v3551_v35  ;;  %v1683_v18 = vmul.f32 %v3479_v46, %v1513_v53 }
 0x11b   : > { %v1684_v5 = vmul.f32 %v3471_v43, %v1514_v57  ;;  %v1805_v12 = vadd.f32 %v1804_v39, %v1677_v40  ;;  %v1211_v13 = vadd.f32 %v1082_v56, %v1081_v62  ;;  %v3575_v15 = vadd.f32 %v507_v41, %v3455_v32 }
 0x11c   : > { %v511_v3 = vpop.f32.mrf.mxu0  ;;  %5843 = vst [vmem:[#allocation25_spill] sm:$0xff] %v3570_v9  ;;  %v672_v17 = vpop.f32.mrf.mxu1  ;;  %v3579_v19 = vadd.f32 %v662_v28, %v3476_v45  ;;  %v3582_v20 = vadd.f32 %v666_v48, %v3457_v33  ;;  %v3587_v21 = vrot.slane %v3463_v37, %v362_v55  ;;  %v3589_v22 = vadd.f32 %v1194_v52, %v1068_v38 }
 0x11d   : > { %5844 = vst [vmem:[#allocation26_spill] sm:$0xff] %v3575_v15  ;;  %v3591_v23 = vadd.f32 %v1796_v59, %v1670_v60  ;;  %v1076_v27 = vmul.f32 %v3543_v25, %v3543_v25  ;;  %v1678_v29 = vmul.f32 %v3485_v50, %v1508_v2  ;;  %v1813_v39 = vadd.f32 %v1684_v5, %v1683_v18 }
 0x11e   : > { %v513_v16 = vpop.f32.mrf.mxu0  ;;  %5845 = vst [vmem:[#allocation27_spill] sm:$0xff] %v3579_v19  ;;  %5846 = vst [vmem:[#allocation28_spill] sm:$0xff] %v3582_v20  ;;  %v674_v28 = vpop.f32.mrf.mxu1  ;;  %v1685_v40 = vmul.f32 %v3482_v47, %v1515_v8  ;;  %v1521_v41 = vmax.f32 %v3570_v9, 0.0  ;;  %v1522_v26 = vmax.f32 %v3575_v15, 0.0  ;;  %v1212_v38 = vadd.f32 %v1211_v13, %v1083_v14 }
 0x11f   : > { %5847 = vst [vmem:[#allocation29_spill] sm:$0xff] %v3587_v21  ;;  %5848 = vst [vmem:[#allocation30_spill] sm:$0xff] %v3591_v23  ;;  %v3599_v37 = vadd.f32 %v1203_v51, %v1076_v27  ;;  %v3601_v55 = vadd.f32 %v1805_v12, %v1678_v29  ;;  %v1090_v48 = vmul.f32 %v3575_v15, %v3575_v15  ;;  %v1516_v57 = vmax.f32 %v3579_v19, 0.0 }
 0x120   : > { %v517_v30 = vpop.f32.mrf.mxu0  ;;  %v678_v53 = vpop.f32.mrf.mxu1  ;;  %v1089_v56 = vmul.f32 %v3570_v9, %v3570_v9  ;;  %v1523_v59 = vmax.f32 %v3582_v20, 0.0  ;;  %v3610_v60 = vadd.f32 %v511_v3, %v3453_v31  ;;  %v1084_v62 = vmul.f32 %v3579_v19, %v3579_v19 }
 0x121   : > { %5849 = vst [vmem:[#allocation31_spill] sm:$0xff] %v3599_v37  ;;  %5850 = vst [vmem:[#allocation32_spill] sm:$0xff] %v3601_v55  ;;  %v1692_v2 = vmul.f32 %v3471_v43, %v1522_v26  ;;  %v3616_v51 = vadd.f32 %v513_v16, %v3455_v32  ;;  %v3619_v5 = vadd.f32 %v672_v17, %v3457_v33 }
 0x122   : > { %v519_v52 = vpop.f32.mrf.mxu0  ;;  %5851 = vst [vmem:[#allocation33_spill] sm:$0xff] %v3610_v60  ;;  %v680_v12 = vpop.f32.mrf.mxu1  ;;  %v1814_v13 = vadd.f32 %v1813_v39, %v1685_v40  ;;  %v1691_v14 = vmul.f32 %v3479_v46, %v1521_v41  ;;  %v1091_v3 = vmul.f32 %v3582_v20, %v3582_v20  ;;  %v1529_v18 = vmax.f32 %v3610_v60, 0.0 }
 0x123   : > { %5852 = vst [vmem:[#allocation34_spill] sm:$0xff] %v3616_v51  ;;  %5853 = vst [vmem:[#allocation35_spill] sm:$0xff] %v3619_v5  ;;  %v3625_v27 = vadd.f32 %v1212_v38, %v1084_v62  ;;  %v1220_v29 = vadd.f32 %v1090_v48, %v1089_v56  ;;  %v3628_v26 = vadd.f32 %v668_v4, %v3476_v45  ;;  %v1530_v16 = vmax.f32 %v3616_v51, 0.0 }
 0x124   : > { %v523_v8 = vpop.f32.mrf.mxu0  ;;  %v684_v15 = vpop.f32.mrf.mxu1  ;;  %v1686_v9 = vmul.f32 %v3485_v50, %v1516_v57  ;;  %v1693_v39 = vmul.f32 %v3482_v47, %v1523_v59  ;;  %v1098_v40 = vmul.f32 %v3616_v51, %v3616_v51  ;;  %v1531_v41 = vmax.f32 %v3619_v5, 0.0 }
 0x125   : > { %5854 = vst [vmem:[#allocation36_spill] sm:$0xff] %v3628_v26  ;;  %v1822_v20 = vadd.f32 %v1692_v2, %v1691_v14  ;;  %v1097_v38 = vmul.f32 %v3610_v60, %v3610_v60  ;;  %v1700_v4 = vmul.f32 %v3471_v43, %v1530_v16  ;;  %v3640_v48 = vadd.f32 %v517_v30, %v3453_v31 }
 0x126   : > { %v525_v17 = vpop.f32.mrf.mxu0  ;;  %v686_v62 = vpop.f32.mrf.mxu1  ;;  %v1699_v57 = vmul.f32 %v3479_v46, %v1529_v18  ;;  %v3644_v59 = vadd.f32 %v674_v28, %v3476_v45  ;;  %v3647_v51 = vadd.f32 %v519_v52, %v3455_v32  ;;  %v3650_v2 = vadd.f32 %v678_v53, %v3457_v33 }
 0x127   : > { %5855 = vst [vmem:[#allocation37_spill] sm:$0xff] %v3640_v48  ;;  %v3652_v14 = vadd.f32 %v1814_v13, %v1686_v9  ;;  %v1221_v60 = vadd.f32 %v1220_v29, %v1091_v3  ;;  %v1524_v16 = vmax.f32 %v3628_v26, 0.0  ;;  %v1099_v30 = vmul.f32 %v3619_v5, %v3619_v5 }
 0x128   : > { %v529_v56 = vpop.f32.mrf.mxu0  ;;  %5856 = vst [vmem:[#allocation38_spill] sm:$0xff] %v3644_v59  ;;  %5857 = vst [vmem:[#allocation39_spill] sm:$0xff] %v3647_v51  ;;  %v690_v35 = vpop.f32.mrf.mxu1  ;;  %v1229_v18 = vadd.f32 %v1098_v40, %v1097_v38  ;;  %v1831_v34 = vadd.f32 %v1700_v4, %v1699_v57  ;;  %v1701_v28 = vmul.f32 %v3482_v47, %v1531_v41  ;;  %v1537_v9 = vmax.f32 %v3640_v48, 0.0 }
 0x129   : > { %5858 = vst [vmem:[#allocation40_spill] sm:$0xff] %v3650_v2  ;;  %5859 = vst [vmem:[#allocation41_spill] sm:$0xff] %v3652_v14  ;;  %v1106_v52 = vmul.f32 %v3647_v51, %v3647_v51  ;;  %v1105_v53 = vmul.f32 %v3640_v48, %v3640_v48  ;;  %v1532_v13 = vmax.f32 %v3644_v59, 0.0  ;;  %v1538_v3 = vmax.f32 %v3647_v51, 0.0 }
 0x12a   : > { %v531_v19 = vpop.f32.mrf.mxu0  ;;  %v3667_v5 = vpop.f32.mrf.mxu1  ;;  %v1823_v40 = vadd.f32 %v1822_v20, %v1693_v39  ;;  %v1092_v41 = vmul.f32 %v3628_v26, %v3628_v26  ;;  %v1107_v38 = vmul.f32 %v3650_v2, %v3650_v2  ;;  %v1539_v4 = vmax.f32 %v3650_v2, 0.0 }
 0x12b   : > { %v1238_v57 = vadd.f32 %v1106_v52, %v1105_v53  ;;  %v1708_v48 = vmul.f32 %v3471_v43, %v1538_v3  ;;  %v3676_v24 = vadd.f32 %v523_v8, %v3453_v31  ;;  %v3679_v51 = vadd.f32 %v680_v12, %v3476_v45 }
 0x12c   : > { %v3665_v29 = vpop.f32.mrf.mxu0  ;;  %v696_v1 = vpop.f32.mrf.mxu1  ;;  %v1694_v20 = vmul.f32 %v3485_v50, %v1524_v16  ;;  %v1230_v39 = vadd.f32 %v1229_v18, %v1099_v30  ;;  %v3683_v26 = vadd.f32 %v525_v17, %v3455_v32  ;;  %v3686_v0 = vadd.f32 %v684_v15, %v3457_v33 }
 0x12d   : > { %5860 = vst [vmem:[#allocation42_spill] sm:$0xff] %v3676_v24  ;;  %5861 = vst [vmem:[#allocation43_spill] sm:$0xff] %v3679_v51  ;;  %v1832_v52 = vadd.f32 %v1831_v34, %v1701_v28  ;;  %v1707_v53 = vmul.f32 %v3479_v46, %v1537_v9  ;;  %v1100_v8 = vmul.f32 %v3644_v59, %v3644_v59  ;;  %v1545_v17 = vmax.f32 %v3676_v24, 0.0 }
 0x12e   : > { %v537_v25 = vpop.f32.mrf.mxu0  ;;  %5862 = vst [vmem:[#allocation44_spill] sm:$0xff] %v3683_v26  ;;  %5863 = vst [vmem:[#allocation45_spill] sm:$0xff] %v3686_v0  ;;  %v1702_v12 = vmul.f32 %v3485_v50, %v1532_v13  ;;  %v3694_v2 = vpop.f32.mrf.mxu1  ;;  %v1709_v16 = vmul.f32 %v3482_v47, %v1539_v4  ;;  %v1114_v15 = vmul.f32 %v3683_v26, %v3683_v26  ;;  %v1546_v34 = vmax.f32 %v3683_v26, 0.0 }
 0x12f   : > { %v1840_v30 = vadd.f32 %v1708_v48, %v1707_v53  ;;  %v1239_v18 = vadd.f32 %v1238_v57, %v1107_v38  ;;  %v1113_v28 = vmul.f32 %v3676_v24, %v3676_v24  ;;  %v1108_v9 = vmul.f32 %v3679_v51, %v3679_v51 }
 0x130   : > { %v3692_v3 = vpop.f32.mrf.mxu0  ;;  %v3707_v59 = vpop.f32.mrf.mxu1  ;;  %v1540_v4 = vmax.f32 %v3679_v51, 0.0  ;;  %v1716_v58 = vmul.f32 %v3471_v43, %v1546_v34  ;;  %v1547_v63 = vmax.f32 %v3686_v0, 0.0  ;;  %v3713_v26 = vadd.f32 %v529_v56, %v3453_v31 }
 0x131   : > { %v1247_v48 = vadd.f32 %v1114_v15, %v1113_v28  ;;  %v1115_v38 = vmul.f32 %v3686_v0, %v3686_v0  ;;  %v3718_v57 = vadd.f32 %v686_v62, %v3476_v45  ;;  %v3721_v53 = vadd.f32 %v531_v19, %v3455_v32 }
 0x132   : > { %v3705_v13 = vpop.f32.mrf.mxu0  ;;  %5864 = vst [vmem:[#allocation46_spill] sm:$0xff] %v3713_v26  ;;  %v3725_v51 = vpop.f32.mrf.mxu1  ;;  %v3727_v34 = vadd.f32 %v1221_v60, %v1092_v41  ;;  %v3729_v44 = vadd.f32 %v1823_v40, %v1694_v20  ;;  %v1715_v56 = vmul.f32 %v3479_v46, %v1545_v17  ;;  %v3733_v15 = vadd.f32 %v690_v35, %v3457_v33 }
 0x133   : > { %5865 = vst [vmem:[#allocation47_spill] sm:$0xff] %v3718_v57  ;;  %5866 = vst [vmem:[#allocation48_spill] sm:$0xff] %v3721_v53  ;;  %v3735_v28 = vadd.f32 %v1230_v39, %v1100_v8  ;;  %v3737_v62 = vadd.f32 %v1832_v52, %v1702_v12  ;;  %v1841_v0 = vadd.f32 %v1840_v30, %v1709_v16  ;;  %v1553_v41 = vmax.f32 %v3713_v26, 0.0 }
 0x134   : > { %v3723_v24 = vpop.f32.mrf.mxu0  ;;  %5867 = vst [vmem:[#allocation49_spill] sm:$0xff] %v3729_v44  ;;  %5868 = vst [vmem:[#allocation50_spill] sm:$0xff] %v3733_v15  ;;  %v3739_v19 = vadd.f32 %v1239_v18, %v1108_v9  ;;  %v3743_v36 = vpop.f32.mrf.mxu1  ;;  %v1849_v60 = vadd.f32 %v1716_v58, %v1715_v56  ;;  %v1717_v40 = vmul.f32 %v3482_v47, %v1547_v63  ;;  %v1554_v20 = vmax.f32 %v3721_v53, 0.0 }
 0x135   : > { %5869 = vst [vmem:[#allocation51_spill] sm:$0xff] %v3735_v28  ;;  %5870 = vst [vmem:[#allocation52_spill] sm:$0xff] %v3737_v62  ;;  %v1710_v35 = vmul.f32 %v3485_v50, %v1540_v4  ;;  %v1248_v39 = vadd.f32 %v1247_v48, %v1115_v38  ;;  %v1548_v52 = vmax.f32 %v3718_v57, 0.0  ;;  %v1122_v8 = vmul.f32 %v3721_v53, %v3721_v53 }
 0x136   : > { %5871 = vst [vmem:[#allocation53_spill] sm:$0xff] %v3739_v19  ;;  %v3741_v42 = vpop.f32.mrf.mxu0  ;;  %v3754_v16 = vpop.f32.mrf.mxu1  ;;  %v1121_v58 = vmul.f32 %v3713_v26, %v3713_v26  ;;  %v1724_v63 = vmul.f32 %v3471_v43, %v1554_v20  ;;  %v1555_v17 = vmax.f32 %v3733_v15, 0.0  ;;  %v3762_v30 = vadd.f32 %v3665_v29, %v3453_v31 }
 0x137   : > { %v1116_v18 = vmul.f32 %v3718_v57, %v3718_v57  ;;  %v3768_v9 = vadd.f32 %v3667_v5, %v3476_v45  ;;  %v3771_v4 = vadd.f32 %v537_v25, %v3455_v32  ;;  %v3774_v48 = vadd.f32 %v696_v1, %v3457_v33 }
 0x138   : > { %v3752_v12 = vpop.f32.mrf.mxu0  ;;  %5872 = vst [vmem:[#allocation54_spill] sm:$0xff] %v3762_v30  ;;  %v3778_v56 = vpop.f32.mrf.mxu1  ;;  %v1850_v20 = vadd.f32 %v1849_v60, %v1717_v40  ;;  %v1723_v29 = vmul.f32 %v3479_v46, %v1553_v41  ;;  %v1123_v53 = vmul.f32 %v3733_v15, %v3733_v15  ;;  %v1561_v26 = vmax.f32 %v3762_v30, 0.0 }
 0x139   : > { %5873 = vst [vmem:[#allocation55_spill] sm:$0xff] %v3768_v9  ;;  %5874 = vst [vmem:[#allocation56_spill] sm:$0xff] %v3771_v4  ;;  %v1718_v5 = vmul.f32 %v3485_v50, %v1548_v52  ;;  %v1256_v57 = vadd.f32 %v1122_v8, %v1121_v58  ;;  %v1130_v25 = vmul.f32 %v3771_v4, %v3771_v4  ;;  %v1562_v1 = vmax.f32 %v3771_v4, 0.0 }
 0x13a   : > { %5875 = vst [vmem:[#allocation57_spill] sm:$0xff] %v3774_v48  ;;  %v3776_v38 = vpop.f32.mrf.mxu0  ;;  %v3790_v44 = vpop.f32.mrf.mxu1  ;;  %v1858_v60 = vadd.f32 %v1724_v63, %v1723_v29  ;;  %v1725_v40 = vmul.f32 %v3482_v47, %v1555_v17  ;;  %v1129_v41 = vmul.f32 %v3762_v30, %v3762_v30  ;;  %v1563_v15 = vmax.f32 %v3774_v48, 0.0 }
 0x13b   : > { %v1731_v52 = vmul.f32 %v3479_v46, %v1561_v26  ;;  %v1556_v8 = vmax.f32 %v3768_v9, 0.0  ;;  %v1732_v58 = vmul.f32 %v3471_v43, %v1562_v1  ;;  %v3801_v4 = vadd.f32 %v3692_v3, %v3453_v31 }
 0x13c   : > { %v3788_v62 = vpop.f32.mrf.mxu0  ;;  %v3805_v63 = vpop.f32.mrf.mxu1  ;;  %v1265_v17 = vadd.f32 %v1130_v25, %v1129_v41  ;;  %v1131_v29 = vmul.f32 %v3774_v48, %v3774_v48  ;;  %v3811_v30 = vadd.f32 %v3694_v2, %v3476_v45  ;;  %v3815_v26 = vadd.f32 %v3705_v13, %v3455_v32 }
 0x13d   : > { %5876 = vst [vmem:[#allocation58_spill] sm:$0xff] %v3801_v4  ;;  %v3817_v1 = vadd.f32 %v1841_v0, %v1710_v35  ;;  %v1867_v3 = vadd.f32 %v1732_v58, %v1731_v52  ;;  %v1733_v14 = vmul.f32 %v3482_v47, %v1563_v15  ;;  %v3822_v55 = vadd.f32 %v3707_v59, %v3457_v33 }
 0x13e   : > { %v3803_v19 = vpop.f32.mrf.mxu0  ;;  %5877 = vst [vmem:[#allocation59_spill] sm:$0xff] %v3811_v30  ;;  %5878 = vst [vmem:[#allocation60_spill] sm:$0xff] %v3815_v26  ;;  %v3826_v41 = vpop.f32.mrf.mxu1  ;;  %v3828_v48 = vadd.f32 %v1248_v39, %v1116_v18  ;;  %v3830_v2 = vadd.f32 %v1850_v20, %v1718_v5  ;;  %v1257_v21 = vadd.f32 %v1256_v57, %v1123_v53  ;;  %v1569_v35 = vmax.f32 %v3801_v4, 0.0 }
 0x13f   : > { %5879 = vst [vmem:[#allocation61_spill] sm:$0xff] %v3817_v1  ;;  %5880 = vst [vmem:[#allocation62_spill] sm:$0xff] %v3822_v55  ;;  %v1124_v0 = vmul.f32 %v3768_v9, %v3768_v9  ;;  %v1859_v13 = vadd.f32 %v1858_v60, %v1725_v40  ;;  %v1564_v15 = vmax.f32 %v3811_v30, 0.0  ;;  %v1570_v59 = vmax.f32 %v3815_v26, 0.0 }
 0x140   : > { %v3824_v25 = vpop.f32.mrf.mxu0  ;;  %5881 = vst [vmem:[#allocation63_spill] sm:$0xff] %v3828_v48  ;;  %5882 = vst [vmem:[#allocation64_spill] sm:$0xff] %v3830_v2  ;;  %v3839_v58 = vpop.f32.mrf.mxu1  ;;  %v1726_v39 = vmul.f32 %v3485_v50, %v1556_v8  ;;  %v1266_v18 = vadd.f32 %v1265_v17, %v1131_v29  ;;  %v1137_v57 = vmul.f32 %v3801_v4, %v3801_v4  ;;  %v1571_v60 = vmax.f32 %v3822_v55, 0.0 }
 0x141   : > { %v1138_v53 = vmul.f32 %v3815_v26, %v3815_v26  ;;  %v1868_v20 = vadd.f32 %v1867_v3, %v1733_v14  ;;  %v1740_v5 = vmul.f32 %v3471_v43, %v1570_v59  ;;  %v3850_v40 = vadd.f32 %v3723_v24, %v3453_v31 }
 0x142   : > { %v3837_v52 = vpop.f32.mrf.mxu0  ;;  %v3854_v2 = vpop.f32.mrf.mxu1  ;;  %v1132_v8 = vmul.f32 %v3811_v30, %v3811_v30  ;;  %v3860_v17 = vadd.f32 %v3725_v51, %v3476_v45  ;;  %v3864_v14 = vadd.f32 %v3741_v42, %v3455_v32  ;;  %v3868_v29 = vadd.f32 %v3743_v36, %v3457_v33 }
 0x143   : > { %5883 = vst [vmem:[#allocation65_spill] sm:$0xff] %v3850_v40  ;;  %v3870_v24 = vadd.f32 %v1257_v21, %v1124_v0  ;;  %v3872_v3 = vadd.f32 %v1859_v13, %v1726_v39  ;;  %v1739_v59 = vmul.f32 %v3479_v46, %v1569_v35  ;;  %v1734_v26 = vmul.f32 %v3485_v50, %v1564_v15 }
 0x144   : > { %v3852_v9 = vpop.f32.mrf.mxu0  ;;  %5884 = vst [vmem:[#allocation66_spill] sm:$0xff] %v3860_v17  ;;  %5885 = vst [vmem:[#allocation67_spill] sm:$0xff] %v3864_v14  ;;  %v3878_v51 = vpop.f32.mrf.mxu1  ;;  %v3880_v30 = vadd.f32 %v1266_v18, %v1132_v8  ;;  %v1274_v42 = vadd.f32 %v1138_v53, %v1137_v57  ;;  %v1139_v1 = vmul.f32 %v3822_v55, %v3822_v55  ;;  %v1578_v36 = vmax.f32 %v3864_v14, 0.0 }
 0x145   : > { %5886 = vst [vmem:[#allocation68_spill] sm:$0xff] %v3868_v29  ;;  %5887 = vst [vmem:[#allocation69_spill] sm:$0xff] %v3870_v24  ;;  %v3885_v21 = vadd.f32 %v1868_v20, %v1734_v26  ;;  %v1876_v0 = vadd.f32 %v1740_v5, %v1739_v59  ;;  %v1741_v13 = vmul.f32 %v3482_v47, %v1571_v60  ;;  %v1577_v35 = vmax.f32 %v3850_v40, 0.0 }
 0x146   : > { %5888 = vst [vmem:[#allocation70_spill] sm:$0xff] %v3872_v3  ;;  %v3876_v4 = vpop.f32.mrf.mxu0  ;;  %5889 = vst [vmem:[#allocation71_spill] sm:$0xff] %v3880_v30  ;;  %v3891_v39 = vpop.f32.mrf.mxu1  ;;  %v1572_v18 = vmax.f32 %v3860_v17, 0.0  ;;  %v1146_v57 = vmul.f32 %v3864_v14, %v3864_v14  ;;  %v1579_v53 = vmax.f32 %v3868_v29, 0.0  ;;  %v3899_v26 = vadd.f32 %v3752_v12, %v3453_v31 }
 0x147   : > { %5890 = vst [vmem:[#allocation72_spill] sm:$0xff] %v3885_v21  ;;  %v1748_v20 = vmul.f32 %v3471_v43, %v1578_v36  ;;  %v3904_v5 = vadd.f32 %v3754_v16, %v3476_v45  ;;  %v3908_v60 = vadd.f32 %v3776_v38, %v3455_v32  ;;  %v3912_v8 = vadd.f32 %v3778_v56, %v3457_v33 }
 0x148   : > { %v3889_v15 = vpop.f32.mrf.mxu0  ;;  %5891 = vst [vmem:[#allocation73_spill] sm:$0xff] %v3899_v26  ;;  %v3916_v14 = vpop.f32.mrf.mxu1  ;;  %v1275_v12 = vadd.f32 %v1274_v42, %v1139_v1  ;;  %v1145_v36 = vmul.f32 %v3850_v40, %v3850_v40  ;;  %v1140_v16 = vmul.f32 %v3860_v17, %v3860_v17  ;;  %v1147_v55 = vmul.f32 %v3868_v29, %v3868_v29 }
 0x149   : > { %5892 = vst [vmem:[#allocation74_spill] sm:$0xff] %v3904_v5  ;;  %5893 = vst [vmem:[#allocation75_spill] sm:$0xff] %v3908_v60  ;;  %v1877_v38 = vadd.f32 %v1876_v0, %v1741_v13  ;;  %v1747_v21 = vmul.f32 %v3479_v46, %v1577_v35  ;;  %v1585_v56 = vmax.f32 %v3899_v26, 0.0  ;;  %v1154_v3 = vmul.f32 %v3908_v60, %v3908_v60 }
 0x14a   : > { %5894 = vst [vmem:[#allocation76_spill] sm:$0xff] %v3912_v8  ;;  %v3914_v59 = vpop.f32.mrf.mxu0  ;;  %v3930_v1 = vpop.f32.mrf.mxu1  ;;  %v1742_v42 = vmul.f32 %v3485_v50, %v1572_v18  ;;  %v1283_v40 = vadd.f32 %v1146_v57, %v1145_v36  ;;  %v1586_v17 = vmax.f32 %v3908_v60, 0.0  ;;  %v1587_v24 = vmax.f32 %v3912_v8, 0.0 }
 0x14b   : > { %v1885_v29 = vadd.f32 %v1748_v20, %v1747_v21  ;;  %v1749_v0 = vmul.f32 %v3482_v47, %v1579_v53  ;;  %v1153_v13 = vmul.f32 %v3899_v26, %v3899_v26  ;;  %v1580_v35 = vmax.f32 %v3904_v5, 0.0 }
 0x14c   : > { %v3928_v30 = vpop.f32.mrf.mxu0  ;;  %v3941_v28 = vpop.f32.mrf.mxu1  ;;  %v1755_v23 = vmul.f32 %v3479_v46, %v1585_v56  ;;  %v1756_v18 = vmul.f32 %v3471_v43, %v1586_v17  ;;  %v3947_v57 = vadd.f32 %v3788_v62, %v3453_v31  ;;  %v3951_v21 = vadd.f32 %v3790_v44, %v3476_v45 }
 0x14d   : > { %v1292_v53 = vadd.f32 %v1154_v3, %v1153_v13  ;;  %v1155_v20 = vmul.f32 %v3912_v8, %v3912_v8  ;;  %v3957_v36 = vadd.f32 %v3803_v19, %v3455_v32  ;;  %v3961_v56 = vadd.f32 %v3805_v63, %v3457_v33 }
 0x14e   : > { %v3939_v48 = vpop.f32.mrf.mxu0  ;;  %5895 = vst [vmem:[#allocation77_spill] sm:$0xff] %v3947_v57  ;;  %5896 = vst [vmem:[#allocation78_spill] sm:$0xff] %v3951_v21  ;;  %v3965_v62 = vpop.f32.mrf.mxu1  ;;  %v3967_v60 = vadd.f32 %v1275_v12, %v1140_v16  ;;  %v3969_v44 = vadd.f32 %v1877_v38, %v1742_v42  ;;  %v1894_v3 = vadd.f32 %v1756_v18, %v1755_v23  ;;  %v1593_v23 = vmax.f32 %v3947_v57, 0.0 }
 0x14f   : > { %5897 = vst [vmem:[#allocation79_spill] sm:$0xff] %v3957_v36  ;;  %5898 = vst [vmem:[#allocation80_spill] sm:$0xff] %v3961_v56  ;;  %v1757_v13 = vmul.f32 %v3482_v47, %v1587_v24  ;;  %v1284_v8 = vadd.f32 %v1283_v40, %v1147_v55  ;;  %v1148_v19 = vmul.f32 %v3904_v5, %v3904_v5  ;;  %v1594_v63 = vmax.f32 %v3957_v36, 0.0 }
 0x150   : > { %v3963_v17 = vpop.f32.mrf.mxu0  ;;  %5899 = vst [vmem:[#allocation81_spill] sm:$0xff] %v3967_v60  ;;  %5900 = vst [vmem:[#allocation82_spill] sm:$0xff] %v3969_v44  ;;  %v1162_v26 = vmul.f32 %v3957_v36, %v3957_v36  ;;  %v3979_v37 = vpop.f32.mrf.mxu1  ;;  %v1886_v12 = vadd.f32 %v1885_v29, %v1749_v0  ;;  %v1750_v16 = vmul.f32 %v3485_v50, %v1580_v35  ;;  %v1588_v24 = vmax.f32 %v3951_v21, 0.0 }
 0x151   : > { %v1293_v55 = vadd.f32 %v1292_v53, %v1155_v20  ;;  %v1161_v40 = vmul.f32 %v3947_v57, %v3947_v57  ;;  %v1595_v38 = vmax.f32 %v3961_v56, 0.0  ;;  %v3989_v42 = vadd.f32 %v3824_v25, %v3453_v31 }
 0x152   : > { %v3977_v49 = vpop.f32.mrf.mxu0  ;;  %v3993_v36 = vpop.f32.mrf.mxu1  ;;  %v1895_v29 = vadd.f32 %v1894_v3, %v1757_v13  ;;  %v1764_v0 = vmul.f32 %v3471_v43, %v1594_v63  ;;  %v3998_v35 = vadd.f32 %v3837_v52, %v3455_v32  ;;  %v4002_v53 = vadd.f32 %v3839_v58, %v3457_v33 }
 0x153   : > { %5901 = vst [vmem:[#allocation83_spill] sm:$0xff] %v3989_v42  ;;  %v4004_v20 = vadd.f32 %v1284_v8, %v1148_v19  ;;  %v1156_v25 = vmul.f32 %v3951_v21, %v3951_v21  ;;  %v1301_v57 = vadd.f32 %v1162_v26, %v1161_v40  ;;  %v1163_v5 = vmul.f32 %v3961_v56, %v3961_v56 }
 0x154   : > { %v3991_v18 = vpop.f32.mrf.mxu0  ;;  %5902 = vst [vmem:[#allocation84_spill] sm:$0xff] %v3998_v35  ;;  %5903 = vst [vmem:[#allocation85_spill] sm:$0xff] %v4002_v53  ;;  %v4012_v13 = vpop.f32.mrf.mxu1  ;;  %v4014_v63 = vadd.f32 %v1886_v12, %v1750_v16  ;;  %v1763_v52 = vmul.f32 %v3479_v46, %v1593_v23  ;;  %v1758_v58 = vmul.f32 %v3485_v50, %v1588_v24  ;;  %v1601_v40 = vmax.f32 %v3989_v42, 0.0 }
 0x155   : > { %5904 = vst [vmem:[#allocation86_spill] sm:$0xff] %v4004_v20  ;;  %v4020_v8 = vadd.f32 %v3826_v41, %v3476_v45  ;;  %v4022_v19 = vadd.f32 %v1293_v55, %v1156_v25  ;;  %v1765_v26 = vmul.f32 %v3482_v47, %v1595_v38  ;;  %v1602_v56 = vmax.f32 %v3998_v35, 0.0 }
 0x156   : > { %v4010_v3 = vpop.f32.mrf.mxu0  ;;  %5905 = vst [vmem:[#allocation87_spill] sm:$0xff] %v4014_v63  ;;  %v4029_v12 = vpop.f32.mrf.mxu1  ;;  %v4031_v16 = vadd.f32 %v1895_v29, %v1758_v58  ;;  %v1903_v23 = vadd.f32 %v1764_v0, %v1763_v52  ;;  %v1170_v24 = vmul.f32 %v3998_v35, %v3998_v35  ;;  %v1603_v41 = vmax.f32 %v4002_v53, 0.0 }
 0x157   : > { %5906 = vst [vmem:[#allocation88_spill] sm:$0xff] %v4020_v8  ;;  %5907 = vst [vmem:[#allocation89_spill] sm:$0xff] %v4022_v19  ;;  %v1302_v55 = vadd.f32 %v1301_v57, %v1163_v5  ;;  %v1772_v25 = vmul.f32 %v3471_v43, %v1602_v56  ;;  %v4039_v38 = vadd.f32 %v3852_v9, %v3453_v31  ;;  %v1596_v56 = vmax.f32 %v4020_v8, 0.0 }
 0x158   : > { %v4027_v21 = vpop.f32.mrf.mxu0  ;;  %5908 = vst [vmem:[#allocation90_spill] sm:$0xff] %v4031_v16  ;;  %v4043_v63 = vadd.f32 %v3854_v2, %v3476_v45  ;;  %v4047_v29 = vpop.f32.mrf.mxu1  ;;  %v1169_v0 = vmul.f32 %v3989_v42, %v3989_v42  ;;  %v1164_v5 = vmul.f32 %v4020_v8, %v4020_v8  ;;  %v4055_v57 = vadd.f32 %v3876_v4, %v3455_v32 }
 0x159   : > { %5909 = vst [vmem:[#allocation91_spill] sm:$0xff] %v4039_v38  ;;  %v4059_v9 = vadd.f32 %v3878_v51, %v3457_v33  ;;  %v1771_v2 = vmul.f32 %v3479_v46, %v1601_v40  ;;  %v1171_v52 = vmul.f32 %v4002_v53, %v4002_v53  ;;  %v1609_v58 = vmax.f32 %v4039_v38, 0.0 }
 0x15a   : > { %5910 = vst [vmem:[#allocation92_spill] sm:$0xff] %v4043_v63  ;;  %v4045_v44 = vpop.f32.mrf.mxu0  ;;  %5911 = vst [vmem:[#allocation93_spill] sm:$0xff] %v4055_v57  ;;  %v4068_v42 = vpop.f32.mrf.mxu1  ;;  %v1310_v16 = vadd.f32 %v1170_v24, %v1169_v0  ;;  %v1773_v4 = vmul.f32 %v3482_v47, %v1603_v41  ;;  %v1178_v51 = vmul.f32 %v4055_v57, %v4055_v57  ;;  %v1610_v19 = vmax.f32 %v4055_v57, 0.0 }
 0x15b   : > { %5912 = vst [vmem:[#allocation94_spill] sm:$0xff] %v4059_v9  ;;  %5913 = vst [vmem:[#allocation95_spill] sm:$0xff] %v4068_v42  ;;  %v1912_v40 = vadd.f32 %v1772_v25, %v1771_v2  ;;  %v1177_v8 = vmul.f32 %v4039_v38, %v4039_v38  ;;  %v1604_v53 = vmax.f32 %v4043_v63, 0.0  ;;  %v1611_v20 = vmax.f32 %v4059_v9, 0.0 }
 0x15c   : > { %v4066_v35 = vpop.f32.mrf.mxu0  ;;  %v1779_v42 = vmul.f32 %v3479_v46, %v1609_v58  ;;  %v1780_v24 = vmul.f32 %v3471_v43, %v1610_v19  ;;  %v1179_v41 = vmul.f32 %v4059_v9, %v4059_v9  ;;  %v4086_v0 = vadd.f32 %v3889_v15, %v3453_v31  ;;  %v4088_v25 = vpop.f32.mrf.mxu1 }
 0x15d   : > { %5915 = vst [vmem:[#allocation97_spill] sm:$0xff] %v4088_v25  ;;  %v1319_v2 = vadd.f32 %v1178_v51, %v1177_v8  ;;  %v4092_v57 = vadd.f32 %v3891_v39, %v3476_v45  ;;  %v4096_v38 = vadd.f32 %v3914_v59, %v3455_v32  ;;  %v4100_v19 = vadd.f32 %v3916_v14, %v3457_v33 }
 0x15e   : > { %v4078_v60 = vpop.f32.mrf.mxu0  ;;  %5914 = vst [vmem:[#allocation96_spill] sm:$0xff] %v4086_v0  ;;  %v1904_v58 = vadd.f32 %v1903_v23, %v1765_v26  ;;  %v4102_v9 = vadd.f32 %v1302_v55, %v1164_v5  ;;  %v1766_v31 = vmul.f32 %v3485_v50, %v1596_v56  ;;  %v1311_v15 = vadd.f32 %v1310_v16, %v1171_v52  ;;  %v4115_v23 = vpop.f32.mrf.mxu1 }
 0x15f   : > { %5916 = vst [vmem:[#allocation98_spill] sm:$0xff] %v4092_v57  ;;  %5917 = vst [vmem:[#allocation99_spill] sm:$0xff] %v4096_v38  ;;  %v1921_v8 = vadd.f32 %v1780_v24, %v1779_v42  ;;  %v1781_v39 = vmul.f32 %v3482_v47, %v1611_v20  ;;  %v1617_v51 = vmax.f32 %v4086_v0, 0.0  ;;  %v1186_v32 = vmul.f32 %v4096_v38, %v4096_v38 }
 0x160   : > { %5918 = vst [vmem:[#allocation100_spill] sm:$0xff] %v4100_v19  ;;  %v4105_v25 = vpop.f32.mrf.mxu0  ;;  %v1913_v59 = vadd.f32 %v1912_v40, %v1773_v4  ;;  %v1172_v33 = vmul.f32 %v4043_v63, %v4043_v63  ;;  %v1618_v14 = vmax.f32 %v4096_v38, 0.0  ;;  %v1619_v26 = vmax.f32 %v4100_v19, 0.0 }
 0x161   : > { %v1774_v16 = vmul.f32 %v3485_v50, %v1604_v53  ;;  %v1320_v42 = vadd.f32 %v1319_v2, %v1179_v41  ;;  %v1185_v20 = vmul.f32 %v4086_v0, %v4086_v0  ;;  %v1612_v55 = vmax.f32 %v4092_v57, 0.0 }
 0x162   : > { %v1787_v5 = vmul.f32 %v3479_v46, %v1617_v51  ;;  %v1788_v56 = vmul.f32 %v3471_v43, %v1618_v14  ;;  %v4125_v52 = vadd.f32 %v3928_v30, %v3490_v54  ;;  %v4129_v4 = vadd.f32 %v3930_v1, %v3476_v45  ;;  %v4131_v40 = vpop.f32.mrf.mxu0  ;;  %v4144_v1 = vpop.f32.mrf.mxu1 }
 0x163   : > { %v1922_v53 = vadd.f32 %v1921_v8, %v1781_v39  ;;  %v1328_v24 = vadd.f32 %v1186_v32, %v1185_v20  ;;  %v1187_v41 = vmul.f32 %v4100_v19, %v4100_v19  ;;  %v4137_v46 = vadd.f32 %v3939_v48, %v3499_v61 }
 0x164   : > { %5919 = vst [vmem:[#allocation101_spill] sm:$0xff] %v4125_v52  ;;  %5920 = vst [vmem:[#allocation102_spill] sm:$0xff] %v4129_v4  ;;  %v4139_v43 = vadd.f32 %v1904_v58, %v1766_v31  ;;  %v1180_v30 = vmul.f32 %v4092_v57, %v4092_v57  ;;  %v1930_v2 = vadd.f32 %v1788_v56, %v1787_v5  ;;  %v1501_v31 = vmax.f32 %v4125_v52, 0.0  ;;  %v4184_v20 = vpop.f32.mrf.mxu1 }
 0x165   : > { %5921 = vst [vmem:[#allocation103_spill] sm:$0xff] %v4137_v46  ;;  %v1789_v45 = vmul.f32 %v3482_v47, %v1619_v26  ;;  %v4146_v51 = vadd.f32 %v1311_v15, %v1172_v33  ;;  %v4148_v8 = vadd.f32 %v1913_v59, %v1774_v16  ;;  %v1782_v39 = vmul.f32 %v3485_v50, %v1612_v55  ;;  %v4163_v15 = vpop.f32.mrf.mxu0 }
 0x166   : > { %5922 = vst [vmem:[#allocation104_spill] sm:$0xff] %v4139_v43  ;;  %v4153_v48 = vadd.f32 %v3941_v28, %v3517_v7  ;;  %v4155_v58 = vadd.f32 %v1320_v42, %v1180_v30  ;;  %v1620_v32 = vmax.f32 %v4129_v4, 0.0  ;;  %v4161_v47 = vadd.f32 %v3963_v17, %v3490_v54 }
 0x167   : > { %5923 = vst [vmem:[#allocation105_spill] sm:$0xff] %v4148_v8  ;;  %v4165_v59 = vadd.f32 %v1922_v53, %v1782_v39  ;;  %v4167_v33 = vadd.f32 %v1328_v24, %v1187_v41  ;;  %v1502_v14 = vmax.f32 %v4137_v46, 0.0  ;;  %v4172_v28 = vadd.f32 %v3977_v49, %v3499_v61  ;;  %v4201_v30 = vpop.f32.mrf.mxu0 }
 0x168   : > { %5924 = vst [vmem:[#allocation106_spill] sm:$0xff] %v4153_v48  ;;  %5925 = vst [vmem:[#allocation107_spill] sm:$0xff] %v4155_v58  ;;  %v1931_v26 = vadd.f32 %v1930_v2, %v1789_v45  ;;  %v1069_v16 = vmul.f32 %v4125_v52, %v4125_v52  ;;  %v4178_v17 = vmul.f32 %v4129_v4, %v4129_v4  ;;  %v1503_v49 = vmax.f32 %v4153_v48, 0.0  ;;  %v5941_v52 = vld [vmem:[#allocation31_spill] sm:$0xff] }
 0x169   : > { %5926 = vst [vmem:[#allocation108_spill] sm:$0xff] %v4161_v47  ;;  %5927 = vst [vmem:[#allocation109_spill] sm:$0xff] %v4165_v59  ;;  %v4182_v42 = vadd.f32 %v3991_v18, %v3490_v54  ;;  %v1070_v55 = vmul.f32 %v4137_v46, %v4137_v46  ;;  %v1509_v5 = vmax.f32 %v4161_v47, 0.0  ;;  %v4192_v56 = vadd.f32 %v3965_v62, %v3527_v11  ;;  %v4244_v38 = vpop.f32.mrf.mxu0 }
 0x16a   : > { %5928 = vst [vmem:[#allocation110_spill] sm:$0xff] %v4167_v33  ;;  %5929 = vst [vmem:[#allocation111_spill] sm:$0xff] %v4172_v28  ;;  %v1671_v53 = vmul.f32 %v3515_v6, %v1501_v31  ;;  %v1790_v24 = vmul.f32 %v3485_v50, %v1620_v32  ;;  %v1510_v18 = vmax.f32 %v4172_v28, 0.0  ;;  %v4199_v41 = vadd.f32 %v3979_v37, %v3517_v7  ;;  %v5942_v33 = vld [vmem:[#allocation24_spill] sm:$0xff] }
 0x16b   : > { %5930 = vst [vmem:[#allocation112_spill] sm:$0xff] %v4178_v17  ;;  %5931 = vst [vmem:[#allocation113_spill] sm:$0xff] %v4182_v42  ;;  %v1672_v2 = vmul.f32 %v3523_v10, %v1502_v14  ;;  %v1077_v45 = vmul.f32 %v4161_v47, %v4161_v47  ;;  %v1085_v62 = vmul.f32 %v4182_v42, %v4182_v42  ;;  %v1517_v31 = vmax.f32 %v4182_v42, 0.0  ;;  %v4223_v14 = vpop.f32.mrf.mxu1 }
 0x16c   : > { %5932 = vst [vmem:[#allocation114_spill] sm:$0xff] %v4192_v56  ;;  %5933 = vst [vmem:[#allocation115_spill] sm:$0xff] %v4199_v41  ;;  %v4210_v39 = vadd.f32 %v4010_v3, %v3499_v61  ;;  %v4212_v50 = vadd.f32 %v1931_v26, %v1790_v24  ;;  %v4217_v37 = vadd.f32 %v3993_v36, %v3527_v11  ;;  %v1504_v3 = vmax.f32 %v4192_v56, 0.0 }
 0x16d   : > { %v4221_v32 = vadd.f32 %v4027_v21, %v3490_v54  ;;  %v4226_v4 = vmul.f32 %v3515_v6, %v1509_v5  ;;  %v1078_v26 = vmul.f32 %v4172_v28, %v4172_v28  ;;  %v4233_v24 = vadd.f32 %v4012_v13, %v3517_v7 }
 0x16e   : > { %5934 = vst [vmem:[#allocation116_spill] sm:$0xff] %v4210_v39  ;;  %5935 = vst [vmem:[#allocation117_spill] sm:$0xff] %v4212_v50  ;;  %v4236_v36 = vmul.f32 %v3523_v10, %v1510_v18  ;;  %v1511_v21 = vmax.f32 %v4199_v41, 0.0  ;;  %v1518_v19 = vmax.f32 %v4210_v39, 0.0  ;;  %v4242_v5 = vadd.f32 %v4029_v12, %v3527_v11  ;;  %v5943_v50 = vld [vmem:[#allocation30_spill] sm:$0xff] }
 0x16f   : > { %5936 = vst [vmem:[#allocation118_spill] sm:$0xff] %v4221_v32  ;;  %5937 = vst [vmem:[#allocation119_spill] sm:$0xff] %v4233_v24  ;;  %v4247_v0 = vadd.f32 %v3625_v27, %v1085_v62  ;;  %v1093_v13 = vmul.f32 %v4221_v32, %v4221_v32  ;;  %v1071_v18 = vmul.f32 %v4153_v48, %v4153_v48  ;;  %v1512_v42 = vmax.f32 %v4217_v37, 0.0  ;;  %v4263_v27 = vpop.f32.mrf.mxu1  ;;  %v4284_v48 = vpop.f32.mrf.mxu0 }
 0x170   : > { %v1196_v57 = vadd.f32 %v3589_v22, %v1069_v16  ;;  %v4255_v63 = vmul.f32 %v3515_v6, %v1517_v31  ;;  %v1525_v12 = vmax.f32 %v4221_v32, 0.0  ;;  %v4261_v28 = vadd.f32 %v4045_v44, %v3499_v61 }
 0x171   : > { %v4267_v62 = vmul.f32 %v4210_v39, %v4210_v39  ;;  %v4271_v22 = vmul.f32 %v4233_v24, %v4233_v24  ;;  %v4275_v31 = vadd.f32 %v4066_v35, %v3490_v54  ;;  %v4278_v32 = vmul.f32 %v3523_v10, %v1518_v19  ;;  %v5940_v19 = vld [vmem:[#allocation95_spill] sm:$0xff] }
 0x172   : > { %5938 = vst [vmem:[#allocation120_spill] sm:$0xff] %v4261_v28  ;;  %v1197_v16 = vadd.f32 %v1196_v57, %v1070_v55  ;;  %v1519_v44 = vmax.f32 %v4233_v24, 0.0  ;;  %v1072_v39 = vmul.f32 %v4192_v56, %v4192_v56  ;;  %v4287_v46 = vadd.f32 %v3727_v34, %v1093_v13  ;;  %v4304_v13 = vpop.f32.mrf.mxu1 }
 0x173   : > { %5939 = vst [vmem:[#allocation121_spill] sm:$0xff] %v4275_v31  ;;  %v4291_v35 = vadd.f32 %v4047_v29, %v3517_v7  ;;  %v4295_v55 = vadd.f32 %v5940_v19, %v3527_v11  ;;  %v4298_v24 = vmul.f32 %v3515_v6, %v1525_v12  ;;  %v1526_v47 = vmax.f32 %v4261_v28, 0.0 }
 0x174   : > { %v1198_v57 = vadd.f32 %v1197_v16, %v1071_v18  ;;  %v1079_v56 = vmul.f32 %v4199_v41, %v4199_v41  ;;  %v1205_v34 = vadd.f32 %v5941_v52, %v1077_v45  ;;  %v4308_v29 = vmul.f32 %v4261_v28, %v4261_v28  ;;  %v4319_v45 = vpop.f32.mrf.mxu0 }
 0x175   : > { %v1101_v16 = vmul.f32 %v4275_v31, %v4275_v31  ;;  %v1533_v12 = vmax.f32 %v4275_v31, 0.0  ;;  %v1673_v17 = vmul.f32 %v5942_v33, %v1503_v49  ;;  %v1798_v59 = vadd.f32 %v5943_v50, %v1671_v53  ;;  %v5946_v31 = vld [vmem:[#allocation29_spill] sm:$0xff] }
 0x176   : > { %v1199_v18 = vadd.f32 %v1198_v57, %v1072_v39  ;;  %v1206_v19 = vadd.f32 %v1205_v34, %v1078_v26  ;;  %v4317_v52 = vadd.f32 %v4078_v60, %v3499_v61  ;;  %v4323_v39 = vmul.f32 %v4291_v35, %v4291_v35  ;;  %v4336_v34 = vpop.f32.mrf.mxu1 }
 0x177   : > { %v4329_v49 = vadd.f32 %v4105_v25, %v3490_v54  ;;  %v4332_v53 = vmul.f32 %v3523_v10, %v1526_v47  ;;  %v1080_v60 = vmul.f32 %v4217_v37, %v4217_v37  ;;  %v1799_v26 = vadd.f32 %v1798_v59, %v1672_v2  ;;  %v5947_v25 = vld [vmem:[#allocation97_spill] sm:$0xff] }
 0x178   : > { %1200 = vadd.xlane.f32.xlu0 %v1199_v18  ;;  %v1207_v50 = vadd.f32 %v1206_v19, %v1079_v56  ;;  %v5945_v18 = vld [vmem:[#allocation51_spill] sm:$0xff]  ;;  %v4340_v57 = vmul.f32 %v3515_v6, %v1533_v12  ;;  %v1674_v41 = vmul.f32 %v5946_v31, %v1504_v3  ;;  %v4345_v8 = vadd.f32 %v5947_v25, %v3517_v7  ;;  %v4352_v56 = vpop.f32.mrf.mxu0  ;;  %v5949_v12 = vld [vmem:[#allocation32_spill] sm:$0xff] }
 0x179   : > { %5944 = vst [vmem:[#allocation95_spill] sm:$0xff] %v4329_v49  ;;  %v1232_v28 = vadd.f32 %v5945_v18, %v1101_v16  ;;  %v1800_v43 = vadd.f32 %v1799_v26, %v1673_v17  ;;  %v1534_v58 = vmax.f32 %v4317_v52, 0.0  ;;  %v4350_v59 = vadd.f32 %v4115_v23, %v3527_v11  ;;  %v4367_v26 = vpop.f32.mrf.mxu1 }
 0x17a   : > { %v1208_v47 = vadd.f32 %v1207_v50, %v1080_v60  ;;  %v1109_v2 = vmul.f32 %v4329_v49, %v4329_v49  ;;  %v1681_v16 = vmul.f32 %v5942_v33, %v1511_v21  ;;  %v1682_v3 = vmul.f32 %v5946_v31, %v1512_v42 }
 0x17b   : > { %5948 = vst [vmem:[#allocation31_spill] sm:$0xff] %v4350_v59  ;;  %v1807_v19 = vadd.f32 %v5949_v12, %v4226_v4  ;;  %v1801_v17 = vadd.f32 %v1800_v43, %v1674_v41  ;;  %v1102_v60 = vmul.f32 %v4317_v52, %v4317_v52  ;;  %v1541_v23 = vmax.f32 %v4329_v49, 0.0  ;;  %v5951_v43 = vld [vmem:[#allocation41_spill] sm:$0xff]  ;;  %v4384_v12 = vpop.f32.mrf.mxu0 }
 0x17c   : > { %1209 = vadd.xlane.f32.xlu1 %v1208_v47  ;;  %v4365_v50 = vadd.f32 %v4131_v40, %v3499_v61  ;;  %v1103_v21 = vmul.f32 %v4345_v8, %v4345_v8  ;;  %v1689_v4 = vmul.f32 %v5942_v33, %v1519_v44  ;;  %v1816_v41 = vadd.f32 %v5951_v43, %v4255_v63 }
 0x17d   : > { %v1808_v42 = vadd.f32 %v1807_v19, %v4236_v36  ;;  %1802 = vadd.xlane.f32.xlu0 %v1801_v17  ;;  %v4376_v18 = vmul.f32 %v3523_v10, %v1534_v58  ;;  %v4382_v47 = vadd.f32 %v4163_v15, %v3490_v54  ;;  %v5953_v36 = vld [vmem:[#allocation53_spill] sm:$0xff]  ;;  %v4391_v63 = vadd.f32 %v4144_v1, %v3517_v7 }
 0x17e   : > { %5950 = vst [vmem:[#allocation24_spill] sm:$0xff] %v4365_v50  ;;  %v4387_v19 = vadd.f32 %v5953_v36, %v1109_v2  ;;  %v1817_v58 = vadd.f32 %v1816_v41, %v4278_v32  ;;  %v4395_v17 = vmul.f32 %v3515_v6, %v1541_v23  ;;  %v1542_v43 = vmax.f32 %v4365_v50, 0.0  ;;  %v4404_v36 = vpop.f32.mrf.mxu1 }
 0x17f   : > { %5952 = vst [vmem:[#allocation30_spill] sm:$0xff] %v4382_v47  ;;  %v1809_v44 = vadd.f32 %v1808_v42, %v1681_v16  ;;  %v4400_v15 = vadd.f32 %v4184_v20, %v3527_v11  ;;  %v1215_v2 = vadd.f32 %v4247_v0, %v4267_v62  ;;  %v5955_v1 = vmax.f32 %v4242_v5, 0.0  ;;  %v4419_v62 = vpop.f32.mrf.mxu0 }
 0x180   : > { %v1818_v32 = vadd.f32 %v1817_v58, %v1689_v4  ;;  %v1117_v23 = vmul.f32 %v4382_v47, %v4382_v47  ;;  %v1110_v41 = vmul.f32 %v4365_v50, %v4365_v50  ;;  %v1549_v20 = vmax.f32 %v4382_v47, 0.0  ;;  %v5958_v4 = vld [vmem:[#allocation63_spill] sm:$0xff] }
 0x181   : > { %5954 = vst [vmem:[#allocation51_spill] sm:$0xff] %v4400_v15  ;;  %v1810_v16 = vadd.f32 %v1809_v44, %v1682_v3  ;;  %v1690_v42 = vmul.f32 %v5946_v31, %v5955_v1  ;;  %v1216_v40 = vadd.f32 %v1215_v2, %v4271_v22  ;;  %v4417_v0 = vadd.f32 %v4201_v30, %v3499_v61 }
 0x182   : > { %v4423_v3 = vmul.f32 %v4391_v63, %v4391_v63  ;;  %v1088_v58 = vmul.f32 %v4242_v5, %v4242_v5  ;;  %v4429_v1 = vmul.f32 %v3523_v10, %v1542_v43  ;;  %v1224_v30 = vadd.f32 %v4287_v46, %v4308_v29 }
 0x183   : > { %5956 = vst [vmem:[#allocation29_spill] sm:$0xff] %v4417_v0  ;;  %1811 = vadd.xlane.f32.xlu0 %v1810_v16  ;;  %v1819_v44 = vadd.f32 %v1818_v32, %v1690_v42  ;;  %v4436_v2 = vadd.f32 %v4244_v38, %v3490_v54  ;;  %v4438_v16 = vpop.f32.mrf.mxu1  ;;  %v4441_v42 = vadd.f32 %v5958_v4, %v1117_v23  ;;  %v1550_v46 = vmax.f32 %v4417_v0, 0.0 }
 0x184   : > { %v1217_v32 = vadd.f32 %v1216_v40, %v1088_v58  ;;  %v4445_v43 = vadd.f32 %v4223_v14, %v3517_v7  ;;  %v1233_v25 = vadd.f32 %v1232_v28, %v1102_v60  ;;  %v4448_v22 = vmul.f32 %v3515_v6, %v1549_v20 }
 0x185   : > { %5957 = vst [vmem:[#allocation97_spill] sm:$0xff] %v4436_v2  ;;  %1820 = vadd.xlane.f32.xlu1 %v1819_v44  ;;  %v1096_v38 = vmul.f32 %v4295_v55, %v4295_v55  ;;  %v1225_v29 = vadd.f32 %v1224_v30, %v4323_v39  ;;  %v4454_v44 = vpop.f32.mrf.mxu0  ;;  %v1125_v40 = vmul.f32 %v4436_v2, %v4436_v2  ;;  %v1557_v39 = vmax.f32 %v4436_v2, 0.0  ;;  %v4471_v58 = vpop.f32.mrf.mxu1 }
 0x186   : > { %5959 = vst [vmem:[#allocation32_spill] sm:$0xff] %v4445_v43  ;;  %v4460_v14 = vadd.f32 %v4263_v27, %v3527_v11  ;;  %v1104_v28 = vmul.f32 %v4350_v59, %v4350_v59  ;;  %v1234_v60 = vadd.f32 %v1233_v25, %v1103_v21  ;;  %v1118_v23 = vmul.f32 %v4417_v0, %v4417_v0 }
 0x187   : > { %1218 = vadd.xlane.f32.xlu0 %v1217_v32  ;;  %v1226_v20 = vadd.f32 %v1225_v29, %v1096_v38  ;;  %v4469_v4 = vadd.f32 %v4284_v48, %v3499_v61  ;;  %v1119_v27 = vmul.f32 %v4445_v43, %v4445_v43  ;;  %v4478_v21 = vadd.f32 %v4304_v13, %v3517_v7  ;;  %v5962_v29 = vld [vmem:[#allocation49_spill] sm:$0xff] }
 0x188   : > { %v1235_v32 = vadd.f32 %v1234_v60, %v1104_v28  ;;  %v4481_v25 = vmul.f32 %v3523_v10, %v1550_v46  ;;  %v5961_v38 = vmax.f32 %v4291_v35, 0.0  ;;  %v1825_v2 = vadd.f32 %v5962_v29, %v4298_v24  ;;  %v4492_v28 = vpop.f32.mrf.mxu0  ;;  %v5964_v60 = vld [vmem:[#allocation69_spill] sm:$0xff] }
 0x189   : > { %5960 = vst [vmem:[#allocation41_spill] sm:$0xff] %v4469_v4  ;;  %1227 = vadd.xlane.f32.xlu1 %v1226_v20  ;;  %v4490_v0 = vadd.f32 %v4319_v45, %v3490_v54  ;;  %v4495_v13 = vadd.f32 %v5964_v60, %v1125_v40  ;;  %v5965_v20 = vmax.f32 %v4345_v8, 0.0  ;;  %v4504_v24 = vmul.f32 %v3515_v6, %v1557_v39  ;;  %v4512_v60 = vpop.f32.mrf.mxu1 }
 0x18a   : > { %v1697_v48 = vmul.f32 %v5942_v33, %v5961_v38  ;;  %v5966_v38 = vld [vmem:[#allocation52_spill] sm:$0xff]  ;;  %v4508_v45 = vmul.f32 %v4469_v4, %v4469_v4  ;;  %v1558_v40 = vmax.f32 %v4469_v4, 0.0  ;;  %v1826_v29 = vadd.f32 %v1825_v2, %v4332_v53  ;;  %v4533_v50 = vpop.f32.mrf.mxu0 }
 0x18b   : > { %5963 = vst [vmem:[#allocation53_spill] sm:$0xff] %v4490_v0  ;;  %1236 = vadd.xlane.f32.xlu0 %v1235_v32  ;;  %v1705_v30 = vmul.f32 %v5942_v33, %v5965_v20  ;;  %v1834_v47 = vadd.f32 %v5966_v38, %v4340_v57  ;;  %v4516_v32 = vmul.f32 %v4478_v21, %v4478_v21  ;;  %v5967_v20 = vmax.f32 %v4295_v55, 0.0 }
 0x18c   : > { %v4524_v38 = vadd.f32 %v4352_v56, %v3499_v61  ;;  %v1827_v46 = vadd.f32 %v1826_v29, %v1697_v48  ;;  %v1133_v53 = vmul.f32 %v4490_v0, %v4490_v0  ;;  %v4530_v2 = vadd.f32 %v4336_v34, %v3527_v11 }
 0x18d   : > { %v1698_v57 = vmul.f32 %v5946_v31, %v5967_v20  ;;  %v1835_v39 = vadd.f32 %v1834_v47, %v4376_v18  ;;  %v1242_v4 = vadd.f32 %v4387_v19, %v1110_v41  ;;  %v1565_v18 = vmax.f32 %v4490_v0, 0.0  ;;  %v4548_v41 = vpop.f32.mrf.mxu1 }
 0x18e   : > { %5968 = vst [vmem:[#allocation63_spill] sm:$0xff] %v4524_v38  ;;  %5969 = vst [vmem:[#allocation49_spill] sm:$0xff] %v4530_v2  ;;  %v5970_v47 = vmax.f32 %v4350_v59, 0.0  ;;  %v4541_v29 = vmul.f32 %v3523_v10, %v1558_v40  ;;  %v4546_v19 = vadd.f32 %v4384_v12, %v3490_v54  ;;  %v1566_v0 = vmax.f32 %v4524_v38, 0.0 }
 0x18f   : > { %v1836_v48 = vadd.f32 %v1835_v39, %v1705_v30  ;;  %v1828_v49 = vadd.f32 %v1827_v46, %v1698_v57  ;;  %v1243_v34 = vadd.f32 %v1242_v4, %v4423_v3  ;;  %v4553_v59 = vadd.f32 %v4367_v26, %v3517_v7  ;;  %v5974_v46 = vld [vmem:[#allocation71_spill] sm:$0xff]  ;;  %v4564_v57 = vpop.f32.mrf.mxu0 }
 0x190   : > { %v1706_v56 = vmul.f32 %v5946_v31, %v5970_v47  ;;  %5971 = vst [vmem:[#allocation69_spill] sm:$0xff] %v4546_v19  ;;  %v4557_v30 = vadd.f32 %v4404_v36, %v3527_v11  ;;  %v1268_v3 = vadd.f32 %v5974_v46, %v1133_v53  ;;  %v1112_v12 = vmul.f32 %v4400_v15, %v4400_v15 }
 0x191   : > { %5972 = vst [vmem:[#allocation52_spill] sm:$0xff] %v4553_v59  ;;  %1829 = vadd.xlane.f32.xlu1 %v1828_v49  ;;  %v1251_v40 = vadd.f32 %v4441_v42, %v1118_v23  ;;  %v4567_v39 = vmul.f32 %v3515_v6, %v1565_v18  ;;  %v1134_v26 = vmul.f32 %v4524_v38, %v4524_v38  ;;  %v1573_v47 = vmax.f32 %v4546_v19, 0.0  ;;  %v1036_v23 = vpop.f32.mrf.mxu1  ;;  %v881_v4 = vpop.f32.mrf.mxu0 }
 0x192   : > { %v1837_v20 = vadd.f32 %v1836_v48, %v1706_v56  ;;  %5973 = vst [vmem:[#allocation122_spill] sm:$0xff] %v4557_v30  ;;  %v1141_v49 = vmul.f32 %v4546_v19, %v4546_v19  ;;  %v1120_v36 = vmul.f32 %v4460_v14, %v4460_v14  ;;  %v1244_v53 = vadd.f32 %v1243_v34, %v1112_v12  ;;  %v5979_v19 = vld [vmem:[#allocation81_spill] sm:$0xff] }
 0x193   : > { %v1252_v56 = vadd.f32 %v1251_v40, %v1119_v27  ;;  %v4578_v42 = vadd.f32 %v4419_v62, %v3499_v61  ;;  %v1135_v18 = vmul.f32 %v4553_v59, %v4553_v59  ;;  %v5976_v12 = vmax.f32 %v4391_v63, 0.0  ;;  %v5977_v62 = vld [vmem:[#allocation61_spill] sm:$0xff]  ;;  %v883_v48 = vpop.f32.mrf.mxu0 }
 0x194   : > { %1838 = vadd.xlane.f32.xlu0 %v1837_v20  ;;  %v4581_v20 = vmul.f32 %v3523_v10, %v1566_v0  ;;  %v1843_v40 = vadd.f32 %v5977_v62, %v4395_v17  ;;  %v4594_v0 = vadd.f32 %v4454_v44, %v3490_v54  ;;  %v4597_v38 = vadd.f32 %v5979_v19, %v1141_v49  ;;  %v4616_v62 = vpop.f32.mrf.mxu1 }
 0x195   : > { %5975 = vst [vmem:[#allocation71_spill] sm:$0xff] %v4578_v42  ;;  %1245 = vadd.xlane.f32.xlu1 %v1244_v53  ;;  %v1253_v34 = vadd.f32 %v1252_v56, %v1120_v36  ;;  %v1713_v27 = vmul.f32 %v5942_v33, %v5976_v12  ;;  %v4601_v46 = vadd.f32 %v4438_v16, %v3517_v7  ;;  %v5980_v36 = vmax.f32 %v4445_v43, 0.0  ;;  %v5981_v56 = vld [vmem:[#allocation64_spill] sm:$0xff] }
 0x196   : > { %5978 = vst [vmem:[#allocation61_spill] sm:$0xff] %v4594_v0  ;;  %v1852_v12 = vadd.f32 %v5981_v56, %v4448_v22  ;;  %v4609_v17 = vmul.f32 %v3515_v6, %v1573_v47  ;;  %v1574_v44 = vmax.f32 %v4578_v42, 0.0  ;;  %v5982_v19 = vmax.f32 %v4400_v15, 0.0 }
 0x197   : > { %v1721_v53 = vmul.f32 %v5942_v33, %v5980_v36  ;;  %v1844_v16 = vadd.f32 %v1843_v40, %v4429_v1  ;;  %v4620_v36 = vmul.f32 %v4578_v42, %v4578_v42  ;;  %v4624_v22 = vadd.f32 %v4471_v58, %v3527_v11 }
 0x198   : > { %1254 = vadd.xlane.f32.xlu0 %v1253_v34  ;;  %v1714_v49 = vmul.f32 %v5946_v31, %v5982_v19  ;;  %v1853_v47 = vadd.f32 %v1852_v12, %v4481_v25  ;;  %v4629_v34 = vadd.f32 %v4492_v28, %v3499_v61  ;;  %v1149_v1 = vmul.f32 %v4594_v0, %v4594_v0 }
 0x199   : > { %v1845_v56 = vadd.f32 %v1844_v16, %v1713_v27  ;;  %v1581_v40 = vmax.f32 %v4594_v0, 0.0  ;;  %v1260_v19 = vadd.f32 %v4495_v13, %v4508_v45  ;;  %v4638_v58 = vmul.f32 %v4601_v46, %v4601_v46  ;;  %v1042_v45 = vpop.f32.mrf.mxu1 }
 0x19a   : > { %5983 = vst [vmem:[#allocation81_spill] sm:$0xff] %v4629_v34  ;;  %v5984_v12 = vmax.f32 %v4460_v14, 0.0  ;;  %v1854_v27 = vadd.f32 %v1853_v47, %v1721_v53  ;;  %v4645_v16 = vmul.f32 %v3523_v10, %v1574_v44  ;;  %v4650_v13 = vadd.f32 %v4533_v50, %v3490_v54  ;;  %v5986_v53 = vld [vmem:[#allocation86_spill] sm:$0xff]  ;;  %v887_v47 = vpop.f32.mrf.mxu0 }
 0x19b   : > { %v1846_v42 = vadd.f32 %v1845_v56, %v1714_v49  ;;  %v1261_v0 = vadd.f32 %v1260_v19, %v4516_v32  ;;  %v1582_v25 = vmax.f32 %v4629_v34, 0.0  ;;  %v1286_v44 = vadd.f32 %v5986_v53, %v1149_v1 }
 0x19c   : > { %v1722_v28 = vmul.f32 %v5946_v31, %v5984_v12  ;;  %5985 = vst [vmem:[#allocation64_spill] sm:$0xff] %v4650_v13  ;;  %v4656_v12 = vadd.f32 %v4512_v60, %v3517_v7  ;;  %v4660_v49 = vmul.f32 %v3515_v6, %v1581_v40  ;;  %v1128_v50 = vmul.f32 %v4530_v2, %v4530_v2  ;;  %v889_v43 = vpop.f32.mrf.mxu0 }
 0x19d   : > { %1847 = vadd.xlane.f32.xlu1 %v1846_v42  ;;  %v1269_v32 = vadd.f32 %v1268_v3, %v1134_v26  ;;  %v1150_v56 = vmul.f32 %v4629_v34, %v4629_v34  ;;  %v1157_v19 = vmul.f32 %v4650_v13, %v4650_v13  ;;  %v4670_v60 = vadd.f32 %v4548_v41, %v3527_v11  ;;  %v1044_v3 = vpop.f32.mrf.mxu1 }
 0x19e   : > { %v1855_v15 = vadd.f32 %v1854_v27, %v1722_v28  ;;  %v1136_v42 = vmul.f32 %v4557_v30, %v4557_v30  ;;  %v1262_v1 = vadd.f32 %v1261_v0, %v1128_v50  ;;  %v1589_v40 = vmax.f32 %v4650_v13, 0.0  ;;  %v5991_v13 = vld [vmem:[#allocation89_spill] sm:$0xff] }
 0x19f   : > { %v1270_v28 = vadd.f32 %v1269_v32, %v1135_v18  ;;  %v4680_v26 = vmul.f32 %v3523_v10, %v1582_v25  ;;  %v1151_v27 = vmul.f32 %v4656_v12, %v4656_v12  ;;  %v4686_v53 = vadd.f32 %v1036_v23, %v3517_v7 }
 0x1a0   : > { %1856 = vadd.xlane.f32.xlu0 %v1855_v15  ;;  %v4677_v15 = vadd.f32 %v4564_v57, %v3499_v61  ;;  %v5988_v18 = vmax.f32 %v4478_v21, 0.0  ;;  %v5989_v57 = vld [vmem:[#allocation70_spill] sm:$0xff]  ;;  %v4694_v25 = vadd.f32 %v881_v4, %v3490_v54  ;;  %v4697_v34 = vadd.f32 %v5991_v13, %v1157_v19 }
 0x1a1   : > { %1263 = vadd.xlane.f32.xlu1 %v1262_v1  ;;  %v1271_v0 = vadd.f32 %v1270_v28, %v1136_v42  ;;  %v1861_v32 = vadd.f32 %v5989_v57, %v4504_v24  ;;  %v5992_v23 = vmax.f32 %v4553_v59, 0.0  ;;  %v5993_v1 = vld [vmem:[#allocation72_spill] sm:$0xff]  ;;  %v5994_v4 = vmax.f32 %v4530_v2, 0.0  ;;  %v1048_v57 = vpop.f32.mrf.mxu1 }
 0x1a2   : > { %5987 = vst [vmem:[#allocation86_spill] sm:$0xff] %v4677_v15  ;;  %v1729_v50 = vmul.f32 %v5942_v33, %v5988_v18  ;;  %5990 = vst [vmem:[#allocation70_spill] sm:$0xff] %v4694_v25  ;;  %v1870_v28 = vadd.f32 %v5993_v1, %v4567_v39  ;;  %v4706_v18 = vmul.f32 %v3515_v6, %v1589_v40  ;;  %v1590_v24 = vmax.f32 %v4677_v15, 0.0 }
 0x1a3   : > { %v1737_v42 = vmul.f32 %v5942_v33, %v5992_v23  ;;  %v1730_v13 = vmul.f32 %v5946_v31, %v5994_v4  ;;  %v1862_v19 = vadd.f32 %v1861_v32, %v4541_v29  ;;  %v4715_v41 = vmul.f32 %v4677_v15, %v4677_v15  ;;  %v893_v4 = vpop.f32.mrf.mxu0 }
 0x1a4   : > { %1272 = vadd.xlane.f32.xlu0 %v1271_v0  ;;  %v4719_v39 = vmul.f32 %v4686_v53, %v4686_v53  ;;  %v1871_v40 = vadd.f32 %v1870_v28, %v4581_v20  ;;  %v4723_v0 = vadd.f32 %v883_v48, %v3499_v61  ;;  %v1165_v1 = vmul.f32 %v4694_v25, %v4694_v25 }
 0x1a5   : > { %v1863_v23 = vadd.f32 %v1862_v19, %v1729_v50  ;;  %v4729_v29 = vadd.f32 %v4616_v62, %v3527_v11  ;;  %v1278_v32 = vadd.f32 %v4597_v38, %v4620_v36  ;;  %v1597_v59 = vmax.f32 %v4694_v25, 0.0  ;;  %v1050_v38 = vpop.f32.mrf.mxu1 }
 0x1a6   : > { %5995 = vst [vmem:[#allocation89_spill] sm:$0xff] %v4723_v0  ;;  %v5997_v20 = vmax.f32 %v4557_v30, 0.0  ;;  %v1872_v50 = vadd.f32 %v1871_v40, %v1737_v42  ;;  %v4739_v28 = vmul.f32 %v3523_v10, %v1590_v24  ;;  %v4743_v2 = vadd.f32 %v887_v47, %v3490_v54 }
 0x1a7   : > { %5996 = vst [vmem:[#allocation72_spill] sm:$0xff] %v4729_v29  ;;  %v1864_v19 = vadd.f32 %v1863_v23, %v1730_v13  ;;  %v1279_v62 = vadd.f32 %v1278_v32, %v4638_v58  ;;  %v1598_v15 = vmax.f32 %v4723_v0, 0.0  ;;  %v4747_v25 = vadd.f32 %v1042_v45, %v3517_v7  ;;  %v895_v13 = vpop.f32.mrf.mxu0 }
 0x1a8   : > { %v1738_v48 = vmul.f32 %v5946_v31, %v5997_v20  ;;  %5998 = vst [vmem:[#allocation123_spill] sm:$0xff] %v4743_v2  ;;  %v4750_v30 = vadd.f32 %v1044_v3, %v3527_v11  ;;  %v4753_v42 = vadd.f32 %v4102_v9, %v1165_v1  ;;  %v1144_v58 = vmul.f32 %v4624_v22, %v4624_v22 }
 0x1a9   : > { %5999 = vst [vmem:[#allocation124_spill] sm:$0xff] %v4747_v25  ;;  %1865 = vadd.xlane.f32.xlu1 %v1864_v19  ;;  %v1287_v47 = vadd.f32 %v1286_v44, %v1150_v56  ;;  %v4759_v40 = vmul.f32 %v3515_v6, %v1597_v59  ;;  %v4763_v45 = vmul.f32 %v4723_v0, %v4723_v0  ;;  %v1605_v1 = vmax.f32 %v4743_v2, 0.0  ;;  %v1054_v59 = vpop.f32.mrf.mxu1 }
 0x1aa   : > { %v1873_v36 = vadd.f32 %v1872_v50, %v1738_v48  ;;  %v1173_v3 = vmul.f32 %v4743_v2, %v4743_v2  ;;  %v1152_v9 = vmul.f32 %v4670_v60, %v4670_v60  ;;  %v1280_v23 = vadd.f32 %v1279_v62, %v1144_v58  ;;  %v899_v58 = vpop.f32.mrf.mxu0 }
 0x1ab   : > { %v1288_v32 = vadd.f32 %v1287_v47, %v1151_v27  ;;  %v4771_v44 = vadd.f32 %v889_v43, %v3499_v61  ;;  %v4774_v56 = vmul.f32 %v3523_v10, %v1598_v15  ;;  %v4778_v20 = vmul.f32 %v4747_v25, %v4747_v25  ;;  %v6002_v15 = vld [vmem:[#allocation82_spill] sm:$0xff] }
 0x1ac   : > { %1874 = vadd.xlane.f32.xlu0 %v1873_v36  ;;  %v1599_v48 = vmax.f32 %v4747_v25, 0.0  ;;  %v4783_v62 = vadd.f32 %v1048_v57, %v3517_v7  ;;  %v6001_v43 = vmax.f32 %v4601_v46, 0.0  ;;  %v1879_v36 = vadd.f32 %v6002_v15, %v4609_v17  ;;  %v6005_v57 = vld [vmem:[#allocation87_spill] sm:$0xff] }
 0x1ad   : > { %6000 = vst [vmem:[#allocation125_spill] sm:$0xff] %v4771_v44  ;;  %1281 = vadd.xlane.f32.xlu1 %v1280_v23  ;;  %v1289_v19 = vadd.f32 %v1288_v32, %v1152_v9  ;;  %v4791_v47 = vadd.f32 %v4146_v51, %v1173_v3  ;;  %v4794_v24 = vadd.f32 %v893_v4, %v3490_v54  ;;  %v6004_v23 = vmax.f32 %v4656_v12, 0.0 }
 0x1ae   : > { %v1745_v27 = vmul.f32 %v5942_v33, %v6001_v43  ;;  %v1888_v32 = vadd.f32 %v6005_v57, %v4660_v49  ;;  %v1775_v50 = vmul.f32 %v3515_v6, %v1605_v1  ;;  %v4804_v17 = vmul.f32 %v4771_v44, %v4771_v44  ;;  %v1056_v43 = vpop.f32.mrf.mxu1 }
 0x1af   : > { %6003 = vst [vmem:[#allocation82_spill] sm:$0xff] %v4794_v24  ;;  %v1753_v9 = vmul.f32 %v5942_v33, %v6004_v23  ;;  %v6006_v51 = vmax.f32 %v4624_v22, 0.0  ;;  %v1880_v4 = vadd.f32 %v1879_v36, %v4645_v16  ;;  %v1606_v15 = vmax.f32 %v4771_v44, 0.0  ;;  %v901_v36 = vpop.f32.mrf.mxu0 }
 0x1b0   : > { %1290 = vadd.xlane.f32.xlu0 %v1289_v19  ;;  %v4812_v23 = vadd.f32 %v1050_v38, %v3527_v11  ;;  %v1889_v49 = vadd.f32 %v1888_v32, %v4680_v26  ;;  %v4816_v1 = vadd.f32 %v895_v13, %v3499_v61  ;;  %v1607_v19 = vmax.f32 %v4783_v62, 0.0  ;;  %v1060_v25 = vpop.f32.mrf.mxu1 }
 0x1b1   : > { %v1746_v3 = vmul.f32 %v5946_v31, %v6006_v51  ;;  %v1881_v57 = vadd.f32 %v1880_v4, %v1745_v27  ;;  %v6008_v2 = vmax.f32 %v4670_v60, 0.0  ;;  %v1296_v16 = vadd.f32 %v4697_v34, %v4715_v41 }
 0x1b2   : > { %6007 = vst [vmem:[#allocation87_spill] sm:$0xff] %v4816_v1  ;;  %v1181_v38 = vmul.f32 %v4794_v24, %v4794_v24  ;;  %v1613_v44 = vmax.f32 %v4794_v24, 0.0  ;;  %v1890_v26 = vadd.f32 %v1889_v49, %v1753_v9  ;;  %v4828_v13 = vadd.f32 %v1054_v59, %v3517_v7 }
 0x1b3   : > { %v1754_v51 = vmul.f32 %v5946_v31, %v6008_v2  ;;  %v1882_v32 = vadd.f32 %v1881_v57, %v1746_v3  ;;  %v1614_v27 = vmax.f32 %v4816_v1, 0.0  ;;  %v1297_v4 = vadd.f32 %v1296_v16, %v4719_v39 }
 0x1b4   : > { %v4833_v2 = vadd.f32 %v899_v58, %v3490_v54  ;;  %v1776_v34 = vmul.f32 %v3523_v10, %v1606_v15  ;;  %v1608_v41 = vmax.f32 %v4812_v23, 0.0  ;;  %v4838_v24 = vadd.f32 %v901_v36, %v3499_v61  ;;  %v6010_v58 = vld [vmem:[#allocation107_spill] sm:$0xff] }
 0x1b5   : > { %v1891_v0 = vadd.f32 %v1890_v26, %v1754_v51  ;;  %1883 = vadd.xlane.f32.xlu1 %v1882_v32  ;;  %v1160_v59 = vmul.f32 %v4729_v29, %v4729_v29  ;;  %v4844_v39 = vadd.f32 %v1056_v43, %v3527_v11  ;;  %v4847_v54 = vadd.f32 %v1060_v25, %v3517_v7  ;;  %v1062_v7 = vpop.f32.mrf.mxu1 }
 0x1b6   : > { %6009 = vst [vmem:[#allocation126_spill] sm:$0xff] %v4833_v2  ;;  %v1621_v9 = vmax.f32 %v4833_v2, 0.0  ;;  %v1322_v3 = vadd.f32 %v6010_v58, %v1181_v38  ;;  %v1783_v15 = vmul.f32 %v3515_v6, %v1613_v44  ;;  %v1182_v61 = vmul.f32 %v4816_v1, %v4816_v1  ;;  %v6012_v38 = vld [vmem:[#allocation90_spill] sm:$0xff] }
 0x1b7   : > { %1892 = vadd.xlane.f32.xlu0 %v1891_v0  ;;  %v1622_v49 = vmax.f32 %v4838_v24, 0.0  ;;  %v1784_v57 = vmul.f32 %v3523_v10, %v1614_v27  ;;  %v1615_v51 = vmax.f32 %v4828_v13, 0.0  ;;  %v1298_v16 = vadd.f32 %v1297_v4, %v1160_v59  ;;  %v6013_v59 = vld [vmem:[#allocation104_spill] sm:$0xff] }
 0x1b8   : > { %v1189_v43 = vmul.f32 %v4833_v2, %v4833_v2  ;;  %v1791_v25 = vmul.f32 %v3515_v6, %v1621_v9  ;;  %v1623_v36 = vmax.f32 %v4847_v54, 0.0  ;;  %v6011_v0 = vmax.f32 %v4686_v53, 0.0  ;;  %v6014_v2 = vld [vmem:[#allocation105_spill] sm:$0xff] }
 0x1b9   : > { %v1897_v26 = vadd.f32 %v6012_v38, %v4706_v18  ;;  %1299 = vadd.xlane.f32.xlu1 %v1298_v16  ;;  %v1616_v32 = vmax.f32 %v4844_v39, 0.0  ;;  %v1792_v27 = vmul.f32 %v3523_v10, %v1622_v49  ;;  %v1769_v4 = vmul.f32 %v5942_v33, %v1599_v48  ;;  %v6016_v49 = vld [vmem:[#allocation109_spill] sm:$0xff] }
 0x1ba   : > { %v1761_v44 = vmul.f32 %v5942_v33, %v6011_v0  ;;  %v1906_v58 = vadd.f32 %v6013_v59, %v4759_v40  ;;  %v4872_v9 = vadd.f32 %v1062_v7, %v3527_v11  ;;  %v1777_v0 = vmul.f32 %v5942_v33, %v1607_v19  ;;  %v6017_v11 = vld [vmem:[#allocation117_spill] sm:$0xff] }
 0x1bb   : > { %v1898_v6 = vadd.f32 %v1897_v26, %v4739_v28  ;;  %v1915_v1 = vadd.f32 %v6014_v2, %v1775_v50  ;;  %v6015_v18 = vmax.f32 %v4729_v29, 0.0  ;;  %v1785_v48 = vmul.f32 %v5942_v33, %v1615_v51 }
 0x1bc   : > { %v1907_v10 = vadd.f32 %v1906_v58, %v4774_v56  ;;  %v1924_v38 = vadd.f32 %v6016_v49, %v1783_v15  ;;  %v1793_v28 = vmul.f32 %v5942_v33, %v1623_v36  ;;  %v1933_v7 = vadd.f32 %v6017_v11, %v1791_v25  ;;  %v6019_v25 = vld [vmem:[#allocation112_spill] sm:$0xff]  ;;  %v6020_v36 = vld [vmem:[#allocation110_spill] sm:$0xff] }
 0x1bd   : > { %v1762_v16 = vmul.f32 %v5946_v31, %v6015_v18  ;;  %v1899_v40 = vadd.f32 %v1898_v6, %v1761_v44  ;;  %v1916_v59 = vadd.f32 %v1915_v1, %v1776_v34  ;;  %v6018_v19 = vmax.f32 %v4750_v30, 0.0 }
 0x1be   : > { %v1908_v2 = vadd.f32 %v1907_v10, %v1769_v4  ;;  %v1778_v26 = vmul.f32 %v5946_v31, %v1608_v41  ;;  %v1925_v18 = vadd.f32 %v1924_v38, %v1784_v57  ;;  %v1624_v56 = vmax.f32 %v4872_v9, 0.0 }
 0x1bf   : > { %v1770_v50 = vmul.f32 %v5946_v31, %v6018_v19  ;;  %v1900_v29 = vadd.f32 %v1899_v40, %v1762_v16  ;;  %v1917_v51 = vadd.f32 %v1916_v59, %v1777_v0  ;;  %v1934_v58 = vadd.f32 %v1933_v7, %v1792_v27 }
 0x1c0   : > { %v1786_v1 = vmul.f32 %v5946_v31, %v1616_v32  ;;  %v1926_v34 = vadd.f32 %v1925_v18, %v1785_v48  ;;  %v1305_v33 = vadd.f32 %v4753_v42, %v4763_v45  ;;  %v1330_v44 = vadd.f32 %v6020_v36, %v6019_v25 }
 0x1c1   : > { %v1909_v15 = vadd.f32 %v1908_v2, %v1770_v50  ;;  %1901 = vadd.xlane.f32.xlu1 %v1900_v29  ;;  %v1918_v4 = vadd.f32 %v1917_v51, %v1778_v26  ;;  %v1935_v6 = vadd.f32 %v1934_v58, %v1793_v28  ;;  %v1175_v41 = vmul.f32 %v4783_v62, %v4783_v62 }
 0x1c2   : > { %v1927_v57 = vadd.f32 %v1926_v34, %v1786_v1  ;;  %v1331_v0 = vadd.f32 %v1330_v44, %v1189_v43  ;;  %v1190_v27 = vmul.f32 %v4838_v24, %v4838_v24  ;;  %v1794_v32 = vmul.f32 %v5946_v31, %v1624_v56 }
 0x1c3   : > { %1910 = vadd.xlane.f32.xlu0 %v1909_v15  ;;  %v1314_v42 = vadd.f32 %v4791_v47, %v4804_v17  ;;  %v1183_v45 = vmul.f32 %v4828_v13, %v4828_v13  ;;  %v1306_v29 = vadd.f32 %v1305_v33, %v4778_v20  ;;  %v1323_v16 = vadd.f32 %v1322_v3, %v1182_v61 }
 0x1c4   : > { %v1936_v10 = vadd.f32 %v1935_v6, %v1794_v32  ;;  %v1168_v43 = vmul.f32 %v4750_v30, %v4750_v30  ;;  %v1191_v48 = vmul.f32 %v4847_v54, %v4847_v54  ;;  %v1332_v31 = vadd.f32 %v1331_v0, %v1190_v27 }
 0x1c5   : > { %1919 = vadd.xlane.f32.xlu1 %v1918_v4  ;;  %v1315_v49 = vadd.f32 %v1314_v42, %v1175_v41  ;;  %v1324_v40 = vadd.f32 %v1323_v16, %v1183_v45  ;;  %v1176_v47 = vmul.f32 %v4812_v23, %v4812_v23  ;;  %v1184_v20 = vmul.f32 %v4844_v39, %v4844_v39 }
 0x1c6   : > { %v1307_v38 = vadd.f32 %v1306_v29, %v1168_v43  ;;  %v1333_v3 = vadd.f32 %v1332_v31, %v1191_v48  ;;  %v1192_v59 = vmul.f32 %v4872_v9, %v4872_v9  ;;  %v4914_v19 = vstv %s1939_s16 }
 0x1c7   : > { %1928 = vadd.xlane.f32.xlu0 %v1927_v57  ;;  %v1316_v17 = vadd.f32 %v1315_v49, %v1176_v47  ;;  %v1325_v61 = vadd.f32 %v1324_v40, %v1184_v20 }
 0x1c8   : > { %v1334_v28 = vadd.f32 %v1333_v3, %v1192_v59 }
 0x1c9   : > { %1937 = vadd.xlane.f32.xlu1 %v1936_v10 }
 0x1cb   : > { %1308 = vadd.xlane.f32.xlu0 %v1307_v38 }
 0x1cd   : > { %1317 = vadd.xlane.f32.xlu1 %v1316_v17 }
 0x1cf   : > { %1326 = vadd.xlane.f32.xlu0 %v1325_v61 }
 0x1d1   : > { %1335 = vadd.xlane.f32.xlu1 %v1334_v28 }
 0x201   : > { %v1201_v11 = vpop.xlane.xlu0 %1200 }
 0x202   : > { %2772 = vrsqrt.f32 %v1201_v11  ;;  %vm1339_vm1 = vcmp.eq.f32.partialorder %v1201_v11, inf  ;;  %v1342_v32 = vand.u32 2147483648, %v1201_v11  ;;  %vm1341_vm3 = vcmp.eq.f32.partialorder %v1201_v11, 0.0 }
 0x205   : > { %v1210_v7 = vpop.xlane.xlu1 %1209 }
 0x206   : > { %2774 = vrsqrt.f32 %v1210_v7  ;;  %v1803_v50 = vpop.xlane.xlu0 %1802  ;;  %vm1346_vm2 = vcmp.eq.f32.partialorder %v1210_v7, inf  ;;  %v1349_v16 = vand.u32 2147483648, %v1210_v7  ;;  %vm1348_vm4 = vcmp.eq.f32.partialorder %v1210_v7, 0.0 }
 0x207   : > { %v4917_v2 = vadd.f32 %v4914_v19, %v1803_v50 }
 0x209   : > { %v1973_v26 = vmin.f32 %v4917_v2, 20.0  ;;  %vm1957_vm8 = vcmp.gt.f32.partialorder %v4917_v2, 20.0 }
 0x20b   : > { %v1989_v18 = vmul.f32 1.442695, %v1973_v26 }
 0x20c   : > { %v1812_v56 = vpop.xlane.xlu0 %1811 }
 0x20d   : > { %v4921_v51 = vadd.f32 %v4914_v19, %v1812_v56  ;;  %2776 = vpow2.f32 %v1989_v18 }
 0x20e   : > { %v1821_v58 = vpop.xlane.xlu1 %1820 }
 0x20f   : > { %v1974_v15 = vmin.f32 %v4921_v51, 20.0  ;;  %v4925_v1 = vadd.f32 %v4914_v19, %v1821_v58  ;;  %v2773_v33 = vpop.eup %2772  ;;  %vm1958_vm13 = vcmp.gt.f32.partialorder %v4921_v51, 20.0 }
 0x210   : > { %v1219_v34 = vpop.xlane.xlu0 %1218  ;;  %v1338_v41 = vmul.f32 %v2773_v33, %v1201_v11 }
 0x211   : > { %v1991_v25 = vmul.f32 1.442695, %v1974_v15  ;;  %v1975_v36 = vmin.f32 %v4925_v1, 20.0  ;;  %2778 = vrsqrt.f32 %v1219_v34  ;;  %vm1353_vm5 = vcmp.eq.f32.partialorder %v1219_v34, inf }
 0x212   : > { %v4928_v6 = vpop.xlane.xlu1 %1227  ;;  %v1340_v27 = vsel %vm1339_vm1, %v1201_v11, %v1338_v41  ;;  %v1356_v15 = vand.u32 2147483648, %v1219_v34  ;;  %vm1355_vm6 = vcmp.eq.f32.partialorder %v1219_v34, 0.0  ;;  %vm1959_vm15 = vcmp.gt.f32.partialorder %v4925_v1, 20.0 }
 0x213   : > { %v2775_v44 = vpop.eup %2774  ;;  %2780 = vpow2.f32 %v1991_v25  ;;  %v1993_v4 = vmul.f32 1.442695, %v1975_v36  ;;  %v1343_v29 = vsel %vm1341_vm3, %v1342_v32, %v1340_v27  ;;  %vm1360_vm9 = vcmp.eq.f32.partialorder %v4928_v6, inf }
 0x214   : > { %v4930_v57 = vpop.xlane.xlu0 %1236  ;;  %2782 = vrsqrt.f32 %v4928_v6  ;;  %v1345_v0 = vmul.f32 %v2775_v44, %v1210_v7  ;;  %v1449_v40 = vmax.f32 %v1343_v29, 1e-12  ;;  %vm1362_vm10 = vcmp.eq.f32.partialorder %v4928_v6, 0.0 }
 0x215   : > { %2784 = vpow2.f32 %v1993_v4  ;;  %vm1367_vm11 = vcmp.eq.f32.partialorder %v4930_v57, inf  ;;  %vm1369_vm12 = vcmp.eq.f32.partialorder %v4930_v57, 0.0 }
 0x216   : > { %2786 = vrsqrt.f32 %v4930_v57  ;;  %v1347_v42 = vsel %vm1346_vm2, %v1210_v7, %v1345_v0 }
 0x217   : > { %v1350_v31 = vsel %vm1348_vm4, %v1349_v16, %v1347_v42  ;;  %v1363_v42 = vand.u32 2147483648, %v4928_v6 }
 0x218   : > { %v1450_v3 = vmax.f32 %v1350_v31, 1e-12 }
 0x21a   : > { %v4934_v45 = vpop.eup %2776  ;;  %v1830_v10 = vpop.xlane.xlu1 %1829 }
 0x21b   : > { %v2021_v43 = vadd.f32 1.0, %v4934_v45  ;;  %v4938_v48 = vadd.f32 %v4914_v19, %v1830_v10  ;;  %v2024_v58 = vmul.f32 -0.5, %v4934_v45  ;;  %v2027_v16 = vand.u32 2147483647, %v4934_v45 }
 0x21d   : > { %v1839_v49 = vpop.xlane.xlu0 %1838  ;;  %2788 = vlog2.f32 %v2021_v43  ;;  %v1976_v20 = vmin.f32 %v4938_v48, 20.0  ;;  %v2025_v41 = vadd.f32 1.0, %v2024_v58  ;;  %vm2028_vm14 = vcmp.lt.f32.partialorder %v2027_v16, 0.0004427343  ;;  %v6023_v16 = vld [vmem:[#allocation13_spill] sm:$0xff] }
 0x21e   : > { %v4941_v38 = vadd.f32 %v4914_v19, %v1839_v49  ;;  %v2779_v47 = vpop.eup %2778  ;;  %v4948_v7 = vpop.xlane.xlu1 %1245  ;;  %2790 = vrcp.f32 %v1449_v40  ;;  %v1370_v49 = vand.u32 2147483648, %v4930_v57 }
 0x21f   : > { %v1352_v61 = vmul.f32 %v2779_v47, %v1219_v34  ;;  %v1995_v11 = vmul.f32 1.442695, %v1976_v20  ;;  %v2026_v20 = vmul.f32 %v4934_v45, %v2025_v41  ;;  %vm1374_vm1 = vcmp.eq.f32.partialorder %v4948_v7, inf }
 0x220   : > { %v4944_v17 = vpop.eup %2780  ;;  %v1977_v59 = vmin.f32 %v4941_v38, 20.0  ;;  %vm1376_vm3 = vcmp.eq.f32.partialorder %v4948_v7, 0.0 }
 0x221   : > { %v2030_v28 = vadd.f32 1.0, %v4944_v17  ;;  %v2783_v50 = vpop.eup %2782  ;;  %v1354_v26 = vsel %vm1353_vm5, %v1219_v34, %v1352_v61  ;;  %v4950_v18 = vpop.xlane.xlu0 %1254  ;;  %v2033_v27 = vmul.f32 -0.5, %v4944_v17 }
 0x222   : > { %v4952_v56 = vpop.eup %2784  ;;  %v1997_v36 = vmul.f32 1.442695, %v1977_v59  ;;  %v1357_v44 = vsel %vm1355_vm6, %v1356_v15, %v1354_v26  ;;  %v1359_v4 = vmul.f32 %v2783_v50, %v4928_v6  ;;  %vm1381_vm4 = vcmp.eq.f32.partialorder %v4950_v18, inf }
 0x223   : > { %2792 = vlog2.f32 %v2030_v28  ;;  %v2787_v33 = vpop.eup %2786  ;;  %v2039_v25 = vadd.f32 1.0, %v4952_v56  ;;  %v1451_v32 = vmax.f32 %v1357_v44, 1e-12  ;;  %v2042_v10 = vmul.f32 -0.5, %v4952_v56 }
 0x224   : > { %2794 = vrcp.f32 %v1450_v3  ;;  %v1366_v0 = vmul.f32 %v2787_v33, %v4930_v57  ;;  %v1361_v43 = vsel %vm1360_vm9, %v4928_v6, %v1359_v4  ;;  %v2036_v3 = vand.u32 2147483647, %v4944_v17 }
 0x225   : > { %2796 = vpow2.f32 %v1995_v11  ;;  %v2034_v28 = vadd.f32 1.0, %v2033_v27  ;;  %v2043_v45 = vadd.f32 1.0, %v2042_v10  ;;  %v1364_v50 = vsel %vm1362_vm10, %v1363_v42, %v1361_v43  ;;  %v6024_v43 = vld [vmem:[#allocation14_spill] sm:$0xff] }
 0x226   : > { %2798 = vlog2.f32 %v2039_v25  ;;  %v1848_v34 = vpop.xlane.xlu1 %1847  ;;  %v1368_v61 = vsel %vm1367_vm11, %v4930_v57, %v1366_v0  ;;  %vm5003_vm0 = vcmp.lt.f32.partialorder %v2036_v3, 0.0004427343  ;;  %v2045_v44 = vand.u32 2147483647, %v4952_v56  ;;  %v6026_v3 = vld [vmem:[#allocation17_spill] sm:$0xff] }
 0x227   : > { %2800 = vrsqrt.f32 %v4948_v7  ;;  %v4971_v31 = vadd.f32 %v4914_v19, %v1848_v34  ;;  %v1371_v15 = vsel %vm1369_vm12, %v1370_v49, %v1368_v61  ;;  %v2035_v57 = vmul.f32 %v4944_v17, %v2034_v28  ;;  %v6027_v28 = vld [vmem:[#allocation101_spill] sm:$0xff] }
 0x228   : > { %2802 = vpow2.f32 %v1997_v36  ;;  %v1452_v34 = vmax.f32 %v1364_v50, 1e-12  ;;  %v2044_v42 = vmul.f32 %v4952_v56, %v2043_v45  ;;  %v6029_v50 = vld [vmem:[#allocation106_spill] sm:$0xff]  ;;  %vm2046_vm2 = vcmp.lt.f32.partialorder %v2045_v44, 0.0004427343 }
 0x229   : > { %v1857_v29 = vpop.xlane.xlu0 %1856  ;;  %2804 = vrsqrt.f32 %v4950_v18  ;;  %v1978_v11 = vmin.f32 %v4971_v31, 20.0  ;;  %v1377_v6 = vand.u32 2147483648, %v4948_v7  ;;  %vm1383_vm5 = vcmp.eq.f32.partialorder %v4950_v18, 0.0 }
 0x22a   : > { %v4974_v40 = vadd.f32 %v4914_v19, %v1857_v29  ;;  %v2789_v47 = vpop.eup %2788  ;;  %2806 = vrcp.f32 %v1451_v32  ;;  %v5019_v17 = vpop.xlane.xlu1 %1263  ;;  %vm1960_vm6 = vcmp.gt.f32.partialorder %v4938_v48, 20.0  ;;  %vm1961_vm10 = vcmp.gt.f32.partialorder %v4941_v38, 20.0 }
 0x22b   : > { %v2023_v59 = vmul.f32 0.6931472, %v2789_v47  ;;  %v1999_v33 = vmul.f32 1.442695, %v1978_v11  ;;  %v2791_v25 = vpop.eup %2790  ;;  %v6025_v47 = vld [vmem:[#allocation15_spill] sm:$0xff] }
 0x22c   : > { %v1979_v26 = vmin.f32 %v4974_v40, 20.0  ;;  %v6028_v11 = vld [vmem:[#allocation103_spill] sm:$0xff] }
 0x22d   : > { %v2029_v58 = vsel %vm2028_vm14, %v2026_v20, %v2023_v59  ;;  %2808 = vpow2.f32 %v1999_v33  ;;  %vm1963_vm14 = vcmp.gt.f32.partialorder %v4974_v40, 20.0 }
 0x22e   : > { %v2165_v36 = vsel %vm1957_vm8, %v4917_v2, %v2029_v58  ;;  %v2001_v4 = vmul.f32 1.442695, %v1979_v26  ;;  %v1453_v2 = vmax.f32 %v1371_v15, 1e-12  ;;  %v6030_v58 = vld [vmem:[#allocation114_spill] sm:$0xff]  ;;  %vm1388_vm8 = vcmp.eq.f32.partialorder %v5019_v17, inf }
 0x22f   : > { %v2181_v0 = vmul.f32 %v2791_v25, %v2165_v36  ;;  %2454 = vst.msk [vmem:[%s4988_s20] sm:$0xff] %vm2453_vm7, %v2165_v36 }
 0x230   : > { %v2793_v41 = vpop.eup %2792  ;;  %2810 = vpow2.f32 %v2001_v4 }
 0x231   : > { %v2795_v27 = vpop.eup %2794  ;;  %v2032_v32 = vmul.f32 0.6931472, %v2793_v41  ;;  %v2197_v10 = vmul.f32 %v2181_v0, %v6023_v16  ;;  %v2198_v49 = vmul.f32 %v2181_v0, %v6024_v43  ;;  %v2199_v20 = vmul.f32 %v2181_v0, %v6025_v47  ;;  %v6031_v16 = vld [vmem:[#allocation16_spill] sm:$0xff] }
 0x232   : > { %v5012_v29 = vpop.eup %2796  ;;  %v2200_v61 = vmul.f32 %v2181_v0, %v6026_v3  ;;  %v2201_v56 = vmul.f32 %v2181_v0, %v6027_v28  ;;  %v2202_v45 = vmul.f32 %v2181_v0, %v6028_v11  ;;  %v2203_v26 = vmul.f32 %v2181_v0, %v6029_v50  ;;  %v6036_v28 = vld [vmem:[#allocation111_spill] sm:$0xff] }
 0x233   : > { %v2799_v59 = vpop.eup %2798  ;;  %v2204_v15 = vmul.f32 %v2181_v0, %v6030_v58  ;;  %2325 = vst [vmem:[%s5026_s22] sm:$0xff] %v2197_v10  ;;  %2326 = vst [vmem:[%s5026_s22 + $0x8] sm:$0xff] %v2198_v49  ;;  %v2038_v25 = vsel %vm5003_vm0, %v2035_v57, %v2032_v32  ;;  %2812 = vrcp.f32 %v1452_v34  ;;  %v2048_v4 = vadd.f32 1.0, %v5012_v29  ;;  %v6033_v49 = vld [vmem:[#allocation19_spill] sm:$0xff] }
 0x234   : > { %v2801_v33 = vpop.eup %2800  ;;  %2327 = vst [vmem:[%s5026_s22 + $0x10] sm:$0xff] %v2199_v20  ;;  %2328 = vst [vmem:[%s5026_s22 + $0x18] sm:$0xff] %v2200_v61  ;;  %v2041_v36 = vmul.f32 0.6931472, %v2799_v59  ;;  %v2166_v0 = vsel %vm1958_vm13, %v4921_v51, %v2038_v25  ;;  %2814 = vrsqrt.f32 %v5019_v17  ;;  %v6034_v20 = vld [vmem:[#allocation21_spill] sm:$0xff]  ;;  %v6035_v61 = vld [vmem:[#allocation108_spill] sm:$0xff] }
 0x235   : > { %v5035_v41 = vpop.eup %2802  ;;  %2329 = vst [vmem:[%s5026_s22 + $0x20] sm:$0xff] %v2201_v56  ;;  %2330 = vst [vmem:[%s5026_s22 + $0x28] sm:$0xff] %v2202_v45  ;;  %v2182_v57 = vmul.f32 %v2795_v27, %v2166_v0  ;;  %2816 = vlog2.f32 %v2048_v4  ;;  %v1373_v44 = vmul.f32 %v2801_v33, %v4948_v7  ;;  %v6037_v11 = vld [vmem:[#allocation115_spill] sm:$0xff]  ;;  %v1384_v58 = vand.u32 2147483648, %v4950_v18 }
 0x236   : > { %2331 = vst [vmem:[%s5026_s22 + $0x30] sm:$0xff] %v2203_v26  ;;  %2332 = vst [vmem:[%s5026_s22 + $0x38] sm:$0xff] %v2204_v15  ;;  %v2047_v34 = vsel %vm2046_vm2, %v2044_v42, %v2041_v36  ;;  %2818 = vrcp.f32 %v1453_v2  ;;  %v2057_v51 = vadd.f32 1.0, %v5035_v41  ;;  %v2805_v27 = vpop.eup %2804  ;;  %v6032_v42 = vld [vmem:[#allocation18_spill] sm:$0xff]  ;;  %v1866_v15 = vpop.xlane.xlu1 %1865  ;;  %v2051_v33 = vmul.f32 -0.5, %v5012_v29  ;;  %v6038_v36 = vld [vmem:[#allocation20_spill] sm:$0xff] }
 0x237   : > { %2455 = vst.msk [vmem:[%s4988_s20 + $0x8] sm:$0xff] %vm2453_vm7, %v2166_v0  ;;  %v2167_v32 = vsel %vm1959_vm15, %v4925_v1, %v2047_v34  ;;  %v2205_v10 = vmul.f32 %v2182_v57, %v6031_v16  ;;  %v2206_v43 = vmul.f32 %v2182_v57, %v6032_v42  ;;  %v2207_v47 = vmul.f32 %v2182_v57, %v6033_v49  ;;  %v5061_v1 = vpop.xlane.xlu0 %1272  ;;  %v2807_v2 = vpop.eup %2806  ;;  %v6039_v0 = vld [vmem:[#allocation22_spill] sm:$0xff]  ;;  %v6040_v34 = vld [vmem:[#allocation23_spill] sm:$0xff]  ;;  %v6042_v42 = vld [vmem:[#allocation113_spill] sm:$0xff] }
 0x238   : > { %v2208_v3 = vmul.f32 %v2182_v57, %v6034_v20  ;;  %2456 = vst.msk [vmem:[%s4988_s20 + $0x10] sm:$0xff] %vm2453_vm7, %v2167_v32  ;;  %v2209_v59 = vmul.f32 %v2182_v57, %v6035_v61  ;;  %v2210_v56 = vmul.f32 %v2182_v57, %v6036_v28  ;;  %v2211_v45 = vmul.f32 %v2182_v57, %v6037_v11 }
 0x239   : > { %v2212_v50 = vmul.f32 %v2182_v57, %v4217_v37  ;;  %2333 = vst [vmem:[%s5026_s22 + $0x40] sm:$0xff] %v2205_v10  ;;  %2334 = vst [vmem:[%s5026_s22 + $0x48] sm:$0xff] %v2206_v43  ;;  %v2183_v26 = vmul.f32 %v2807_v2, %v2167_v32  ;;  %2820 = vlog2.f32 %v2057_v51  ;;  %v1375_v37 = vsel %vm1374_vm1, %v4948_v7, %v1373_v44  ;;  %v6041_v51 = vld [vmem:[#allocation27_spill] sm:$0xff]  ;;  %v6043_v44 = vld [vmem:[#allocation116_spill] sm:$0xff] }
 0x23a   : > { %2335 = vst [vmem:[%s5026_s22 + $0x50] sm:$0xff] %v2207_v47  ;;  %2336 = vst [vmem:[%s5026_s22 + $0x58] sm:$0xff] %v2208_v3  ;;  %v1380_v25 = vmul.f32 %v2805_v27, %v4950_v18  ;;  %2822 = vrsqrt.f32 %v5061_v1  ;;  %v5087_v10 = vpop.eup %2808  ;;  %v6044_v27 = vld [vmem:[#allocation119_spill] sm:$0xff]  ;;  %v2060_v2 = vmul.f32 -0.5, %v5035_v41  ;;  %v1378_v61 = vsel %vm1376_vm3, %v1377_v6, %v1375_v37 }
 0x23b   : > { %2337 = vst [vmem:[%s5026_s22 + $0x60] sm:$0xff] %v2209_v59  ;;  %2338 = vst [vmem:[%s5026_s22 + $0x68] sm:$0xff] %v2210_v56  ;;  %v2213_v4 = vmul.f32 %v2183_v26, %v6038_v36  ;;  %v2214_v57 = vmul.f32 %v2183_v26, %v6039_v0  ;;  %v2215_v32 = vmul.f32 %v2183_v26, %v6040_v34  ;;  %v2066_v28 = vadd.f32 1.0, %v5087_v10  ;;  %v1875_v56 = vpop.xlane.xlu0 %1874 }
 0x23c   : > { %2339 = vst [vmem:[%s5026_s22 + $0x70] sm:$0xff] %v2211_v45  ;;  %2340 = vst [vmem:[%s5026_s22 + $0x78] sm:$0xff] %v2212_v50  ;;  %v2216_v16 = vmul.f32 %v2183_v26, %v6041_v51  ;;  %v2217_v43 = vmul.f32 %v2183_v26, %v6042_v42  ;;  %v2218_v49 = vmul.f32 %v2183_v26, %v6043_v44  ;;  %v2054_v11 = vand.u32 2147483647, %v5012_v29  ;;  %v5117_v50 = vpop.xlane.xlu1 %1281 }
 0x23d   : > { %v2219_v47 = vmul.f32 %v2183_v26, %v6044_v27  ;;  %v2220_v20 = vmul.f32 %v2183_v26, %v4242_v5  ;;  %v5093_v3 = vpop.eup %2810  ;;  %2341 = vst [vmem:[%s5026_s22 + $0x80] sm:$0xff] %v2213_v4  ;;  %2342 = vst [vmem:[%s5026_s22 + $0x88] sm:$0xff] %v2214_v57  ;;  %v1382_v59 = vsel %vm1381_vm4, %v4950_v18, %v1380_v25  ;;  %v2052_v5 = vadd.f32 1.0, %v2051_v33 }
 0x23e   : > { %2343 = vst [vmem:[%s5026_s22 + $0x90] sm:$0xff] %v2215_v32  ;;  %2344 = vst [vmem:[%s5026_s22 + $0x98] sm:$0xff] %v2216_v16  ;;  %v1385_v45 = vsel %vm1383_vm5, %v1384_v58, %v1382_v59  ;;  %v2075_v7 = vadd.f32 1.0, %v5093_v3  ;;  %2824 = vlog2.f32 %v2066_v28  ;;  %v5115_v6 = vadd.f32 %v4914_v19, %v1866_v15 }
 0x23f   : > { %2345 = vst [vmem:[%s5026_s22 + $0xa0] sm:$0xff] %v2217_v43  ;;  %2346 = vst [vmem:[%s5026_s22 + $0xa8] sm:$0xff] %v2218_v49  ;;  %v1454_v37 = vmax.f32 %v1378_v61, 1e-12  ;;  %v2061_v33 = vadd.f32 1.0, %v2060_v2  ;;  %v2053_v58 = vmul.f32 %v5012_v29, %v2052_v5  ;;  %v1391_v0 = vand.u32 2147483648, %v5019_v17  ;;  %v5136_v29 = vpop.xlane.xlu0 %1290 }
 0x240   : > { %2347 = vst [vmem:[%s5026_s22 + $0xb0] sm:$0xff] %v2219_v47  ;;  %2348 = vst [vmem:[%s5026_s22 + $0xb8] sm:$0xff] %v2220_v20  ;;  %v2813_v26 = vpop.eup %2812  ;;  %2826 = vlog2.f32 %v2075_v7  ;;  %v1455_v36 = vmax.f32 %v1385_v45, 1e-12  ;;  %vm5122_vm9 = vcmp.lt.f32.partialorder %v2054_v11, 0.0004427343  ;;  %v5134_v16 = vadd.f32 %v4914_v19, %v1875_v56  ;;  %v1884_v20 = vpop.xlane.xlu1 %1883 }
 0x241   : > { %v2815_v25 = vpop.eup %2814  ;;  %v2063_v15 = vand.u32 2147483647, %v5035_v41  ;;  %v2069_v32 = vmul.f32 -0.5, %v5087_v10  ;;  %v1980_v51 = vmin.f32 %v5115_v6, 20.0  ;;  %2828 = vrcp.f32 %v1454_v37 }
 0x242   : > { %v2817_v18 = vpop.eup %2816  ;;  %v2072_v42 = vand.u32 2147483647, %v5087_v10  ;;  %v2078_v43 = vmul.f32 -0.5, %v5093_v3  ;;  %v1387_v44 = vmul.f32 %v2815_v25, %v5019_v17  ;;  %v2062_v27 = vmul.f32 %v5035_v41, %v2061_v33  ;;  %v6051_v25 = vld [vmem:[#allocation25_spill] sm:$0xff] }
 0x243   : > { %v5128_v57 = vpop.eup %2818  ;;  %v2050_v34 = vmul.f32 0.6931472, %v2817_v18  ;;  %2830 = vrcp.f32 %v1455_v36  ;;  %v2003_v47 = vmul.f32 1.442695, %v1980_v51  ;;  %vm5147_vm11 = vcmp.lt.f32.partialorder %v2063_v15, 0.0004427343 }
 0x244   : > { %v1981_v28 = vmin.f32 %v5134_v16, 20.0  ;;  %2832 = vrsqrt.f32 %v5117_v50  ;;  %v2070_v11 = vadd.f32 1.0, %v2069_v32  ;;  %v2081_v45 = vand.u32 2147483647, %v5093_v3  ;;  %v6052_v36 = vld [vmem:[#allocation26_spill] sm:$0xff]  ;;  %v6054_v15 = vld [vmem:[#allocation36_spill] sm:$0xff]  ;;  %v1893_v32 = vpop.xlane.xlu0 %1892 }
 0x245   : > { %v2056_v49 = vsel %vm5122_vm9, %v2053_v58, %v2050_v34  ;;  %vm5156_vm12 = vcmp.lt.f32.partialorder %v2072_v42, 0.0004427343  ;;  %v5163_v37 = vsel %vm1388_vm8, %v5019_v17, %v1387_v44  ;;  %2834 = vpow2.f32 %v2003_v47  ;;  %v6053_v58 = vld [vmem:[#allocation28_spill] sm:$0xff]  ;;  %v6055_v51 = vld [vmem:[#allocation118_spill] sm:$0xff] }
 0x246   : > { %v2821_v2 = vpop.eup %2820  ;;  %v2168_v61 = vsel %vm1960_vm6, %v4938_v48, %v2056_v49  ;;  %v2079_v48 = vadd.f32 1.0, %v2078_v43  ;;  %vm1962_vm13 = vcmp.gt.f32.partialorder %v4971_v31, 20.0  ;;  %v6056_v43 = vld [vmem:[#allocation120_spill] sm:$0xff]  ;;  %vm1390_vm15 = vcmp.eq.f32.partialorder %v5019_v17, 0.0  ;;  %v6065_v17 = vld [vmem:[#allocation37_spill] sm:$0xff] }
 0x247   : > { %v2823_v56 = vpop.eup %2822  ;;  %v2184_v5 = vmul.f32 %v2813_v26, %v2168_v61  ;;  %2457 = vst.msk [vmem:[%s4988_s20 + $0x18] sm:$0xff] %vm2453_vm7, %v2168_v61  ;;  %v2059_v41 = vmul.f32 0.6931472, %v2821_v2  ;;  %v2005_v26 = vmul.f32 1.442695, %v1981_v28  ;;  %vm1395_vm1 = vcmp.eq.f32.partialorder %v5061_v1, inf }
 0x248   : > { %vm5182_vm0 = vcmp.lt.f32.partialorder %v2081_v45, 0.0004427343  ;;  %v2071_v59 = vmul.f32 %v5087_v10, %v2070_v11  ;;  %v2080_v10 = vmul.f32 %v5093_v3, %v2079_v48  ;;  %v6064_v48 = vld [vmem:[#allocation31_spill] sm:$0xff]  ;;  %vm1397_vm2 = vcmp.eq.f32.partialorder %v5061_v1, 0.0 }
 0x249   : > { %v2221_v33 = vmul.f32 %v2184_v5, %v6051_v25  ;;  %v2222_v18 = vmul.f32 %v2184_v5, %v6052_v36  ;;  %v2223_v4 = vmul.f32 %v2184_v5, %v6053_v58  ;;  %v2224_v34 = vmul.f32 %v2184_v5, %v6054_v15  ;;  %v6060_v36 = vld [vmem:[#allocation34_spill] sm:$0xff]  ;;  %v6061_v58 = vld [vmem:[#allocation35_spill] sm:$0xff] }
 0x24a   : > { %v2225_v42 = vmul.f32 %v2184_v5, %v6055_v51  ;;  %v2226_v44 = vmul.f32 %v2184_v5, %v6056_v43  ;;  %v2227_v49 = vmul.f32 %v2184_v5, %v4291_v35  ;;  %v2228_v47 = vmul.f32 %v2184_v5, %v4295_v55  ;;  %v5190_v55 = vpop.xlane.xlu1 %1299  ;;  %v6062_v15 = vld [vmem:[#allocation38_spill] sm:$0xff] }
 0x24b   : > { %2349 = vst [vmem:[%s5026_s22 + $0xc0] sm:$0xff] %v2221_v33  ;;  %2350 = vst [vmem:[%s5026_s22 + $0xc8] sm:$0xff] %v2222_v18  ;;  %v2065_v2 = vsel %vm5147_vm11, %v2062_v27, %v2059_v41  ;;  %2836 = vpow2.f32 %v2005_v26  ;;  %v5188_v35 = vadd.f32 %v4914_v19, %v1884_v20  ;;  %v2825_v28 = vpop.eup %2824  ;;  %v5202_v5 = vadd.f32 %v4914_v19, %v1893_v32  ;;  %v6059_v33 = vld [vmem:[#allocation33_spill] sm:$0xff] }
 0x24c   : > { %2351 = vst [vmem:[%s5026_s22 + $0xd0] sm:$0xff] %v2223_v4  ;;  %2352 = vst [vmem:[%s5026_s22 + $0xd8] sm:$0xff] %v2224_v34  ;;  %v2169_v27 = vsel %vm1961_vm10, %v4941_v38, %v2065_v2  ;;  %2838 = vrsqrt.f32 %v5136_v29  ;;  %v2068_v45 = vmul.f32 0.6931472, %v2825_v28  ;;  %v1394_v26 = vmul.f32 %v2823_v56, %v5061_v1  ;;  %v6063_v34 = vld [vmem:[#allocation121_spill] sm:$0xff] }
 0x24d   : > { %2353 = vst [vmem:[%s5026_s22 + $0xe0] sm:$0xff] %v2225_v42  ;;  %2354 = vst [vmem:[%s5026_s22 + $0xe8] sm:$0xff] %v2226_v44  ;;  %v2827_v20 = vpop.eup %2826  ;;  %v2185_v41 = vmul.f32 %v5128_v57, %v2169_v27  ;;  %v1982_v25 = vmin.f32 %v5188_v35, 20.0  ;;  %v1983_v11 = vmin.f32 %v5202_v5, 20.0  ;;  %2840 = vrsqrt.f32 %v5190_v55 }
 0x24e   : > { %2355 = vst [vmem:[%s5026_s22 + $0xf0] sm:$0xff] %v2227_v49  ;;  %2356 = vst [vmem:[%s5026_s22 + $0xf8] sm:$0xff] %v2228_v47  ;;  %v2077_v38 = vmul.f32 0.6931472, %v2827_v20  ;;  %v2829_v43 = vpop.eup %2828  ;;  %v2074_v44 = vsel %vm5156_vm12, %v2071_v59, %v2068_v45  ;;  %v1398_v61 = vand.u32 2147483648, %v5061_v1  ;;  %v1396_v20 = vsel %vm1395_vm1, %v5061_v1, %v1394_v26 }
 0x24f   : > { %2458 = vst.msk [vmem:[%s4988_s20 + $0x20] sm:$0xff] %vm2453_vm7, %v2169_v27  ;;  %v2229_v57 = vmul.f32 %v2185_v41, %v6059_v33  ;;  %v2230_v18 = vmul.f32 %v2185_v41, %v6060_v36  ;;  %v2231_v4 = vmul.f32 %v2185_v41, %v6061_v58  ;;  %v2232_v56 = vmul.f32 %v2185_v41, %v6062_v15  ;;  %v6070_v36 = vld [vmem:[#allocation24_spill] sm:$0xff] }
 0x250   : > { %v2233_v32 = vmul.f32 %v2185_v41, %v6063_v34  ;;  %v2234_v51 = vmul.f32 %v2185_v41, %v4317_v52  ;;  %v2235_v3 = vmul.f32 %v2185_v41, %v4345_v8  ;;  %v2236_v42 = vmul.f32 %v2185_v41, %v6064_v48  ;;  %v2831_v2 = vpop.eup %2830 }
 0x251   : > { %2357 = vst [vmem:[%s5026_s22 + $0x100] sm:$0xff] %v2229_v57  ;;  %2358 = vst [vmem:[%s5026_s22 + $0x108] sm:$0xff] %v2230_v18  ;;  %v2083_v49 = vsel %vm5182_vm0, %v2080_v10, %v2077_v38  ;;  %v2007_v47 = vmul.f32 1.442695, %v1982_v25  ;;  %v2009_v52 = vmul.f32 1.442695, %v1983_v11  ;;  %v2170_v8 = vsel %vm1962_vm13, %v4971_v31, %v2074_v44  ;;  %v2833_v28 = vpop.eup %2832 }
 0x252   : > { %2359 = vst [vmem:[%s5026_s22 + $0x110] sm:$0xff] %v2231_v4  ;;  %2360 = vst [vmem:[%s5026_s22 + $0x118] sm:$0xff] %v2232_v56  ;;  %v2171_v7 = vsel %vm1963_vm14, %v4974_v40, %v2083_v49  ;;  %v2186_v27 = vmul.f32 %v2829_v43, %v2170_v8  ;;  %v5249_v31 = vsel %vm1390_vm15, %v1391_v0, %v5163_v37  ;;  %v1902_v40 = vpop.xlane.xlu1 %1901  ;;  %vm1402_vm3 = vcmp.eq.f32.partialorder %v5117_v50, inf  ;;  %v5256_v45 = vpop.eup %2834  ;;  %v6066_v37 = vld [vmem:[#allocation39_spill] sm:$0xff]  ;;  %v6067_v38 = vld [vmem:[#allocation40_spill] sm:$0xff] }
 0x253   : > { %2361 = vst [vmem:[%s5026_s22 + $0x120] sm:$0xff] %v2233_v32  ;;  %2362 = vst [vmem:[%s5026_s22 + $0x128] sm:$0xff] %v2234_v51  ;;  %v2187_v59 = vmul.f32 %v2831_v2, %v2171_v7  ;;  %2842 = vpow2.f32 %v2007_v47  ;;  %v1401_v41 = vmul.f32 %v2833_v28, %v5117_v50  ;;  %v6068_v11 = vld [vmem:[#allocation43_spill] sm:$0xff]  ;;  %v6072_v56 = vld [vmem:[#allocation42_spill] sm:$0xff]  ;;  %v1911_v28 = vpop.xlane.xlu0 %1910  ;;  %vm1404_vm4 = vcmp.eq.f32.partialorder %v5117_v50, 0.0 }
 0x254   : > { %2363 = vst [vmem:[%s5026_s22 + $0x130] sm:$0xff] %v2235_v3  ;;  %2364 = vst [vmem:[%s5026_s22 + $0x138] sm:$0xff] %v2236_v42  ;;  %2844 = vpow2.f32 %v2009_v52  ;;  %v2237_v0 = vmul.f32 %v2186_v27, %v6065_v17  ;;  %v2238_v25 = vmul.f32 %v2186_v27, %v6066_v37  ;;  %v2239_v10 = vmul.f32 %v2186_v27, %v6067_v38  ;;  %v6069_v57 = vld [vmem:[#allocation95_spill] sm:$0xff]  ;;  %v6073_v32 = vld [vmem:[#allocation44_spill] sm:$0xff] }
 0x255   : > { %2459 = vst.msk [vmem:[%s4988_s20 + $0x28] sm:$0xff] %vm2453_vm7, %v2170_v8  ;;  %2460 = vst.msk [vmem:[%s4988_s20 + $0x30] sm:$0xff] %vm2453_vm7, %v2171_v7  ;;  %v2240_v33 = vmul.f32 %v2186_v27, %v6068_v11  ;;  %v2241_v26 = vmul.f32 %v2186_v27, %v6069_v57  ;;  %v2242_v18 = vmul.f32 %v2186_v27, %v6070_v36  ;;  %v6071_v4 = vld [vmem:[#allocation51_spill] sm:$0xff]  ;;  %v6074_v3 = vld [vmem:[#allocation45_spill] sm:$0xff]  ;;  %vm1409_vm5 = vcmp.eq.f32.partialorder %v5136_v29, inf }
 0x256   : > { %v2243_v58 = vmul.f32 %v2186_v27, %v4391_v63  ;;  %v2244_v15 = vmul.f32 %v2186_v27, %v6071_v4  ;;  %2365 = vst [vmem:[%s5026_s22 + $0x140] sm:$0xff] %v2237_v0  ;;  %2366 = vst [vmem:[%s5026_s22 + $0x148] sm:$0xff] %v2238_v25  ;;  %v2245_v34 = vmul.f32 %v2187_v59, %v6072_v56  ;;  %v6075_v42 = vld [vmem:[#allocation47_spill] sm:$0xff]  ;;  %v6076_v63 = vld [vmem:[#allocation30_spill] sm:$0xff]  ;;  %v2084_v0 = vadd.f32 1.0, %v5256_v45  ;;  %v1920_v38 = vpop.xlane.xlu1 %1919 }
 0x257   : > { %2367 = vst [vmem:[%s5026_s22 + $0x150] sm:$0xff] %v2239_v10  ;;  %2368 = vst [vmem:[%s5026_s22 + $0x158] sm:$0xff] %v2240_v33  ;;  %v2246_v51 = vmul.f32 %v2187_v59, %v6073_v32  ;;  %v2247_v48 = vmul.f32 %v2187_v59, %v6074_v3  ;;  %v2248_v43 = vmul.f32 %v2187_v59, %v6075_v42  ;;  %v6077_v47 = vld [vmem:[#allocation29_spill] sm:$0xff]  ;;  %v6078_v2 = vld [vmem:[#allocation32_spill] sm:$0xff]  ;;  %v1405_v25 = vand.u32 2147483648, %v5117_v50  ;;  %v1929_v36 = vpop.xlane.xlu0 %1928 }
 0x258   : > { %v5274_v44 = vpop.eup %2836  ;;  %2369 = vst [vmem:[%s5026_s22 + $0x160] sm:$0xff] %v2241_v26  ;;  %2370 = vst [vmem:[%s5026_s22 + $0x168] sm:$0xff] %v2242_v18  ;;  %v2249_v49 = vmul.f32 %v2187_v59, %v6076_v63  ;;  %v2250_v52 = vmul.f32 %v2187_v59, %v6077_v47  ;;  %v2251_v8 = vmul.f32 %v2187_v59, %v6078_v2  ;;  %2846 = vlog2.f32 %v2084_v0 }
 0x259   : > { %2371 = vst [vmem:[%s5026_s22 + $0x170] sm:$0xff] %v2243_v58  ;;  %2372 = vst [vmem:[%s5026_s22 + $0x178] sm:$0xff] %v2244_v15  ;;  %v2252_v7 = vmul.f32 %v2187_v59, %v4460_v14  ;;  %v2839_v27 = vpop.eup %2838  ;;  %v1399_v17 = vsel %vm1397_vm2, %v1398_v61, %v1396_v20  ;;  %v2093_v37 = vadd.f32 1.0, %v5274_v44  ;;  %v1456_v14 = vmax.f32 %v5249_v31, 1e-12 }
 0x25a   : > { %2373 = vst [vmem:[%s5026_s22 + $0x180] sm:$0xff] %v2245_v34  ;;  %2374 = vst [vmem:[%s5026_s22 + $0x188] sm:$0xff] %v2246_v51  ;;  %v1403_v59 = vsel %vm1402_vm3, %v5117_v50, %v1401_v41  ;;  %v5303_v1 = vadd.f32 %v4914_v19, %v1902_v40  ;;  %v2841_v61 = vpop.eup %2840  ;;  %v1408_v10 = vmul.f32 %v2839_v27, %v5136_v29  ;;  %v1457_v33 = vmax.f32 %v1399_v17, 1e-12  ;;  %v1938_v42 = vpop.xlane.xlu1 %1937 }
 0x25b   : > { %2375 = vst [vmem:[%s5026_s22 + $0x190] sm:$0xff] %v2247_v48  ;;  %2376 = vst [vmem:[%s5026_s22 + $0x198] sm:$0xff] %v2248_v43  ;;  %v1406_v20 = vsel %vm1404_vm4, %v1405_v25, %v1403_v59  ;;  %v5307_v11 = vadd.f32 %v4914_v19, %v1911_v28  ;;  %2848 = vlog2.f32 %v2093_v37  ;;  %v5310_v31 = vadd.f32 %v4914_v19, %v1920_v38  ;;  %v5342_v28 = vpop.xlane.xlu0 %1308 }
 0x25c   : > { %2377 = vst [vmem:[%s5026_s22 + $0x1a0] sm:$0xff] %v2249_v49  ;;  %2378 = vst [vmem:[%s5026_s22 + $0x1a8] sm:$0xff] %v2250_v52  ;;  %v1458_v57 = vmax.f32 %v1406_v20, 1e-12  ;;  %v1984_v50 = vmin.f32 %v5303_v1, 20.0  ;;  %2850 = vrcp.f32 %v1456_v14  ;;  %v2087_v40 = vmul.f32 -0.5, %v5256_v45 }
 0x25d   : > { %2379 = vst [vmem:[%s5026_s22 + $0x1b0] sm:$0xff] %v2251_v8  ;;  %2380 = vst [vmem:[%s5026_s22 + $0x1b8] sm:$0xff] %v2252_v7  ;;  %v1410_v41 = vsel %vm1409_vm5, %v5136_v29, %v1408_v10  ;;  %v1985_v26 = vmin.f32 %v5307_v11, 20.0  ;;  %2852 = vrcp.f32 %v1457_v33  ;;  %v2096_v58 = vmul.f32 -0.5, %v5274_v44 }
 0x25e   : > { %v1412_v4 = vand.u32 2147483648, %v5136_v29  ;;  %v1986_v15 = vmin.f32 %v5310_v31, 20.0  ;;  %vm1411_vm6 = vcmp.eq.f32.partialorder %v5136_v29, 0.0  ;;  %v1415_v32 = vmul.f32 %v2841_v61, %v5190_v55  ;;  %v5359_v20 = vpop.xlane.xlu1 %1317 }
 0x25f   : > { %vm1416_vm8 = vcmp.eq.f32.partialorder %v5190_v55, inf  ;;  %2854 = vrcp.f32 %v1458_v57  ;;  %v2011_v48 = vmul.f32 1.442695, %v1984_v50  ;;  %vm1964_vm9 = vcmp.gt.f32.partialorder %v5115_v6, 20.0 }
 0x260   : > { %v5317_v18 = vpop.eup %2842  ;;  %v1413_v51 = vsel %vm1411_vm6, %v1412_v4, %v1410_v41  ;;  %v2088_v43 = vadd.f32 1.0, %v2087_v40  ;;  %v2090_v63 = vand.u32 2147483647, %v5256_v45  ;;  %v2013_v49 = vmul.f32 1.442695, %v1985_v26  ;;  %v5367_v26 = vpop.xlane.xlu0 %1326 }
 0x261   : > { %v5322_v56 = vpop.eup %2844  ;;  %v2102_v34 = vadd.f32 1.0, %v5317_v18  ;;  %vm1965_vm10 = vcmp.gt.f32.partialorder %v5134_v16, 20.0  ;;  %v2097_v29 = vadd.f32 1.0, %v2096_v58  ;;  %vm1418_vm11 = vcmp.eq.f32.partialorder %v5190_v55, 0.0 }
 0x262   : > { %v2111_v3 = vadd.f32 1.0, %v5322_v56  ;;  %v2015_v47 = vmul.f32 1.442695, %v1986_v15  ;;  %v1459_v52 = vmax.f32 %v1413_v51, 1e-12  ;;  %v1417_v2 = vsel %vm1416_vm8, %v5190_v55, %v1415_v32 }
 0x263   : > { %2856 = vlog2.f32 %v2102_v34  ;;  %v5337_v8 = vadd.f32 %v4914_v19, %v1929_v36  ;;  %v5340_v7 = vadd.f32 %v4914_v19, %v1938_v42  ;;  %v2099_v27 = vand.u32 2147483647, %v5274_v44 }
 0x264   : > { %2858 = vlog2.f32 %v2111_v3  ;;  %v2105_v17 = vmul.f32 -0.5, %v5317_v18  ;;  %v1419_v0 = vand.u32 2147483648, %v5190_v55  ;;  %v2089_v37 = vmul.f32 %v5256_v45, %v2088_v43  ;;  %v6081_v43 = vld [vmem:[#allocation46_spill] sm:$0xff] }
 0x265   : > { %2860 = vpow2.f32 %v2011_v48  ;;  %vm5348_vm12 = vcmp.lt.f32.partialorder %v2090_v63, 0.0004427343  ;;  %v1987_v38 = vmin.f32 %v5337_v8, 20.0  ;;  %v2847_v19 = vpop.eup %2846  ;;  %v2098_v14 = vmul.f32 %v5274_v44, %v2097_v29 }
 0x266   : > { %2862 = vpow2.f32 %v2013_v49  ;;  %v5356_v59 = vsel %vm1418_vm11, %v1419_v0, %v1417_v2  ;;  %v1988_v61 = vmin.f32 %v5340_v7, 20.0  ;;  %v2086_v10 = vmul.f32 0.6931472, %v2847_v19  ;;  %v6082_v49 = vld [vmem:[#allocation48_spill] sm:$0xff]  ;;  %v6084_v2 = vld [vmem:[#allocation55_spill] sm:$0xff]  ;;  %v6085_v0 = vld [vmem:[#allocation97_spill] sm:$0xff] }
 0x267   : > { %2864 = vpow2.f32 %v2015_v47  ;;  %v2114_v33 = vmul.f32 -0.5, %v5322_v56  ;;  %v2017_v57 = vmul.f32 1.442695, %v1987_v38  ;;  %v2106_v40 = vadd.f32 1.0, %v2105_v17  ;;  %v6083_v47 = vld [vmem:[#allocation50_spill] sm:$0xff]  ;;  %v6087_v19 = vld [vmem:[#allocation49_spill] sm:$0xff] }
 0x268   : > { %v2849_v45 = vpop.eup %2848  ;;  %2866 = vrcp.f32 %v1459_v52  ;;  %v2019_v41 = vmul.f32 1.442695, %v1988_v61  ;;  %v2092_v55 = vsel %vm5348_vm12, %v2089_v37, %v2086_v10  ;;  %vm2100_vm13 = vcmp.lt.f32.partialorder %v2099_v27, 0.0004427343  ;;  %v6086_v37 = vld [vmem:[#allocation41_spill] sm:$0xff] }
 0x269   : > { %v2095_v50 = vmul.f32 0.6931472, %v2849_v45  ;;  %2868 = vrsqrt.f32 %v5342_v28  ;;  %v2108_v44 = vand.u32 2147483647, %v5317_v18  ;;  %v2851_v36 = vpop.eup %2850  ;;  %v2172_v58 = vsel %vm1964_vm9, %v5115_v6, %v2092_v55  ;;  %v6088_v45 = vld [vmem:[#allocation54_spill] sm:$0xff]  ;;  %v6092_v55 = vld [vmem:[#allocation53_spill] sm:$0xff] }
 0x26a   : > { %2870 = vrsqrt.f32 %v5359_v20  ;;  %v2117_v15 = vand.u32 2147483647, %v5322_v56  ;;  %v2853_v34 = vpop.eup %2852  ;;  %v2188_v32 = vmul.f32 %v2851_v36, %v2172_v58  ;;  %2461 = vst.msk [vmem:[%s4988_s20 + $0x38] sm:$0xff] %vm2453_vm7, %v2172_v58  ;;  %vm1966_vm14 = vcmp.gt.f32.partialorder %v5188_v35, 20.0  ;;  %v6093_v58 = vld [vmem:[#allocation63_spill] sm:$0xff] }
 0x26b   : > { %v2101_v4 = vsel %vm2100_vm13, %v2098_v14, %v2095_v50  ;;  %2872 = vpow2.f32 %v2017_v57  ;;  %vm1967_vm15 = vcmp.gt.f32.partialorder %v5202_v5, 20.0  ;;  %v1460_v3 = vmax.f32 %v5356_v59, 1e-12  ;;  %v5393_v59 = vpop.xlane.xlu1 %1335  ;;  %v6090_v50 = vld [vmem:[#allocation57_spill] sm:$0xff] }
 0x26c   : > { %v2173_v51 = vsel %vm1965_vm10, %v5134_v16, %v2101_v4  ;;  %2874 = vpow2.f32 %v2019_v41  ;;  %v2107_v48 = vmul.f32 %v5317_v18, %v2106_v40  ;;  %v2115_v42 = vadd.f32 1.0, %v2114_v33  ;;  %v2855_v16 = vpop.eup %2854  ;;  %v6089_v33 = vld [vmem:[#allocation56_spill] sm:$0xff] }
 0x26d   : > { %v2189_v6 = vmul.f32 %v2853_v34, %v2173_v51  ;;  %2462 = vst.msk [vmem:[%s4988_s20 + $0x40] sm:$0xff] %vm2453_vm7, %v2173_v51  ;;  %2876 = vrsqrt.f32 %v5367_v26  ;;  %v2253_v63 = vmul.f32 %v2188_v32, %v6081_v43  ;;  %v2254_v29 = vmul.f32 %v2188_v32, %v6082_v49  ;;  %v6094_v34 = vld [vmem:[#allocation52_spill] sm:$0xff]  ;;  %v6095_v51 = vld [vmem:[#allocation122_spill] sm:$0xff] }
 0x26e   : > { %v2255_v52 = vmul.f32 %v2188_v32, %v6083_v47  ;;  %v2256_v27 = vmul.f32 %v2188_v32, %v6084_v2  ;;  %v2257_v18 = vmul.f32 %v2188_v32, %v6085_v0  ;;  %v2258_v25 = vmul.f32 %v2188_v32, %v6086_v37 }
 0x26f   : > { %v2259_v38 = vmul.f32 %v2188_v32, %v4478_v21  ;;  %v2260_v14 = vmul.f32 %v2188_v32, %v6087_v19  ;;  %2381 = vst [vmem:[%s5026_s22 + $0x1c0] sm:$0xff] %v2253_v63  ;;  %2382 = vst [vmem:[%s5026_s22 + $0x1c8] sm:$0xff] %v2254_v29  ;;  %v2261_v10 = vmul.f32 %v2189_v6, %v6088_v45  ;;  %v6091_v21 = vld [vmem:[#allocation59_spill] sm:$0xff]  ;;  %2878 = vrsqrt.f32 %v5393_v59  ;;  %v6097_v45 = vld [vmem:[#allocation60_spill] sm:$0xff] }
 0x270   : > { %v2857_v17 = vpop.eup %2856  ;;  %2383 = vst [vmem:[%s5026_s22 + $0x1d0] sm:$0xff] %v2255_v52  ;;  %2384 = vst [vmem:[%s5026_s22 + $0x1d8] sm:$0xff] %v2256_v27  ;;  %v2262_v57 = vmul.f32 %v2189_v6, %v6089_v33  ;;  %v2263_v40 = vmul.f32 %v2189_v6, %v6090_v50  ;;  %v2264_v41 = vmul.f32 %v2189_v6, %v6091_v21  ;;  %vm2109_vm0 = vcmp.lt.f32.partialorder %v2108_v44, 0.0004427343  ;;  %v6098_v33 = vld [vmem:[#allocation62_spill] sm:$0xff] }
 0x271   : > { %v2859_v61 = vpop.eup %2858  ;;  %2385 = vst [vmem:[%s5026_s22 + $0x1e0] sm:$0xff] %v2257_v18  ;;  %2386 = vst [vmem:[%s5026_s22 + $0x1e8] sm:$0xff] %v2258_v25  ;;  %v2265_v36 = vmul.f32 %v2189_v6, %v6092_v55  ;;  %v2266_v4 = vmul.f32 %v2189_v6, %v6093_v58  ;;  %v2267_v32 = vmul.f32 %v2189_v6, %v6094_v34  ;;  %v2104_v49 = vmul.f32 0.6931472, %v2857_v17  ;;  %v6099_v50 = vld [vmem:[#allocation66_spill] sm:$0xff] }
 0x272   : > { %2387 = vst [vmem:[%s5026_s22 + $0x1f0] sm:$0xff] %v2259_v38  ;;  %2388 = vst [vmem:[%s5026_s22 + $0x1f8] sm:$0xff] %v2260_v14  ;;  %v2268_v43 = vmul.f32 %v2189_v6, %v6095_v51  ;;  %v5411_v63 = vpop.eup %2860  ;;  %v2113_v29 = vmul.f32 0.6931472, %v2859_v61  ;;  %v2116_v47 = vmul.f32 %v5322_v56, %v2115_v42  ;;  %vm2118_vm1 = vcmp.lt.f32.partialorder %v2117_v15, 0.0004427343 }
 0x273   : > { %2389 = vst [vmem:[%s5026_s22 + $0x200] sm:$0xff] %v2261_v10  ;;  %2390 = vst [vmem:[%s5026_s22 + $0x208] sm:$0xff] %v2262_v57  ;;  %v5419_v52 = vpop.eup %2862  ;;  %v2120_v6 = vadd.f32 1.0, %v5411_v63  ;;  %v2123_v2 = vmul.f32 -0.5, %v5411_v63  ;;  %v2110_v17 = vsel %vm2109_vm0, %v2107_v48, %v2104_v49  ;;  %2880 = vrcp.f32 %v1460_v3  ;;  %v6096_v14 = vld [vmem:[#allocation58_spill] sm:$0xff]  ;;  %v6102_v51 = vld [vmem:[#allocation65_spill] sm:$0xff] }
 0x274   : > { %2391 = vst [vmem:[%s5026_s22 + $0x210] sm:$0xff] %v2263_v40  ;;  %2392 = vst [vmem:[%s5026_s22 + $0x218] sm:$0xff] %v2264_v41  ;;  %v5427_v27 = vpop.eup %2864  ;;  %v2119_v56 = vsel %vm2118_vm1, %v2116_v47, %v2113_v29  ;;  %v2129_v42 = vadd.f32 1.0, %v5419_v52  ;;  %v2174_v18 = vsel %vm1966_vm14, %v5188_v35, %v2110_v17  ;;  %v1426_v3 = vand.u32 2147483648, %v5342_v28  ;;  %v6100_v41 = vld [vmem:[#allocation69_spill] sm:$0xff]  ;;  %v6103_v49 = vld [vmem:[#allocation67_spill] sm:$0xff] }
 0x275   : > { %2393 = vst [vmem:[%s5026_s22 + $0x220] sm:$0xff] %v2265_v36  ;;  %2394 = vst [vmem:[%s5026_s22 + $0x228] sm:$0xff] %v2266_v4  ;;  %v2867_v0 = vpop.eup %2866  ;;  %v2175_v44 = vsel %vm1967_vm15, %v5202_v5, %v2119_v56  ;;  %2882 = vlog2.f32 %v2120_v6  ;;  %v2190_v37 = vmul.f32 %v2855_v16, %v2174_v18  ;;  %v2124_v35 = vadd.f32 1.0, %v2123_v2  ;;  %v6101_v36 = vld [vmem:[#allocation71_spill] sm:$0xff]  ;;  %v6104_v47 = vld [vmem:[#allocation68_spill] sm:$0xff] }
 0x276   : > { %2395 = vst [vmem:[%s5026_s22 + $0x230] sm:$0xff] %v2267_v32  ;;  %2396 = vst [vmem:[%s5026_s22 + $0x238] sm:$0xff] %v2268_v43  ;;  %v5436_v15 = vpop.eup %2868  ;;  %v2191_v48 = vmul.f32 %v2867_v0, %v2175_v44  ;;  %2884 = vlog2.f32 %v2129_v42  ;;  %v2126_v38 = vand.u32 2147483647, %v5411_v63  ;;  %v2132_v5 = vmul.f32 -0.5, %v5419_v52  ;;  %v6105_v2 = vld [vmem:[#allocation74_spill] sm:$0xff] }
 0x277   : > { %2463 = vst.msk [vmem:[%s4988_s20 + $0x48] sm:$0xff] %vm2453_vm7, %v2174_v18  ;;  %2464 = vst.msk [vmem:[%s4988_s20 + $0x50] sm:$0xff] %vm2453_vm7, %v2175_v44  ;;  %v5443_v25 = vpop.eup %2870  ;;  %v2138_v16 = vadd.f32 1.0, %v5427_v27  ;;  %v2269_v61 = vmul.f32 %v2190_v37, %v6096_v14  ;;  %v2270_v10 = vmul.f32 %v2190_v37, %v6097_v45  ;;  %v2271_v57 = vmul.f32 %v2190_v37, %v6098_v33  ;;  %v6107_v56 = vld [vmem:[#allocation81_spill] sm:$0xff]  ;;  %v6118_v33 = vld [vmem:[#allocation72_spill] sm:$0xff] }
 0x278   : > { %v5448_v19 = vpop.eup %2872  ;;  %v2272_v40 = vmul.f32 %v2190_v37, %v6099_v50  ;;  %v2273_v55 = vmul.f32 %v2190_v37, %v6100_v41  ;;  %v2274_v58 = vmul.f32 %v2190_v37, %v6101_v36  ;;  %v2275_v4 = vmul.f32 %v2190_v37, %v4601_v46 }
 0x279   : > { %v5454_v21 = vpop.eup %2874  ;;  %v2276_v34 = vmul.f32 %v2190_v37, %v4624_v22  ;;  %2397 = vst [vmem:[%s5026_s22 + $0x240] sm:$0xff] %v2269_v61  ;;  %2398 = vst [vmem:[%s5026_s22 + $0x248] sm:$0xff] %v2270_v10  ;;  %v2277_v43 = vmul.f32 %v2191_v48, %v6102_v51  ;;  %v2278_v29 = vmul.f32 %v2191_v48, %v6103_v49  ;;  %vm1423_vm2 = vcmp.eq.f32.partialorder %v5342_v28, inf  ;;  %v6106_v22 = vld [vmem:[#allocation61_spill] sm:$0xff]  ;;  %v6117_v61 = vld [vmem:[#allocation86_spill] sm:$0xff] }
 0x27a   : > { %v2877_v32 = vpop.eup %2876  ;;  %2399 = vst [vmem:[%s5026_s22 + $0x250] sm:$0xff] %v2271_v57  ;;  %2400 = vst [vmem:[%s5026_s22 + $0x258] sm:$0xff] %v2272_v40  ;;  %v2279_v6 = vmul.f32 %v2191_v48, %v6104_v47  ;;  %v2280_v46 = vmul.f32 %v2191_v48, %v6105_v2  ;;  %vm1430_vm3 = vcmp.eq.f32.partialorder %v5359_v20, inf  ;;  %v2281_v17 = vmul.f32 %v2191_v48, %v6106_v22 }
 0x27b   : > { %2401 = vst [vmem:[%s5026_s22 + $0x260] sm:$0xff] %v2273_v55  ;;  %2402 = vst [vmem:[%s5026_s22 + $0x268] sm:$0xff] %v2274_v58  ;;  %v2282_v42 = vmul.f32 %v2191_v48, %v6107_v56  ;;  %v2283_v0 = vmul.f32 %v2191_v48, %v4656_v12  ;;  %v2284_v18 = vmul.f32 %v2191_v48, %v4670_v60  ;;  %vm1425_vm4 = vcmp.eq.f32.partialorder %v5342_v28, 0.0 }
 0x27c   : > { %2403 = vst [vmem:[%s5026_s22 + $0x270] sm:$0xff] %v2275_v4  ;;  %2404 = vst [vmem:[%s5026_s22 + $0x278] sm:$0xff] %v2276_v34  ;;  %v2133_v44 = vadd.f32 1.0, %v2132_v5  ;;  %v2135_v37 = vand.u32 2147483647, %v5419_v52  ;;  %2886 = vlog2.f32 %v2138_v16  ;;  %vm1432_vm5 = vcmp.eq.f32.partialorder %v5359_v20, 0.0  ;;  %v2879_v16 = vpop.eup %2878 }
 0x27d   : > { %2405 = vst [vmem:[%s5026_s22 + $0x280] sm:$0xff] %v2277_v43  ;;  %2406 = vst [vmem:[%s5026_s22 + $0x288] sm:$0xff] %v2278_v29  ;;  %vm1968_vm6 = vcmp.gt.f32.partialorder %v5303_v1, 20.0  ;;  %v2147_v12 = vadd.f32 1.0, %v5448_v19  ;;  %v1433_v60 = vand.u32 2147483648, %v5359_v20  ;;  %vm1437_vm8 = vcmp.eq.f32.partialorder %v5367_v26, inf }
 0x27e   : > { %2407 = vst [vmem:[%s5026_s22 + $0x290] sm:$0xff] %v2279_v6  ;;  %2408 = vst [vmem:[%s5026_s22 + $0x298] sm:$0xff] %v2280_v46  ;;  %vm1439_vm9 = vcmp.eq.f32.partialorder %v5367_v26, 0.0  ;;  %vm1969_vm10 = vcmp.gt.f32.partialorder %v5307_v11, 20.0  ;;  %v2156_v48 = vadd.f32 1.0, %v5454_v21  ;;  %v1440_v5 = vand.u32 2147483648, %v5367_v26 }
 0x27f   : > { %2409 = vst [vmem:[%s5026_s22 + $0x2a0] sm:$0xff] %v2281_v17  ;;  %2410 = vst [vmem:[%s5026_s22 + $0x2a8] sm:$0xff] %v2282_v42  ;;  %vm1444_vm11 = vcmp.eq.f32.partialorder %v5393_v59, inf  ;;  %vm1446_vm12 = vcmp.eq.f32.partialorder %v5393_v59, 0.0  ;;  %v2125_v14 = vmul.f32 %v5411_v63, %v2124_v35  ;;  %vm5500_vm13 = vcmp.lt.f32.partialorder %v2126_v38, 0.0004427343 }
 0x280   : > { %2411 = vst [vmem:[%s5026_s22 + $0x2b0] sm:$0xff] %v2283_v0  ;;  %2412 = vst [vmem:[%s5026_s22 + $0x2b8] sm:$0xff] %v2284_v18  ;;  %2888 = vlog2.f32 %v2147_v12  ;;  %v1447_v45 = vand.u32 2147483648, %v5393_v59  ;;  %v2134_v10 = vmul.f32 %v5419_v52, %v2133_v44  ;;  %vm5506_vm14 = vcmp.lt.f32.partialorder %v2135_v37, 0.0004427343  ;;  %v2881_v50 = vpop.eup %2880  ;;  %v6112_v44 = vld [vmem:[#allocation73_spill] sm:$0xff] }
 0x281   : > { %v2141_v57 = vmul.f32 -0.5, %v5427_v27  ;;  %2890 = vlog2.f32 %v2156_v48  ;;  %v2144_v40 = vand.u32 2147483647, %v5427_v27  ;;  %v1422_v63 = vmul.f32 %v5436_v15, %v5342_v28  ;;  %v6113_v12 = vld [vmem:[#allocation75_spill] sm:$0xff] }
 0x282   : > { %v1429_v35 = vmul.f32 %v5443_v25, %v5359_v20  ;;  %v1436_v38 = vmul.f32 %v2877_v32, %v5367_v26  ;;  %v2883_v41 = vpop.eup %2882  ;;  %v2150_v52 = vmul.f32 -0.5, %v5448_v19  ;;  %v2153_v55 = vand.u32 2147483647, %v5448_v19 }
 0x283   : > { %v2159_v36 = vmul.f32 -0.5, %v5454_v21  ;;  %v1443_v58 = vmul.f32 %v2879_v16, %v5393_v59  ;;  %v2885_v4 = vpop.eup %2884  ;;  %v2122_v34 = vmul.f32 0.6931472, %v2883_v41  ;;  %v1424_v15 = vsel %vm1423_vm2, %v5342_v28, %v1422_v63  ;;  %v6116_v16 = vld [vmem:[#allocation64_spill] sm:$0xff] }
 0x284   : > { %v1431_v25 = vsel %vm1430_vm3, %v5359_v20, %v1429_v35  ;;  %v1438_v32 = vsel %vm1437_vm8, %v5367_v26, %v1436_v38  ;;  %v2131_v51 = vmul.f32 0.6931472, %v2885_v4  ;;  %v1427_v43 = vsel %vm1425_vm4, %v1426_v3, %v1424_v15 }
 0x285   : > { %v1434_v49 = vsel %vm1432_vm5, %v1433_v60, %v1431_v25  ;;  %v1441_v29 = vsel %vm1439_vm9, %v1440_v5, %v1438_v32  ;;  %v2128_v47 = vsel %vm5500_vm13, %v2125_v14, %v2122_v34  ;;  %v2142_v6 = vadd.f32 1.0, %v2141_v57  ;;  %v6119_v32 = vld [vmem:[#allocation77_spill] sm:$0xff] }
 0x286   : > { %v1461_v2 = vmax.f32 %v1427_v43, 1e-12  ;;  %v1462_v46 = vmax.f32 %v1434_v49, 1e-12  ;;  %v2176_v22 = vsel %vm1968_vm6, %v5303_v1, %v2128_v47  ;;  %v2137_v28 = vsel %vm5506_vm14, %v2134_v10, %v2131_v51  ;;  %v6121_v49 = vld [vmem:[#allocation80_spill] sm:$0xff] }
 0x287   : > { %v1463_v3 = vmax.f32 %v1441_v29, 1e-12  ;;  %v1445_v20 = vsel %vm1444_vm11, %v5393_v59, %v1443_v58  ;;  %v2192_v26 = vmul.f32 %v2881_v50, %v2176_v22  ;;  %2465 = vst.msk [vmem:[%s4988_s20 + $0x58] sm:$0xff] %vm2453_vm7, %v2176_v22  ;;  %v2177_v17 = vsel %vm1969_vm10, %v5307_v11, %v2137_v28  ;;  %v6114_v11 = vld [vmem:[#allocation76_spill] sm:$0xff]  ;;  %v6115_v59 = vld [vmem:[#allocation78_spill] sm:$0xff]  ;;  %v6124_v22 = vld [vmem:[#allocation89_spill] sm:$0xff] }
 0x288   : > { %2892 = vrcp.f32 %v1461_v2  ;;  %v1448_v1 = vsel %vm1446_vm12, %v1447_v45, %v1445_v20  ;;  %2466 = vst.msk [vmem:[%s4988_s20 + $0x60] sm:$0xff] %vm2453_vm7, %v2177_v17  ;;  %v2151_v56 = vadd.f32 1.0, %v2150_v52  ;;  %v2160_v42 = vadd.f32 1.0, %v2159_v36  ;;  %v6122_v47 = vld [vmem:[#allocation88_spill] sm:$0xff]  ;;  %v6123_v2 = vld [vmem:[#allocation70_spill] sm:$0xff] }
 0x289   : > { %2894 = vrcp.f32 %v1462_v46  ;;  %v1464_v0 = vmax.f32 %v1448_v1, 1e-12  ;;  %v2887_v18 = vpop.eup %2886  ;;  %v2285_v37 = vmul.f32 %v2192_v26, %v6112_v44  ;;  %v2286_v60 = vmul.f32 %v2192_v26, %v6113_v12  ;;  %v6126_v1 = vld [vmem:[#allocation83_spill] sm:$0xff] }
 0x28a   : > { %v2287_v48 = vmul.f32 %v2192_v26, %v6114_v11  ;;  %v2288_v5 = vmul.f32 %v2192_v26, %v6115_v59  ;;  %v2289_v14 = vmul.f32 %v2192_v26, %v6116_v16  ;;  %v2290_v45 = vmul.f32 %v2192_v26, %v6117_v61  ;;  %v6131_v11 = vld [vmem:[#allocation125_spill] sm:$0xff]  ;;  %v6132_v61 = vld [vmem:[#allocation91_spill] sm:$0xff] }
 0x28b   : > { %v2291_v10 = vmul.f32 %v2192_v26, %v4686_v53  ;;  %v2292_v57 = vmul.f32 %v2192_v26, %v6118_v33  ;;  %2413 = vst [vmem:[%s5026_s22 + $0x2c0] sm:$0xff] %v2285_v37  ;;  %2414 = vst [vmem:[%s5026_s22 + $0x2c8] sm:$0xff] %v2286_v60  ;;  %v2140_v50 = vmul.f32 0.6931472, %v2887_v18  ;;  %v2143_v63 = vmul.f32 %v5427_v27, %v2142_v6  ;;  %v6128_v18 = vld [vmem:[#allocation85_spill] sm:$0xff]  ;;  %v6129_v37 = vld [vmem:[#allocation92_spill] sm:$0xff] }
 0x28c   : > { %2415 = vst [vmem:[%s5026_s22 + $0x2d0] sm:$0xff] %v2287_v48  ;;  %2416 = vst [vmem:[%s5026_s22 + $0x2d8] sm:$0xff] %v2288_v5  ;;  %v2162_v35 = vand.u32 2147483647, %v5454_v21  ;;  %2896 = vrcp.f32 %v1463_v3  ;;  %vm2145_vm15 = vcmp.lt.f32.partialorder %v2144_v40, 0.0004427343  ;;  %v2152_v27 = vmul.f32 %v5448_v19, %v2151_v56 }
 0x28d   : > { %v2889_v38 = vpop.eup %2888  ;;  %2417 = vst [vmem:[%s5026_s22 + $0x2e0] sm:$0xff] %v2289_v14  ;;  %2418 = vst [vmem:[%s5026_s22 + $0x2e8] sm:$0xff] %v2290_v45  ;;  %2898 = vrcp.f32 %v1464_v0  ;;  %vm1970_vm0 = vcmp.gt.f32.partialorder %v5310_v31, 20.0  ;;  %v2146_v41 = vsel %vm2145_vm15, %v2143_v63, %v2140_v50  ;;  %vm2154_vm1 = vcmp.lt.f32.partialorder %v2153_v55, 0.0004427343  ;;  %v6125_v3 = vld [vmem:[#allocation124_spill] sm:$0xff] }
 0x28e   : > { %2419 = vst [vmem:[%s5026_s22 + $0x2f0] sm:$0xff] %v2291_v10  ;;  %2420 = vst [vmem:[%s5026_s22 + $0x2f8] sm:$0xff] %v2292_v57  ;;  %v2891_v53 = vpop.eup %2890  ;;  %v2149_v52 = vmul.f32 0.6931472, %v2889_v38  ;;  %v2178_v36 = vsel %vm1970_vm0, %v5310_v31, %v2146_v41  ;;  %v2161_v4 = vmul.f32 %v5454_v21, %v2160_v42  ;;  %vm1971_vm2 = vcmp.gt.f32.partialorder %v5337_v8, 20.0  ;;  %v6127_v42 = vld [vmem:[#allocation84_spill] sm:$0xff] }
 0x28f   : > { %v2158_v58 = vmul.f32 0.6931472, %v2891_v53  ;;  %2467 = vst.msk [vmem:[%s4988_s20 + $0x68] sm:$0xff] %vm2453_vm7, %v2178_v36  ;;  %vm2163_vm3 = vcmp.lt.f32.partialorder %v2162_v35, 0.0004427343  ;;  %vm1972_vm4 = vcmp.gt.f32.partialorder %v5340_v7, 20.0 }
 0x290   : > { %v2155_v40 = vsel %vm2154_vm1, %v2152_v27, %v2149_v52  ;;  %v6133_v45 = vld [vmem:[#allocation93_spill] sm:$0xff]  ;;  %v6134_v10 = vld [vmem:[#allocation94_spill] sm:$0xff]  ;;  %v6137_v38 = vld [vmem:[#allocation87_spill] sm:$0xff] }
 0x291   : > { %v2179_v34 = vsel %vm1971_vm2, %v5337_v8, %v2155_v40  ;;  %v2164_v15 = vsel %vm2163_vm3, %v2161_v4, %v2158_v58  ;;  %v6120_v8 = vld [vmem:[#allocation79_spill] sm:$0xff]  ;;  %v6135_v57 = vld [vmem:[#allocation98_spill] sm:$0xff]  ;;  %v6138_v27 = vld [vmem:[#allocation96_spill] sm:$0xff] }
 0x292   : > { %2468 = vst.msk [vmem:[%s4988_s20 + $0x70] sm:$0xff] %vm2453_vm7, %v2179_v34  ;;  %v2180_v19 = vsel %vm1972_vm4, %v5340_v7, %v2164_v15  ;;  %v6136_v63 = vld [vmem:[#allocation82_spill] sm:$0xff]  ;;  %v6139_v58 = vld [vmem:[#allocation99_spill] sm:$0xff]  ;;  %v6140_v40 = vld [vmem:[#allocation100_spill] sm:$0xff] }
 0x293   : > { %2469 = vst.msk [vmem:[%s4988_s20 + $0x78] sm:$0xff] %vm2453_vm7, %v2180_v19  ;;  %v6141_v15 = vld [vmem:[#allocation102_spill] sm:$0xff] }
 0x295   : > { %v2893_v31 = vpop.eup %2892 }
 0x296   : > { %v2895_v21 = vpop.eup %2894  ;;  %v2193_v55 = vmul.f32 %v2893_v31, %v2177_v17 }
 0x297   : > { %v2194_v25 = vmul.f32 %v2895_v21, %v2178_v36 }
 0x298   : > { %v2293_v51 = vmul.f32 %v2193_v55, %v6119_v32  ;;  %v2294_v43 = vmul.f32 %v2193_v55, %v6120_v8  ;;  %v2295_v29 = vmul.f32 %v2193_v55, %v6121_v49  ;;  %v2296_v6 = vmul.f32 %v2193_v55, %v6122_v47 }
 0x299   : > { %v2897_v7 = vpop.eup %2896  ;;  %v2297_v46 = vmul.f32 %v2193_v55, %v6123_v2  ;;  %v2298_v28 = vmul.f32 %v2193_v55, %v6124_v22  ;;  %v2299_v20 = vmul.f32 %v2193_v55, %v6125_v3  ;;  %v2300_v26 = vmul.f32 %v2193_v55, %v4750_v30  ;;  %v6130_v30 = vld [vmem:[#allocation123_spill] sm:$0xff] }
 0x29a   : > { %v2899_v17 = vpop.eup %2898  ;;  %2421 = vst [vmem:[%s5026_s22 + $0x300] sm:$0xff] %v2293_v51  ;;  %2422 = vst [vmem:[%s5026_s22 + $0x308] sm:$0xff] %v2294_v43  ;;  %v2301_v56 = vmul.f32 %v2194_v25, %v6126_v1  ;;  %v2302_v0 = vmul.f32 %v2194_v25, %v6127_v42  ;;  %v2303_v44 = vmul.f32 %v2194_v25, %v6128_v18 }
 0x29b   : > { %2423 = vst [vmem:[%s5026_s22 + $0x310] sm:$0xff] %v2295_v29  ;;  %2424 = vst [vmem:[%s5026_s22 + $0x318] sm:$0xff] %v2296_v6  ;;  %v2304_v12 = vmul.f32 %v2194_v25, %v6129_v37  ;;  %v2305_v60 = vmul.f32 %v2194_v25, %v6130_v30  ;;  %v2306_v48 = vmul.f32 %v2194_v25, %v6131_v11 }
 0x29c   : > { %2425 = vst [vmem:[%s5026_s22 + $0x320] sm:$0xff] %v2297_v46  ;;  %2426 = vst [vmem:[%s5026_s22 + $0x328] sm:$0xff] %v2298_v28  ;;  %v2307_v59 = vmul.f32 %v2194_v25, %v4783_v62  ;;  %v2308_v5 = vmul.f32 %v2194_v25, %v4812_v23  ;;  %v2195_v16 = vmul.f32 %v2897_v7, %v2179_v34 }
 0x29d   : > { %2427 = vst [vmem:[%s5026_s22 + $0x330] sm:$0xff] %v2299_v20  ;;  %2428 = vst [vmem:[%s5026_s22 + $0x338] sm:$0xff] %v2300_v26  ;;  %v2196_v14 = vmul.f32 %v2899_v17, %v2180_v19 }
 0x29e   : > { %2429 = vst [vmem:[%s5026_s22 + $0x340] sm:$0xff] %v2301_v56  ;;  %2430 = vst [vmem:[%s5026_s22 + $0x348] sm:$0xff] %v2302_v0  ;;  %v2309_v62 = vmul.f32 %v2195_v16, %v6132_v61  ;;  %v2310_v23 = vmul.f32 %v2195_v16, %v6133_v45  ;;  %v2311_v33 = vmul.f32 %v2195_v16, %v6134_v10 }
 0x29f   : > { %2431 = vst [vmem:[%s5026_s22 + $0x350] sm:$0xff] %v2303_v44  ;;  %2432 = vst [vmem:[%s5026_s22 + $0x358] sm:$0xff] %v2304_v12  ;;  %v2312_v50 = vmul.f32 %v2195_v16, %v6135_v57  ;;  %v2313_v35 = vmul.f32 %v2195_v16, %v6136_v63  ;;  %v2314_v53 = vmul.f32 %v2195_v16, %v6137_v38 }
 0x2a0   : > { %2433 = vst [vmem:[%s5026_s22 + $0x360] sm:$0xff] %v2305_v60  ;;  %2434 = vst [vmem:[%s5026_s22 + $0x368] sm:$0xff] %v2306_v48  ;;  %v2315_v41 = vmul.f32 %v2195_v16, %v4828_v13  ;;  %v2316_v52 = vmul.f32 %v2195_v16, %v4844_v39  ;;  %v2317_v36 = vmul.f32 %v2196_v14, %v6138_v27  ;;  %v6142_v13 = vld [vmem:[#allocation126_spill] sm:$0xff] }
 0x2a1   : > { %2435 = vst [vmem:[%s5026_s22 + $0x370] sm:$0xff] %v2307_v59  ;;  %2436 = vst [vmem:[%s5026_s22 + $0x378] sm:$0xff] %v2308_v5  ;;  %v2318_v4 = vmul.f32 %v2196_v14, %v6139_v58  ;;  %v2319_v34 = vmul.f32 %v2196_v14, %v6140_v40  ;;  %v2320_v19 = vmul.f32 %v2196_v14, %v6141_v15 }
 0x2a2   : > { %2437 = vst [vmem:[%s5026_s22 + $0x380] sm:$0xff] %v2309_v62  ;;  %2438 = vst [vmem:[%s5026_s22 + $0x388] sm:$0xff] %v2310_v23  ;;  %v2321_v39 = vmul.f32 %v2196_v14, %v6142_v13  ;;  %v2322_v31 = vmul.f32 %v2196_v14, %v4838_v24  ;;  %v2323_v21 = vmul.f32 %v2196_v14, %v4847_v54 }
 0x2a3   : > { %2439 = vst [vmem:[%s5026_s22 + $0x390] sm:$0xff] %v2311_v33  ;;  %2440 = vst [vmem:[%s5026_s22 + $0x398] sm:$0xff] %v2312_v50  ;;  %v2324_v55 = vmul.f32 %v2196_v14, %v4872_v9 }
 0x2a4   : > { %2441 = vst [vmem:[%s5026_s22 + $0x3a0] sm:$0xff] %v2313_v35  ;;  %2442 = vst [vmem:[%s5026_s22 + $0x3a8] sm:$0xff] %v2314_v53 }
 0x2a5   : > { %2443 = vst [vmem:[%s5026_s22 + $0x3b0] sm:$0xff] %v2315_v41  ;;  %2444 = vst [vmem:[%s5026_s22 + $0x3b8] sm:$0xff] %v2316_v52 }
 0x2a6   : > { %2445 = vst [vmem:[%s5026_s22 + $0x3c0] sm:$0xff] %v2317_v36  ;;  %2446 = vst [vmem:[%s5026_s22 + $0x3c8] sm:$0xff] %v2318_v4 }
 0x2a7   : > { %2447 = vst [vmem:[%s5026_s22 + $0x3d0] sm:$0xff] %v2319_v34  ;;  %2448 = vst [vmem:[%s5026_s22 + $0x3d8] sm:$0xff] %v2320_v19 }
 0x2a8   : > { %2449 = vst [vmem:[%s5026_s22 + $0x3e0] sm:$0xff] %v2321_v39  ;;  %2450 = vst [vmem:[%s5026_s22 + $0x3e8] sm:$0xff] %v2322_v31 }
 0x2a9   : > { %2451 = vst [vmem:[%s5026_s22 + $0x3f0] sm:$0xff] %v2323_v21  ;;  %2452 = vst [vmem:[%s5026_s22 + $0x3f8] sm:$0xff] %v2324_v55 }
 0x2aa   : > { %2991 = shalt.err (!%p2988_p10)
}
 0x2ab   : > { %s2992_s16 = scalar_lea.hbm %s5642_s11, 16384  ;;  %s2996_s19 = scalar_lea.hbm %s5709_s5, 65536 }
 0x2ac   : > { %p2993_p7 = scmp.ne.s32.totalorder %s5642_s11, %s2992_s16  ;;  %p2997_p11 = scmp.lt.s32.totalorder %s5642_s11, %s5709_s5 }
 0x2ad   : > { %p2998_p0 = scmp.lt.s32.totalorder %s2996_s19, %s2992_s16 }
 0x2ae   : > { %p2994_p8 = pnand %p2993_p7, %p6143_p2 }
 0x2af   : > { %p2999_p12 = por %p2998_p0, %p2997_p11 }
 0x2b0   : > { %p2995_p13 = pneg %p2994_p8 }
 0x2b2   : > { %p3000_p1 = pnand %p2999_p12, %p2995_p13 }
 0x2b4   : > { %3003 = shalt.err (!%p3000_p1)
}
 0x2b5   : > { %s3053_s22 = smov 1024   ;;  %s3054_s27 = smov 64  }
 0x2b6   : > { %2711 = dma.vmem_to_hbm [thread:$0]  (%p6143_p2), %s5644_s29, 16384, %s5642_s11, %s5664_s12, %s3053_s22, %s3053_s22, %s3054_s27  }
 0x2b7 PF: > { %p2733_p9 = scmp.ge.s32.totalorder %s3046_s26, 2  ;;  %s2509_s4 = sand.u32 1, %s3034_s23  }
 0x2b8   : > { %p6144_p3 = scmp.ne.s32.totalorder %s5823_s9, 0  ;;  %s2510_s30 = scalar_lea.sflag [#allocation5], %s2509_s4 }
 0x2ba   : > { %p2724_p4 = pnand %p2733_p9, %p6144_p3 }
 0x2bc   : > { %p2725_p5 = pneg %p2724_p4 }
 0x2be   : > { %3029 = dma.done.wait (%p2725_p5), %s2510_s30, 16384  }
 0x2bf   : > { %3031 = vsyncadd (%p2725_p5), %s2510_s30, 4294950912  ;;  %p20_p6 = scmp.ge.s32.totalorder %s3118_s28, 6   ;;  %s6145_s23 = smov %s3038_s24 }
 0x2c0   : > { %s6146_s24 = smov %s3042_s25  ;;  %s6147_s25 = smov %s3129_s7 }
 0x2c1   : > { %s6148_s26 = smov %s3118_s28  ;;  %22 = sbr.rel (!%p20_p6) target bundleno = 7 (0x7), region = 100 }
 0x2c6   :  { %2523 = vsyncpa [#allocation4], 1 }
 0x2c7   :  { %2525 = vsyncpa [#allocation4 + $0x1], 1 }
 0x2c8   :  { %2526 = vsyncpa [#allocation7], 1 }
 0x2c9   :  { %2527 = vsyncpa [#allocation5], 1 }
 0x2ca   :  { %2529 = vsyncpa [#allocation5 + $0x1], 1 }

</bundles_post_ra>
